<compile_context>
chip_gen: v7x
topology: tpu7x:2x2x1
jax: 0.10.0
libtpu: 0.0.40
codegen_flags: <defaults>
</compile_context>

<pallas_src>
import functools

import jax
import jax.numpy as jnp
from jax.experimental import pallas as pl
from jax.experimental.pallas import tpu as pltpu


# --------------------------------------------------------------------------------------
# Kernel
# --------------------------------------------------------------------------------------
def _gsa_kernel(x_kv_ref, x_q_ref, wq_ref, bq_ref, wkv_ref, bkv_ref,
                wo_ref, bo_ref, lnw_ref, lnb_ref, o_ref, k_scr, v_scr,
                *, num_heads):
    Bblk, L, D = x_kv_ref.shape
    Tq = x_q_ref.shape[1]
    H = num_heads
    hd = D // H
    G = Bblk * H
    cdt = wq_ref.dtype                     # bf16 MXU operand dtype (set by the wrapper)
    qc = pl.program_id(1)

    def split_heads(t, rows):              # (Bblk*rows, D) -> (G, rows, hd)
        t = t.reshape(Bblk, rows, H, hd)
        return jnp.transpose(t, (0, 2, 1, 3)).reshape(G, rows, hd)

    # K/V for the full sequence: computed once per batch block (q-chunk 0) and cached in
    # bf16 VMEM scratch so later q-chunks reuse it.
    @pl.when(qc == 0)
    def _():
        xkv = x_kv_ref[...].astype(cdt).reshape(Bblk * L, D)
        kv = jnp.dot(xkv, wkv_ref[...], preferred_element_type=jnp.float32)
        kv = kv + bkv_ref[...]                               # (Bblk*L, 2D) f32
        k_scr[...] = split_heads(kv[:, :D], L).astype(cdt)   # (G, L, hd) bf16
        v_scr[...] = split_heads(kv[:, D:], L).astype(cdt)

    # Q projection for this query chunk (1/sqrt(hd) folded into wq/bq by the wrapper).
    x_q = x_q_ref[...]                                       # (Bblk, Tq, D) storage dtype
    xq2 = x_q.astype(cdt).reshape(Bblk * Tq, D)
    q = jnp.dot(xq2, wq_ref[...], preferred_element_type=jnp.float32) + bq_ref[...]
    q = split_heads(q, Tq).astype(cdt)                       # (G, Tq, hd) bf16

    # Attention against the full key range held in scratch: only a (G, Tq, L) score slab
    # is ever live (no online-softmax bookkeeping needed since K/V are fully resident).
    s = jnp.einsum('gqd,gkd->gqk', q, k_scr[...],
                   preferred_element_type=jnp.float32)       # (G, Tq, L) f32
    s = s - jnp.max(s, axis=-1, keepdims=True)
    p = jnp.exp(s)
    p = p * pl.reciprocal(jnp.sum(p, axis=-1, keepdims=True), approx=True)
    o = jnp.einsum('gqk,gkd->gqd', p.astype(cdt), v_scr[...],
                   preferred_element_type=jnp.float32)       # (G, Tq, hd) f32

    # Merge heads back: (G, Tq, hd) -> (Bblk*Tq, D)
    # TODO(synk): try pltpu.einshape for the head split/merge if the relayouts show up in
    # profiles (only the two middle, non-lane axes are swapped here).
    o = o.reshape(Bblk, H, Tq, hd)
    attn = jnp.transpose(o, (0, 2, 1, 3)).reshape(Bblk * Tq, D)

    # Output projection (bf16 operands, f32 accumulate) + residual + LayerNorm (f32).
    y = x_q.astype(jnp.float32).reshape(Bblk * Tq, D)
    y = y + jnp.dot(attn.astype(cdt), wo_ref[...],
                    preferred_element_type=jnp.float32) + bo_ref[...]
    mean = jnp.mean(y, axis=-1, keepdims=True)
    yc = y - mean
    var = jnp.mean(yc * yc, axis=-1, keepdims=True)
    out = yc * jax.lax.rsqrt(var + 1e-5) * lnw_ref[...] + lnb_ref[...]
    o_ref[...] = out.reshape(Bblk, Tq, D).astype(o_ref.dtype)


# --------------------------------------------------------------------------------------
# Block-size selection (VMEM- and generation-aware)
# --------------------------------------------------------------------------------------
def _vmem_capacity_bytes():
    """Physical VMEM per core (128 MiB v5e/v6e, 64 MiB v7x) with a safe fallback."""
    try:
        cap = getattr(pltpu.get_tpu_info(), "vmem_capacity_bytes", None)
        if cap:
            return int(cap)
    except Exception:
        pass
    return 128 * 1024 * 1024


def _pick_q_chunk(L):
    """Query-axis tile: full L for short sequences, else the largest divisor of L that is a
    multiple of 8 and <= 512 (bounds the (G, tq, L) score slab and vreg live ranges)."""
    if L <= 512:
        return L
    for tq in range(512, 7, -8):
        if L % tq == 0:
            return tq
    # TODO(synk): pad/mask the query axis when L has no sublane-aligned divisor.
    return L


def _vmem_bytes_estimate(bblk, tq, L, D, H, x_isize, w_isize):
    """Rough per-step VMEM footprint: pipelined activation blocks + single-buffered weights
    + bf16 K/V scratch + f32 compute transients (the score slab dominates)."""
    hd = D // H
    G = bblk * H
    hd_pad = max(hd, 128)                       # lane padding of the head dim
    d_pad = max(D, 128)
    act = 2 * bblk * L * D * x_isize            # x for K/V (double-buffered)
    act += 2 * 2 * bblk * tq * D * x_isize      # x for Q + output block (double-buffered)
    wts = (4 * D * D + 6 * D) * w_isize         # weights single-buffered (Buffered(1))
    kv_scr = 2 * G * L * hd_pad * w_isize
    tmp = (bblk * L * 2 * d_pad * 4             # K/V projection (f32, q-chunk 0 step)
           + bblk * tq * d_pad * 4              # Q projection (f32)
           + 2 * G * tq * L * 4                 # scores + probabilities
           + G * tq * hd_pad * 4                # per-chunk attention output
           + 3 * bblk * tq * d_pad * 4)         # residual / LayerNorm temporaries
    return act + wts + kv_scr + tmp


def _pick_batch_block(B, tq, L, D, H, x_isize, w_isize, vmem_limit):
    """Largest divisor of B that fits the VMEM budget; keeps >= 2 grid steps on the parallel
    batch axis whenever B >= 2 so v7x can shard it across both TensorCores."""
    budget = int(vmem_limit * 0.85)
    cap = B if B < 2 else B // 2
    best = 1
    for c in range(1, cap + 1):
        if B % c == 0 and _vmem_bytes_estimate(c, tq, L, D, H, x_isize, w_isize) <= budget:
            best = c
    return best


# --------------------------------------------------------------------------------------
# Wrapper
# --------------------------------------------------------------------------------------
def global_self_attention(x_lbd, params, num_heads, *, compute_dtype=jnp.bfloat16):
    """x_lbd: (L, B, D) — PyTorch nn.MultiheadAttention default layout (batch_first=False)."""
    wqkv, bqkv, wo, bo, lnw, lnb = params
    L, B, D = x_lbd.shape
    assert D % num_heads == 0, "d_model must be divisible by num_heads"
    hd = D // num_heads
    scale = 1.0 / float(hd) ** 0.5
    f32 = jnp.float32

    # Split the fused in-projection into Q and KV parts, pre-transpose so the kernel only
    # computes x @ W, and fold 1/sqrt(hd) into the Q projection (in f32, then one cast).
    wq_t = (jnp.transpose(wqkv[:D].astype(f32)) * scale).astype(compute_dtype)   # (D, D)
    wkv_t = jnp.transpose(wqkv[D:].astype(f32)).astype(compute_dtype)            # (D, 2D)
    bq = (bqkv[:D].astype(f32) * scale).reshape(1, D)
    bkv = bqkv[D:].astype(f32).reshape(1, 2 * D)
    wo_t = jnp.transpose(wo.astype(f32)).astype(compute_dtype)                   # (D, D)
    bo2 = bo.astype(f32).reshape(1, D)
    lnw2 = lnw.astype(f32).reshape(1, D)
    lnb2 = lnb.astype(f32).reshape(1, D)

    # Batch-major activations: each (bblk, L, D) / (bblk, tq, D) block is one contiguous DMA.
    x_bld = jnp.transpose(x_lbd, (1, 0, 2))

    vmem_limit = min(int(_vmem_capacity_bytes() * 0.75), 100 * 1024 * 1024)
    x_isize = x_bld.dtype.itemsize
    w_isize = jnp.finfo(compute_dtype).bits // 8
    tq = _pick_q_chunk(L)
    bblk = _pick_batch_block(B, tq, L, D, num_heads, x_isize, w_isize, vmem_limit)
    grid = (B // bblk, L // tq)
    G = bblk * num_heads
    # TODO(synk): if even bblk=1 overflows VMEM (very long L), also tile K/V with a
    # flash-style online softmax instead of holding the full key range in scratch.

    kernel = functools.partial(_gsa_kernel, num_heads=num_heads)
    weights = (wq_t, bq, wkv_t, bkv, wo_t, bo2, lnw2, lnb2)

    def run(single_buffer_weights):
        def w_spec(arr):
            zeros = lambda b, qi: (0,) * arr.ndim
            if single_buffer_weights:
                # Grid-invariant operands: single-buffered, no double-buffer VMEM cost.
                return pl.BlockSpec(arr.shape, zeros, pipeline_mode=pl.Buffered(1))
            return pl.BlockSpec(arr.shape, zeros)

        out = pl.pallas_call(
            kernel,
            out_shape=jax.ShapeDtypeStruct((B, L, D), x_lbd.dtype),
            grid=grid,
            in_specs=[
                pl.BlockSpec((bblk, L, D), lambda b, qi: (b, 0, 0)),    # x for K/V (per b)
                pl.BlockSpec((bblk, tq, D), lambda b, qi: (b, qi, 0)),  # x for Q / residual
            ] + [w_spec(w) for w in weights],
            out_specs=pl.BlockSpec((bblk, tq, D), lambda b, qi: (b, qi, 0)),
            scratch_shapes=[
                pltpu.VMEM((G, L, hd), compute_dtype),   # K cache (per batch block)
                pltpu.VMEM((G, L, hd), compute_dtype),   # V cache (per batch block)
            ],
            compiler_params=pltpu.CompilerParams(
                dimension_semantics=("parallel", "arbitrary"),
                vmem_limit_bytes=vmem_limit,
            ),
        )(x_bld, x_bld, *weights)
        return jax.block_until_ready(out)

    try:
        out_bld = run(single_buffer_weights=True)
    except Exception:
        # TODO(synk): drop this fallback once pl.Buffered(1) weight specs are confirmed on
        # the target toolchain; double-buffered weights just cost extra VMEM but are correct.
        out_bld = run(single_buffer_weights=False)

    return jnp.transpose(out_bld, (1, 0, 2))


# --------------------------------------------------------------------------------------
# Pure-JAX reference (f32) matching nn.MultiheadAttention + residual + LayerNorm
# --------------------------------------------------------------------------------------
def _reference(x_lbd, params, num_heads):
    wqkv, bqkv, wo, bo, lnw, lnb = params
    L, B, D = x_lbd.shape
    hd = D // num_heads
    x = jnp.transpose(x_lbd, (1, 0, 2)).astype(jnp.float32)       # (B, L, D)
    qkv = jnp.einsum('bld,ed->ble', x, wqkv) + bqkv                # (B, L, 3D)
    q, k, v = qkv[..., :D], qkv[..., D:2 * D], qkv[..., 2 * D:]
    q = q.reshape(B, L, num_heads, hd).transpose(0, 2, 1, 3) / (hd ** 0.5)
    k = k.reshape(B, L, num_heads, hd).transpose(0, 2, 1, 3)
    v = v.reshape(B, L, num_heads, hd).transpose(0, 2, 1, 3)
    s = jnp.einsum('bhld,bhmd->bhlm', q, k)
    p = jax.nn.softmax(s, axis=-1)
    o = jnp.einsum('bhlm,bhmd->bhld', p, v).transpose(0, 2, 1, 3).reshape(B, L, D)
    attn = jnp.einsum('bld,ed->ble', o, wo) + bo
    y = x + attn
    mean = jnp.mean(y, axis=-1, keepdims=True)
    var = jnp.mean((y - mean) ** 2, axis=-1, keepdims=True)
    y = (y - mean) / jnp.sqrt(var + 1e-5) * lnw + lnb
    return jnp.transpose(y, (1, 0, 2))


if __name__ == "__main__":
    L, B, D, H = 8, 2, 32, 4

    key = jax.random.PRNGKey(0)
    kx, k1, k2, k3, k4, k5, k6 = jax.random.split(key, 7)

    x = jax.random.normal(kx, (L, B, D), dtype=jnp.float32)

    # deterministic parameter init (shapes from nn.MultiheadAttention / nn.LayerNorm)
    in_proj_weight = jax.random.normal(k1, (3 * D, D), dtype=jnp.float32) * 0.05
    in_proj_bias = jax.random.normal(k3, (3 * D,), dtype=jnp.float32) * 0.02
    out_proj_weight = jax.random.normal(k2, (D, D), dtype=jnp.float32) * 0.05
    out_proj_bias = jax.random.normal(k4, (D,), dtype=jnp.float32) * 0.02
    ln_weight = 1.0 + 0.1 * jax.random.normal(k5, (D,), dtype=jnp.float32)
    ln_bias = 0.05 * jax.random.normal(k6, (D,), dtype=jnp.float32)

    params = (in_proj_weight, in_proj_bias, out_proj_weight, out_proj_bias,
              ln_weight, ln_bias)

    out = jax.block_until_ready(global_self_attention(x, params, num_heads=H))
    ref = jax.block_until_ready(_reference(x, params, num_heads=H))

    assert out.shape == (L, B, D)
    # The kernel runs the MXU matmuls with bf16 operands (f32 accumulation), so compare
    # against the f32 reference with a mixed-precision tolerance.
    assert jnp.allclose(out, ref, atol=2e-2, rtol=2e-2), "mismatch vs reference"

    print("KERNEL_OK")
</pallas_src>

<mosaic_0001>
module attributes {stable_mosaic.version = 11 : i64} {
  func.func @_gsa_kernel(%arg0: i32, %arg1: i32, %arg2: memref<1x8x32xf32, #tpu.memory_space<vmem>>, %arg3: memref<1x8x32xf32, #tpu.memory_space<vmem>>, %arg4: memref<32x32xbf16, #tpu.memory_space<vmem>>, %arg5: memref<1x32xf32, #tpu.memory_space<vmem>>, %arg6: memref<32x64xbf16, #tpu.memory_space<vmem>>, %arg7: memref<1x64xf32, #tpu.memory_space<vmem>>, %arg8: memref<32x32xbf16, #tpu.memory_space<vmem>>, %arg9: memref<1x32xf32, #tpu.memory_space<vmem>>, %arg10: memref<1x32xf32, #tpu.memory_space<vmem>>, %arg11: memref<1x32xf32, #tpu.memory_space<vmem>>, %arg12: memref<1x8x32xf32, #tpu.memory_space<vmem>>, %arg13: memref<4x8x8xbf16, #tpu.memory_space<vmem>>, %arg14: memref<4x8x8xbf16, #tpu.memory_space<vmem>>) attributes {dimension_semantics = [#tpu.dimension_semantics<parallel>, #tpu.dimension_semantics<arbitrary>], iteration_bounds = array<i64: 2, 1>, scalar_prefetch = 0 : i64, scratch_operands = 2 : i64, tpu.core_type = #tpu.core_type<tc>, window_params = [{transform_indices = @transform_0, window_bounds = array<i64: 1, 8, 32>}, {transform_indices = @transform_1, window_bounds = array<i64: 1, 8, 32>}, {pipeline_mode = #tpu.pipeline_mode<synchronous>, transform_indices = @transform_2, window_bounds = array<i64: 32, 32>}, {pipeline_mode = #tpu.pipeline_mode<synchronous>, transform_indices = @transform_3, window_bounds = array<i64: 1, 32>}, {pipeline_mode = #tpu.pipeline_mode<synchronous>, transform_indices = @transform_4, window_bounds = array<i64: 32, 64>}, {pipeline_mode = #tpu.pipeline_mode<synchronous>, transform_indices = @transform_5, window_bounds = array<i64: 1, 64>}, {pipeline_mode = #tpu.pipeline_mode<synchronous>, transform_indices = @transform_6, window_bounds = array<i64: 32, 32>}, {pipeline_mode = #tpu.pipeline_mode<synchronous>, transform_indices = @transform_7, window_bounds = array<i64: 1, 32>}, {pipeline_mode = #tpu.pipeline_mode<synchronous>, transform_indices = @transform_8, window_bounds = array<i64: 1, 32>}, {pipeline_mode = #tpu.pipeline_mode<synchronous>, transform_indices = @transform_9, window_bounds = array<i64: 1, 32>}, {transform_indices = @transform_10, window_bounds = array<i64: 1, 8, 32>}]} {
    %c0_i32 = arith.constant 0 : i32
    %0 = arith.cmpi eq, %arg1, %c0_i32 : i32
    %1 = arith.extui %0 : i1 to i32
    %c0_i32_0 = arith.constant 0 : i32
    %2 = arith.cmpi ne, %1, %c0_i32_0 : i32
    scf.if %2 {
      %c0_34 = arith.constant 0 : index
      %c0_35 = arith.constant 0 : index
      %c0_36 = arith.constant 0 : index
      %65 = vector.load %arg2[%c0_34, %c0_35, %c0_36] : memref<1x8x32xf32, #tpu.memory_space<vmem>>, vector<1x8x32xf32>
      %66 = arith.truncf %65 : vector<1x8x32xf32> to vector<1x8x32xbf16>
      %67 = vector.shape_cast %66 : vector<1x8x32xbf16> to vector<8x32xbf16>
      %c0_37 = arith.constant 0 : index
      %c0_38 = arith.constant 0 : index
      %68 = vector.load %arg6[%c0_37, %c0_38] : memref<32x64xbf16, #tpu.memory_space<vmem>>, vector<32x64xbf16>
      %cst_39 = arith.constant dense<0.000000e+00> : vector<8x64xf32>
      %69 = tpu.matmul %67, %68, %cst_39 {dimension_numbers = #tpu.dot_dimension_numbers<[1], [0], [0], [1], [0, 0, 1, 1], [], []>} : vector<8x32xbf16>, vector<32x64xbf16>, vector<8x64xf32> -> vector<8x64xf32>
      %c0_40 = arith.constant 0 : index
      %c0_41 = arith.constant 0 : index
      %70 = vector.load %arg7[%c0_40, %c0_41] : memref<1x64xf32, #tpu.memory_space<vmem>>, vector<1x64xf32>
      %71 = vector.broadcast %70 : vector<1x64xf32> to vector<8x64xf32>
      %72 = arith.addf %69, %71 : vector<8x64xf32>
      %73 = vector.extract_strided_slice %72 {offsets = [0, 0], sizes = [8, 32], strides = [1, 1]} : vector<8x64xf32> to vector<8x32xf32>
      %74 = vector.shape_cast %73 : vector<8x32xf32> to vector<1x8x4x8xf32>
      %75 = tpu.transpose %74, [0, 2, 1, 3] : vector<1x8x4x8xf32> -> vector<1x4x8x8xf32>
      %76 = vector.shape_cast %75 : vector<1x4x8x8xf32> to vector<4x8x8xf32>
      %77 = arith.truncf %76 : vector<4x8x8xf32> to vector<4x8x8xbf16>
      %c0_42 = arith.constant 0 : index
      %c0_43 = arith.constant 0 : index
      %c0_44 = arith.constant 0 : index
      %78 = vector.load %arg13[%c0_42, %c0_43, %c0_44] : memref<4x8x8xbf16, #tpu.memory_space<vmem>>, vector<4x8x8xbf16>
      tpu.vector_store %arg13[%c0_42, %c0_43, %c0_44], %77 {strides = array<i32>} : memref<4x8x8xbf16, #tpu.memory_space<vmem>>, vector<4x8x8xbf16>,
      %79 = vector.extract_strided_slice %72 {offsets = [0, 32], sizes = [8, 32], strides = [1, 1]} : vector<8x64xf32> to vector<8x32xf32>
      %80 = vector.shape_cast %79 : vector<8x32xf32> to vector<1x8x4x8xf32>
      %81 = tpu.transpose %80, [0, 2, 1, 3] : vector<1x8x4x8xf32> -> vector<1x4x8x8xf32>
      %82 = vector.shape_cast %81 : vector<1x4x8x8xf32> to vector<4x8x8xf32>
      %83 = arith.truncf %82 : vector<4x8x8xf32> to vector<4x8x8xbf16>
      %c0_45 = arith.constant 0 : index
      %c0_46 = arith.constant 0 : index
      %c0_47 = arith.constant 0 : index
      %84 = vector.load %arg14[%c0_45, %c0_46, %c0_47] : memref<4x8x8xbf16, #tpu.memory_space<vmem>>, vector<4x8x8xbf16>
      tpu.vector_store %arg14[%c0_45, %c0_46, %c0_47], %83 {strides = array<i32>} : memref<4x8x8xbf16, #tpu.memory_space<vmem>>, vector<4x8x8xbf16>,
    } else {
    }
    %c0 = arith.constant 0 : index
    %c0_1 = arith.constant 0 : index
    %c0_2 = arith.constant 0 : index
    %3 = vector.load %arg3[%c0, %c0_1, %c0_2] : memref<1x8x32xf32, #tpu.memory_space<vmem>>, vector<1x8x32xf32>
    %4 = arith.truncf %3 : vector<1x8x32xf32> to vector<1x8x32xbf16>
    %5 = vector.shape_cast %4 : vector<1x8x32xbf16> to vector<8x32xbf16>
    %c0_3 = arith.constant 0 : index
    %c0_4 = arith.constant 0 : index
    %6 = vector.load %arg4[%c0_3, %c0_4] : memref<32x32xbf16, #tpu.memory_space<vmem>>, vector<32x32xbf16>
    %cst = arith.constant dense<0.000000e+00> : vector<8x32xf32>
    %7 = tpu.matmul %5, %6, %cst {dimension_numbers = #tpu.dot_dimension_numbers<[1], [0], [0], [1], [0, 0, 1, 1], [], []>} : vector<8x32xbf16>, vector<32x32xbf16>, vector<8x32xf32> -> vector<8x32xf32>
    %c0_5 = arith.constant 0 : index
    %c0_6 = arith.constant 0 : index
    %8 = vector.load %arg5[%c0_5, %c0_6] : memref<1x32xf32, #tpu.memory_space<vmem>>, vector<1x32xf32>
    %9 = vector.broadcast %8 : vector<1x32xf32> to vector<8x32xf32>
    %10 = arith.addf %7, %9 : vector<8x32xf32>
    %11 = vector.shape_cast %10 : vector<8x32xf32> to vector<1x8x4x8xf32>
    %12 = tpu.transpose %11, [0, 2, 1, 3] : vector<1x8x4x8xf32> -> vector<1x4x8x8xf32>
    %13 = vector.shape_cast %12 : vector<1x4x8x8xf32> to vector<4x8x8xf32>
    %14 = arith.truncf %13 : vector<4x8x8xf32> to vector<4x8x8xbf16>
    %c0_7 = arith.constant 0 : index
    %c0_8 = arith.constant 0 : index
    %c0_9 = arith.constant 0 : index
    %15 = vector.load %arg13[%c0_7, %c0_8, %c0_9] : memref<4x8x8xbf16, #tpu.memory_space<vmem>>, vector<4x8x8xbf16>
    "tpu.trace_start"() <{level = 10 : i32, message = "gqd,gkd->gqk"}> : () -> ()
    %cst_10 = arith.constant dense<0.000000e+00> : vector<4x8x8xf32>
    %16 = tpu.matmul %14, %15, %cst_10 {dimension_numbers = #tpu.dot_dimension_numbers<[2], [2], [1], [1], [0, 0, 0, 1, 1, 1], [0], [0]>} : vector<4x8x8xbf16>, vector<4x8x8xbf16>, vector<4x8x8xf32> -> vector<4x8x8xf32>
    "tpu.trace_stop"() : () -> ()
    %cst_11 = arith.constant dense<0xFF800000> : vector<4x8xf32>
    %17 = vector.multi_reduction <maximumf>, %16, %cst_11 [2] : vector<4x8x8xf32> to vector<4x8xf32>
    %18 = vector.shape_cast %17 : vector<4x8xf32> to vector<4x8x1xf32>
    %19 = vector.broadcast %18 : vector<4x8x1xf32> to vector<4x8x8xf32>
    %20 = arith.subf %16, %19 : vector<4x8x8xf32>
    %21 = math.exp %20 : vector<4x8x8xf32>
    %cst_12 = arith.constant dense<0.000000e+00> : vector<4x8xf32>
    %22 = vector.multi_reduction <add>, %21, %cst_12 [2] : vector<4x8x8xf32> to vector<4x8xf32>
    %23 = vector.shape_cast %22 : vector<4x8xf32> to vector<4x8x1xf32>
    %24 = tpu.reciprocal %23 {approx = true} : vector<4x8x1xf32> -> vector<4x8x1xf32>
    %25 = vector.broadcast %24 : vector<4x8x1xf32> to vector<4x8x8xf32>
    %26 = arith.mulf %21, %25 : vector<4x8x8xf32>
    %27 = arith.truncf %26 : vector<4x8x8xf32> to vector<4x8x8xbf16>
    %c0_13 = arith.constant 0 : index
    %c0_14 = arith.constant 0 : index
    %c0_15 = arith.constant 0 : index
    %28 = vector.load %arg14[%c0_13, %c0_14, %c0_15] : memref<4x8x8xbf16, #tpu.memory_space<vmem>>, vector<4x8x8xbf16>
    "tpu.trace_start"() <{level = 10 : i32, message = "gqk,gkd->gqd"}> : () -> ()
    %cst_16 = arith.constant dense<0.000000e+00> : vector<4x8x8xf32>
    %29 = tpu.matmul %27, %28, %cst_16 {dimension_numbers = #tpu.dot_dimension_numbers<[2], [1], [1], [2], [0, 0, 0, 1, 1, 2], [0], [0]>} : vector<4x8x8xbf16>, vector<4x8x8xbf16>, vector<4x8x8xf32> -> vector<4x8x8xf32>
    "tpu.trace_stop"() : () -> ()
    %30 = vector.shape_cast %29 : vector<4x8x8xf32> to vector<1x4x8x8xf32>
    %31 = tpu.transpose %30, [0, 2, 1, 3] : vector<1x4x8x8xf32> -> vector<1x8x4x8xf32>
    %32 = vector.shape_cast %31 : vector<1x8x4x8xf32> to vector<8x32xf32>
    %33 = vector.shape_cast %3 : vector<1x8x32xf32> to vector<8x32xf32>
    %34 = arith.truncf %32 : vector<8x32xf32> to vector<8x32xbf16>
    %c0_17 = arith.constant 0 : index
    %c0_18 = arith.constant 0 : index
    %35 = vector.load %arg8[%c0_17, %c0_18] : memref<32x32xbf16, #tpu.memory_space<vmem>>, vector<32x32xbf16>
    %cst_19 = arith.constant dense<0.000000e+00> : vector<8x32xf32>
    %36 = tpu.matmul %34, %35, %cst_19 {dimension_numbers = #tpu.dot_dimension_numbers<[1], [0], [0], [1], [0, 0, 1, 1], [], []>} : vector<8x32xbf16>, vector<32x32xbf16>, vector<8x32xf32> -> vector<8x32xf32>
    %37 = arith.addf %33, %36 : vector<8x32xf32>
    %c0_20 = arith.constant 0 : index
    %c0_21 = arith.constant 0 : index
    %38 = vector.load %arg9[%c0_20, %c0_21] : memref<1x32xf32, #tpu.memory_space<vmem>>, vector<1x32xf32>
    %39 = vector.broadcast %38 : vector<1x32xf32> to vector<8x32xf32>
    %40 = arith.addf %37, %39 : vector<8x32xf32>
    %cst_22 = arith.constant dense<0.000000e+00> : vector<8xf32>
    %41 = vector.multi_reduction <add>, %40, %cst_22 [1] : vector<8x32xf32> to vector<8xf32>
    %42 = vector.shape_cast %41 : vector<8xf32> to vector<8x1xf32>
    %cst_23 = arith.constant 3.200000e+01 : f32
    %43 = vector.broadcast %cst_23 : f32 to vector<8x1xf32>
    %44 = arith.divf %42, %43 : vector<8x1xf32>
    %45 = vector.broadcast %44 : vector<8x1xf32> to vector<8x32xf32>
    %46 = arith.subf %40, %45 : vector<8x32xf32>
    %47 = arith.mulf %46, %46 : vector<8x32xf32>
    %cst_24 = arith.constant dense<0.000000e+00> : vector<8xf32>
    %48 = vector.multi_reduction <add>, %47, %cst_24 [1] : vector<8x32xf32> to vector<8xf32>
    %49 = vector.shape_cast %48 : vector<8xf32> to vector<8x1xf32>
    %cst_25 = arith.constant 3.200000e+01 : f32
    %50 = vector.broadcast %cst_25 : f32 to vector<8x1xf32>
    %51 = arith.divf %49, %50 : vector<8x1xf32>
    %cst_26 = arith.constant 9.99999974E-6 : f32
    %52 = vector.broadcast %cst_26 : f32 to vector<8x1xf32>
    %53 = arith.addf %51, %52 : vector<8x1xf32>
    %54 = math.rsqrt %53 : vector<8x1xf32>
    %55 = vector.broadcast %54 : vector<8x1xf32> to vector<8x32xf32>
    %56 = arith.mulf %46, %55 : vector<8x32xf32>
    %c0_27 = arith.constant 0 : index
    %c0_28 = arith.constant 0 : index
    %57 = vector.load %arg10[%c0_27, %c0_28] : memref<1x32xf32, #tpu.memory_space<vmem>>, vector<1x32xf32>
    %58 = vector.broadcast %57 : vector<1x32xf32> to vector<8x32xf32>
    %59 = arith.mulf %56, %58 : vector<8x32xf32>
    %c0_29 = arith.constant 0 : index
    %c0_30 = arith.constant 0 : index
    %60 = vector.load %arg11[%c0_29, %c0_30] : memref<1x32xf32, #tpu.memory_space<vmem>>, vector<1x32xf32>
    %61 = vector.broadcast %60 : vector<1x32xf32> to vector<8x32xf32>
    %62 = arith.addf %59, %61 : vector<8x32xf32>
    %63 = vector.shape_cast %62 : vector<8x32xf32> to vector<1x8x32xf32>
    %c0_31 = arith.constant 0 : index
    %c0_32 = arith.constant 0 : index
    %c0_33 = arith.constant 0 : index
    %64 = vector.load %arg12[%c0_31, %c0_32, %c0_33] : memref<1x8x32xf32, #tpu.memory_space<vmem>>, vector<1x8x32xf32>
    tpu.vector_store %arg12[%c0_31, %c0_32, %c0_33], %63 {strides = array<i32>} : memref<1x8x32xf32, #tpu.memory_space<vmem>>, vector<1x8x32xf32>,
    return
  }
  func.func @transform_0(%arg0: i32, %arg1: i32) -> (i32, i32, i32) {
    %c0_i32 = arith.constant 0 : i32
    %c0_i32_0 = arith.constant 0 : i32
    %c0_i32_1 = arith.constant 0 : i32
    return %arg0, %c0_i32, %c0_i32_0 : i32, i32, i32
  }
  func.func @transform_1(%arg0: i32, %arg1: i32) -> (i32, i32, i32) {
    %c0_i32 = arith.constant 0 : i32
    %c0_i32_0 = arith.constant 0 : i32
    return %arg0, %arg1, %c0_i32 : i32, i32, i32
  }
  func.func @transform_2(%arg0: i32, %arg1: i32) -> (i32, i32) {
    %c0_i32 = arith.constant 0 : i32
    %c0_i32_0 = arith.constant 0 : i32
    %c0_i32_1 = arith.constant 0 : i32
    return %c0_i32, %c0_i32_0 : i32, i32
  }
  func.func @transform_3(%arg0: i32, %arg1: i32) -> (i32, i32) {
    %c0_i32 = arith.constant 0 : i32
    %c0_i32_0 = arith.constant 0 : i32
    %c0_i32_1 = arith.constant 0 : i32
    return %c0_i32, %c0_i32_0 : i32, i32
  }
  func.func @transform_4(%arg0: i32, %arg1: i32) -> (i32, i32) {
    %c0_i32 = arith.constant 0 : i32
    %c0_i32_0 = arith.constant 0 : i32
    %c0_i32_1 = arith.constant 0 : i32
    return %c0_i32, %c0_i32_0 : i32, i32
  }
  func.func @transform_5(%arg0: i32, %arg1: i32) -> (i32, i32) {
    %c0_i32 = arith.constant 0 : i32
    %c0_i32_0 = arith.constant 0 : i32
    %c0_i32_1 = arith.constant 0 : i32
    return %c0_i32, %c0_i32_0 : i32, i32
  }
  func.func @transform_6(%arg0: i32, %arg1: i32) -> (i32, i32) {
    %c0_i32 = arith.constant 0 : i32
    %c0_i32_0 = arith.constant 0 : i32
    %c0_i32_1 = arith.constant 0 : i32
    return %c0_i32, %c0_i32_0 : i32, i32
  }
  func.func @transform_7(%arg0: i32, %arg1: i32) -> (i32, i32) {
    %c0_i32 = arith.constant 0 : i32
    %c0_i32_0 = arith.constant 0 : i32
    %c0_i32_1 = arith.constant 0 : i32
    return %c0_i32, %c0_i32_0 : i32, i32
  }
  func.func @transform_8(%arg0: i32, %arg1: i32) -> (i32, i32) {
    %c0_i32 = arith.constant 0 : i32
    %c0_i32_0 = arith.constant 0 : i32
    %c0_i32_1 = arith.constant 0 : i32
    return %c0_i32, %c0_i32_0 : i32, i32
  }
  func.func @transform_9(%arg0: i32, %arg1: i32) -> (i32, i32) {
    %c0_i32 = arith.constant 0 : i32
    %c0_i32_0 = arith.constant 0 : i32
    %c0_i32_1 = arith.constant 0 : i32
    return %c0_i32, %c0_i32_0 : i32, i32
  }
  func.func @transform_10(%arg0: i32, %arg1: i32) -> (i32, i32, i32) {
    %c0_i32 = arith.constant 0 : i32
    %c0_i32_0 = arith.constant 0 : i32
    return %arg0, %arg1, %c0_i32 : i32, i32, i32
  }
}

module attributes {stable_mosaic.version = 11 : i64} {
  func.func @_gsa_kernel(%arg0: i32, %arg1: i32, %arg2: memref<1x8x32xf32, #tpu.memory_space<vmem>>, %arg3: memref<1x8x32xf32, #tpu.memory_space<vmem>>, %arg4: memref<32x32xbf16, #tpu.memory_space<vmem>>, %arg5: memref<1x32xf32, #tpu.memory_space<vmem>>, %arg6: memref<32x64xbf16, #tpu.memory_space<vmem>>, %arg7: memref<1x64xf32, #tpu.memory_space<vmem>>, %arg8: memref<32x32xbf16, #tpu.memory_space<vmem>>, %arg9: memref<1x32xf32, #tpu.memory_space<vmem>>, %arg10: memref<1x32xf32, #tpu.memory_space<vmem>>, %arg11: memref<1x32xf32, #tpu.memory_space<vmem>>, %arg12: memref<1x8x32xf32, #tpu.memory_space<vmem>>, %arg13: memref<4x8x8xbf16, #tpu.memory_space<vmem>>, %arg14: memref<4x8x8xbf16, #tpu.memory_space<vmem>>) attributes {dimension_semantics = [#tpu.dimension_semantics<parallel>, #tpu.dimension_semantics<arbitrary>], iteration_bounds = array<i64: 2, 1>, scalar_prefetch = 0 : i64, scratch_operands = 2 : i64, tpu.core_type = #tpu.core_type<tc>, window_params = [{transform_indices = @transform_0, window_bounds = array<i64: 1, 8, 32>}, {transform_indices = @transform_1, window_bounds = array<i64: 1, 8, 32>}, {pipeline_mode = #tpu.pipeline_mode<synchronous>, transform_indices = @transform_2, window_bounds = array<i64: 32, 32>}, {pipeline_mode = #tpu.pipeline_mode<synchronous>, transform_indices = @transform_3, window_bounds = array<i64: 1, 32>}, {pipeline_mode = #tpu.pipeline_mode<synchronous>, transform_indices = @transform_4, window_bounds = array<i64: 32, 64>}, {pipeline_mode = #tpu.pipeline_mode<synchronous>, transform_indices = @transform_5, window_bounds = array<i64: 1, 64>}, {pipeline_mode = #tpu.pipeline_mode<synchronous>, transform_indices = @transform_6, window_bounds = array<i64: 32, 32>}, {pipeline_mode = #tpu.pipeline_mode<synchronous>, transform_indices = @transform_7, window_bounds = array<i64: 1, 32>}, {pipeline_mode = #tpu.pipeline_mode<synchronous>, transform_indices = @transform_8, window_bounds = array<i64: 1, 32>}, {pipeline_mode = #tpu.pipeline_mode<synchronous>, transform_indices = @transform_9, window_bounds = array<i64: 1, 32>}, {transform_indices = @transform_10, window_bounds = array<i64: 1, 8, 32>}]} {
    %c0_i32 = arith.constant 0 : i32
    %0 = arith.cmpi eq, %arg1, %c0_i32 : i32
    %1 = arith.extui %0 : i1 to i32
    %c0_i32_0 = arith.constant 0 : i32
    %2 = arith.cmpi ne, %1, %c0_i32_0 : i32
    scf.if %2 {
      %c0_34 = arith.constant 0 : index
      %c0_35 = arith.constant 0 : index
      %c0_36 = arith.constant 0 : index
      %65 = vector.load %arg2[%c0_34, %c0_35, %c0_36] : memref<1x8x32xf32, #tpu.memory_space<vmem>>, vector<1x8x32xf32>
      %66 = arith.truncf %65 : vector<1x8x32xf32> to vector<1x8x32xbf16>
      %67 = vector.shape_cast %66 : vector<1x8x32xbf16> to vector<8x32xbf16>
      %c0_37 = arith.constant 0 : index
      %c0_38 = arith.constant 0 : index
      %68 = vector.load %arg6[%c0_37, %c0_38] : memref<32x64xbf16, #tpu.memory_space<vmem>>, vector<32x64xbf16>
      %cst_39 = arith.constant dense<0.000000e+00> : vector<8x64xf32>
      %69 = tpu.matmul %67, %68, %cst_39 {dimension_numbers = #tpu.dot_dimension_numbers<[1], [0], [0], [1], [0, 0, 1, 1], [], []>} : vector<8x32xbf16>, vector<32x64xbf16>, vector<8x64xf32> -> vector<8x64xf32>
      %c0_40 = arith.constant 0 : index
      %c0_41 = arith.constant 0 : index
      %70 = vector.load %arg7[%c0_40, %c0_41] : memref<1x64xf32, #tpu.memory_space<vmem>>, vector<1x64xf32>
      %71 = vector.broadcast %70 : vector<1x64xf32> to vector<8x64xf32>
      %72 = arith.addf %69, %71 : vector<8x64xf32>
      %73 = vector.extract_strided_slice %72 {offsets = [0, 0], sizes = [8, 32], strides = [1, 1]} : vector<8x64xf32> to vector<8x32xf32>
      %74 = vector.shape_cast %73 : vector<8x32xf32> to vector<1x8x4x8xf32>
      %75 = tpu.transpose %74, [0, 2, 1, 3] : vector<1x8x4x8xf32> -> vector<1x4x8x8xf32>
      %76 = vector.shape_cast %75 : vector<1x4x8x8xf32> to vector<4x8x8xf32>
      %77 = arith.truncf %76 : vector<4x8x8xf32> to vector<4x8x8xbf16>
      %c0_42 = arith.constant 0 : index
      %c0_43 = arith.constant 0 : index
      %c0_44 = arith.constant 0 : index
      %78 = vector.load %arg13[%c0_42, %c0_43, %c0_44] : memref<4x8x8xbf16, #tpu.memory_space<vmem>>, vector<4x8x8xbf16>
      tpu.vector_store %arg13[%c0_42, %c0_43, %c0_44], %77 {strides = array<i32>} : memref<4x8x8xbf16, #tpu.memory_space<vmem>>, vector<4x8x8xbf16>,
      %79 = vector.extract_strided_slice %72 {offsets = [0, 32], sizes = [8, 32], strides = [1, 1]} : vector<8x64xf32> to vector<8x32xf32>
      %80 = vector.shape_cast %79 : vector<8x32xf32> to vector<1x8x4x8xf32>
      %81 = tpu.transpose %80, [0, 2, 1, 3] : vector<1x8x4x8xf32> -> vector<1x4x8x8xf32>
      %82 = vector.shape_cast %81 : vector<1x4x8x8xf32> to vector<4x8x8xf32>
      %83 = arith.truncf %82 : vector<4x8x8xf32> to vector<4x8x8xbf16>
      %c0_45 = arith.constant 0 : index
      %c0_46 = arith.constant 0 : index
      %c0_47 = arith.constant 0 : index
      %84 = vector.load %arg14[%c0_45, %c0_46, %c0_47] : memref<4x8x8xbf16, #tpu.memory_space<vmem>>, vector<4x8x8xbf16>
      tpu.vector_store %arg14[%c0_45, %c0_46, %c0_47], %83 {strides = array<i32>} : memref<4x8x8xbf16, #tpu.memory_space<vmem>>, vector<4x8x8xbf16>,
    } else {
    }
    %c0 = arith.constant 0 : index
    %c0_1 = arith.constant 0 : index
    %c0_2 = arith.constant 0 : index
    %3 = vector.load %arg3[%c0, %c0_1, %c0_2] : memref<1x8x32xf32, #tpu.memory_space<vmem>>, vector<1x8x32xf32>
    %4 = arith.truncf %3 : vector<1x8x32xf32> to vector<1x8x32xbf16>
    %5 = vector.shape_cast %4 : vector<1x8x32xbf16> to vector<8x32xbf16>
    %c0_3 = arith.constant 0 : index
    %c0_4 = arith.constant 0 : index
    %6 = vector.load %arg4[%c0_3, %c0_4] : memref<32x32xbf16, #tpu.memory_space<vmem>>, vector<32x32xbf16>
    %cst = arith.constant dense<0.000000e+00> : vector<8x32xf32>
    %7 = tpu.matmul %5, %6, %cst {dimension_numbers = #tpu.dot_dimension_numbers<[1], [0], [0], [1], [0, 0, 1, 1], [], []>} : vector<8x32xbf16>, vector<32x32xbf16>, vector<8x32xf32> -> vector<8x32xf32>
    %c0_5 = arith.constant 0 : index
    %c0_6 = arith.constant 0 : index
    %8 = vector.load %arg5[%c0_5, %c0_6] : memref<1x32xf32, #tpu.memory_space<vmem>>, vector<1x32xf32>
    %9 = vector.broadcast %8 : vector<1x32xf32> to vector<8x32xf32>
    %10 = arith.addf %7, %9 : vector<8x32xf32>
    %11 = vector.shape_cast %10 : vector<8x32xf32> to vector<1x8x4x8xf32>
    %12 = tpu.transpose %11, [0, 2, 1, 3] : vector<1x8x4x8xf32> -> vector<1x4x8x8xf32>
    %13 = vector.shape_cast %12 : vector<1x4x8x8xf32> to vector<4x8x8xf32>
    %14 = arith.truncf %13 : vector<4x8x8xf32> to vector<4x8x8xbf16>
    %c0_7 = arith.constant 0 : index
    %c0_8 = arith.constant 0 : index
    %c0_9 = arith.constant 0 : index
    %15 = vector.load %arg13[%c0_7, %c0_8, %c0_9] : memref<4x8x8xbf16, #tpu.memory_space<vmem>>, vector<4x8x8xbf16>
    "tpu.trace_start"() <{level = 10 : i32, message = "gqd,gkd->gqk"}> : () -> ()
    %cst_10 = arith.constant dense<0.000000e+00> : vector<4x8x8xf32>
    %16 = tpu.matmul %14, %15, %cst_10 {dimension_numbers = #tpu.dot_dimension_numbers<[2], [2], [1], [1], [0, 0, 0, 1, 1, 1], [0], [0]>} : vector<4x8x8xbf16>, vector<4x8x8xbf16>, vector<4x8x8xf32> -> vector<4x8x8xf32>
    "tpu.trace_stop"() : () -> ()
    %cst_11 = arith.constant dense<0xFF800000> : vector<4x8xf32>
    %17 = vector.multi_reduction <maximumf>, %16, %cst_11 [2] : vector<4x8x8xf32> to vector<4x8xf32>
    %18 = vector.shape_cast %17 : vector<4x8xf32> to vector<4x8x1xf32>
    %19 = vector.broadcast %18 : vector<4x8x1xf32> to vector<4x8x8xf32>
    %20 = arith.subf %16, %19 : vector<4x8x8xf32>
    %21 = math.exp %20 : vector<4x8x8xf32>
    %cst_12 = arith.constant dense<0.000000e+00> : vector<4x8xf32>
    %22 = vector.multi_reduction <add>, %21, %cst_12 [2] : vector<4x8x8xf32> to vector<4x8xf32>
    %23 = vector.shape_cast %22 : vector<4x8xf32> to vector<4x8x1xf32>
    %24 = tpu.reciprocal %23 {approx = true} : vector<4x8x1xf32> -> vector<4x8x1xf32>
    %25 = vector.broadcast %24 : vector<4x8x1xf32> to vector<4x8x8xf32>
    %26 = arith.mulf %21, %25 : vector<4x8x8xf32>
    %27 = arith.truncf %26 : vector<4x8x8xf32> to vector<4x8x8xbf16>
    %c0_13 = arith.constant 0 : index
    %c0_14 = arith.constant 0 : index
    %c0_15 = arith.constant 0 : index
    %28 = vector.load %arg14[%c0_13, %c0_14, %c0_15] : memref<4x8x8xbf16, #tpu.memory_space<vmem>>, vector<4x8x8xbf16>
    "tpu.trace_start"() <{level = 10 : i32, message = "gqk,gkd->gqd"}> : () -> ()
    %cst_16 = arith.constant dense<0.000000e+00> : vector<4x8x8xf32>
    %29 = tpu.matmul %27, %28, %cst_16 {dimension_numbers = #tpu.dot_dimension_numbers<[2], [1], [1], [2], [0, 0, 0, 1, 1, 2], [0], [0]>} : vector<4x8x8xbf16>, vector<4x8x8xbf16>, vector<4x8x8xf32> -> vector<4x8x8xf32>
    "tpu.trace_stop"() : () -> ()
    %30 = vector.shape_cast %29 : vector<4x8x8xf32> to vector<1x4x8x8xf32>
    %31 = tpu.transpose %30, [0, 2, 1, 3] : vector<1x4x8x8xf32> -> vector<1x8x4x8xf32>
    %32 = vector.shape_cast %31 : vector<1x8x4x8xf32> to vector<8x32xf32>
    %33 = vector.shape_cast %3 : vector<1x8x32xf32> to vector<8x32xf32>
    %34 = arith.truncf %32 : vector<8x32xf32> to vector<8x32xbf16>
    %c0_17 = arith.constant 0 : index
    %c0_18 = arith.constant 0 : index
    %35 = vector.load %arg8[%c0_17, %c0_18] : memref<32x32xbf16, #tpu.memory_space<vmem>>, vector<32x32xbf16>
    %cst_19 = arith.constant dense<0.000000e+00> : vector<8x32xf32>
    %36 = tpu.matmul %34, %35, %cst_19 {dimension_numbers = #tpu.dot_dimension_numbers<[1], [0], [0], [1], [0, 0, 1, 1], [], []>} : vector<8x32xbf16>, vector<32x32xbf16>, vector<8x32xf32> -> vector<8x32xf32>
    %37 = arith.addf %33, %36 : vector<8x32xf32>
    %c0_20 = arith.constant 0 : index
    %c0_21 = arith.constant 0 : index
    %38 = vector.load %arg9[%c0_20, %c0_21] : memref<1x32xf32, #tpu.memory_space<vmem>>, vector<1x32xf32>
    %39 = vector.broadcast %38 : vector<1x32xf32> to vector<8x32xf32>
    %40 = arith.addf %37, %39 : vector<8x32xf32>
    %cst_22 = arith.constant dense<0.000000e+00> : vector<8xf32>
    %41 = vector.multi_reduction <add>, %40, %cst_22 [1] : vector<8x32xf32> to vector<8xf32>
    %42 = vector.shape_cast %41 : vector<8xf32> to vector<8x1xf32>
    %cst_23 = arith.constant 3.200000e+01 : f32
    %43 = vector.broadcast %cst_23 : f32 to vector<8x1xf32>
    %44 = arith.divf %42, %43 : vector<8x1xf32>
    %45 = vector.broadcast %44 : vector<8x1xf32> to vector<8x32xf32>
    %46 = arith.subf %40, %45 : vector<8x32xf32>
    %47 = arith.mulf %46, %46 : vector<8x32xf32>
    %cst_24 = arith.constant dense<0.000000e+00> : vector<8xf32>
    %48 = vector.multi_reduction <add>, %47, %cst_24 [1] : vector<8x32xf32> to vector<8xf32>
    %49 = vector.shape_cast %48 : vector<8xf32> to vector<8x1xf32>
    %cst_25 = arith.constant 3.200000e+01 : f32
    %50 = vector.broadcast %cst_25 : f32 to vector<8x1xf32>
    %51 = arith.divf %49, %50 : vector<8x1xf32>
    %cst_26 = arith.constant 9.99999974E-6 : f32
    %52 = vector.broadcast %cst_26 : f32 to vector<8x1xf32>
    %53 = arith.addf %51, %52 : vector<8x1xf32>
    %54 = math.rsqrt %53 : vector<8x1xf32>
    %55 = vector.broadcast %54 : vector<8x1xf32> to vector<8x32xf32>
    %56 = arith.mulf %46, %55 : vector<8x32xf32>
    %c0_27 = arith.constant 0 : index
    %c0_28 = arith.constant 0 : index
    %57 = vector.load %arg10[%c0_27, %c0_28] : memref<1x32xf32, #tpu.memory_space<vmem>>, vector<1x32xf32>
    %58 = vector.broadcast %57 : vector<1x32xf32> to vector<8x32xf32>
    %59 = arith.mulf %56, %58 : vector<8x32xf32>
    %c0_29 = arith.constant 0 : index
    %c0_30 = arith.constant 0 : index
    %60 = vector.load %arg11[%c0_29, %c0_30] : memref<1x32xf32, #tpu.memory_space<vmem>>, vector<1x32xf32>
    %61 = vector.broadcast %60 : vector<1x32xf32> to vector<8x32xf32>
    %62 = arith.addf %59, %61 : vector<8x32xf32>
    %63 = vector.shape_cast %62 : vector<8x32xf32> to vector<1x8x32xf32>
    %c0_31 = arith.constant 0 : index
    %c0_32 = arith.constant 0 : index
    %c0_33 = arith.constant 0 : index
    %64 = vector.load %arg12[%c0_31, %c0_32, %c0_33] : memref<1x8x32xf32, #tpu.memory_space<vmem>>, vector<1x8x32xf32>
    tpu.vector_store %arg12[%c0_31, %c0_32, %c0_33], %63 {strides = array<i32>} : memref<1x8x32xf32, #tpu.memory_space<vmem>>, vector<1x8x32xf32>,
    return
  }
  func.func @transform_0(%arg0: i32, %arg1: i32) -> (i32, i32, i32) {
    %c0_i32 = arith.constant 0 : i32
    %c0_i32_0 = arith.constant 0 : i32
    %c0_i32_1 = arith.constant 0 : i32
    return %arg0, %c0_i32, %c0_i32_0 : i32, i32, i32
  }
  func.func @transform_1(%arg0: i32, %arg1: i32) -> (i32, i32, i32) {
    %c0_i32 = arith.constant 0 : i32
    %c0_i32_0 = arith.constant 0 : i32
    return %arg0, %arg1, %c0_i32 : i32, i32, i32
  }
  func.func @transform_2(%arg0: i32, %arg1: i32) -> (i32, i32) {
    %c0_i32 = arith.constant 0 : i32
    %c0_i32_0 = arith.constant 0 : i32
    %c0_i32_1 = arith.constant 0 : i32
    return %c0_i32, %c0_i32_0 : i32, i32
  }
  func.func @transform_3(%arg0: i32, %arg1: i32) -> (i32, i32) {
    %c0_i32 = arith.constant 0 : i32
    %c0_i32_0 = arith.constant 0 : i32
    %c0_i32_1 = arith.constant 0 : i32
    return %c0_i32, %c0_i32_0 : i32, i32
  }
  func.func @transform_4(%arg0: i32, %arg1: i32) -> (i32, i32) {
    %c0_i32 = arith.constant 0 : i32
    %c0_i32_0 = arith.constant 0 : i32
    %c0_i32_1 = arith.constant 0 : i32
    return %c0_i32, %c0_i32_0 : i32, i32
  }
  func.func @transform_5(%arg0: i32, %arg1: i32) -> (i32, i32) {
    %c0_i32 = arith.constant 0 : i32
    %c0_i32_0 = arith.constant 0 : i32
    %c0_i32_1 = arith.constant 0 : i32
    return %c0_i32, %c0_i32_0 : i32, i32
  }
  func.func @transform_6(%arg0: i32, %arg1: i32) -> (i32, i32) {
    %c0_i32 = arith.constant 0 : i32
    %c0_i32_0 = arith.constant 0 : i32
    %c0_i32_1 = arith.constant 0 : i32
    return %c0_i32, %c0_i32_0 : i32, i32
  }
  func.func @transform_7(%arg0: i32, %arg1: i32) -> (i32, i32) {
    %c0_i32 = arith.constant 0 : i32
    %c0_i32_0 = arith.constant 0 : i32
    %c0_i32_1 = arith.constant 0 : i32
    return %c0_i32, %c0_i32_0 : i32, i32
  }
  func.func @transform_8(%arg0: i32, %arg1: i32) -> (i32, i32) {
    %c0_i32 = arith.constant 0 : i32
    %c0_i32_0 = arith.constant 0 : i32
    %c0_i32_1 = arith.constant 0 : i32
    return %c0_i32, %c0_i32_0 : i32, i32
  }
  func.func @transform_9(%arg0: i32, %arg1: i32) -> (i32, i32) {
    %c0_i32 = arith.constant 0 : i32
    %c0_i32_0 = arith.constant 0 : i32
    %c0_i32_1 = arith.constant 0 : i32
    return %c0_i32, %c0_i32_0 : i32, i32
  }
  func.func @transform_10(%arg0: i32, %arg1: i32) -> (i32, i32, i32) {
    %c0_i32 = arith.constant 0 : i32
    %c0_i32_0 = arith.constant 0 : i32
    return %arg0, %arg1, %c0_i32 : i32, i32, i32
  }
}

</mosaic_0001>

<bundles_post_ra>
// kernel: tpu_custom_call.1
= control target key start
LH: loop header
LB: loop body
LE: loop exit
PB: predicated region body
PF: predicated region fallthrough
CT: control target
= control target key end

     0   :  { %s3438_s0 = inlined_call_operand.hbm [shape: f32[2,8,32], index: 0, kind: input, shape index: {}]   ;;  %s3439_s1 = inlined_call_operand.hbm [shape: f32[2,8,32], index: 1, kind: input, shape index: {}]   ;;  %s3440_s2 = inlined_call_operand.hbm [shape: bf16[32,32], index: 2, kind: input, shape index: {}]   ;;  %s3441_s3 = inlined_call_operand.hbm [shape: f32[1,32], index: 3, kind: input, shape index: {}]   ;;  %s3442_s4 = inlined_call_operand.hbm [shape: bf16[32,64], index: 4, kind: input, shape index: {}]   ;;  %s3443_s5 = inlined_call_operand.hbm [shape: f32[1,64], index: 5, kind: input, shape index: {}]   ;;  %s3444_s6 = inlined_call_operand.hbm [shape: bf16[32,32], index: 6, kind: input, shape index: {}]   ;;  %s3445_s7 = inlined_call_operand.hbm [shape: f32[1,32], index: 7, kind: input, shape index: {}]   ;;  %s3446_s8 = inlined_call_operand.hbm [shape: f32[1,32], index: 8, kind: input, shape index: {}]   ;;  %s3447_s9 = inlined_call_operand.hbm [shape: f32[1,32], index: 9, kind: input, shape index: {}]   ;;  %s3448_s10 = inlined_call_operand.hbm [shape: f32[2,8,32], index: 10, kind: output, shape index: {}]  }
   0x1   :  { %3458 = sst [smem:[#allocation32_spill]] %s3439_s1 }
   0x2   :  { %3459 = sst [smem:[#allocation33_spill]] %s3440_s2 }
   0x3   :  { %3460 = sst [smem:[#allocation34_spill]] %s3441_s3 }
   0x4   :  { %3461 = sst [smem:[#allocation35_spill]] %s3442_s4 }
   0x5   :  { %3462 = sst [smem:[#allocation36_spill]] %s3443_s5 }
   0x6   :  { %3463 = sst [smem:[#allocation37_spill]] %s3444_s6 }
   0x7   :  { %3464 = sst [smem:[#allocation38_spill]] %s3445_s7 }
   0x8   :  { %3465 = sst [smem:[#allocation39_spill]] %s3448_s10 }
   0x9   :  { %15 = vsyncpa [#allocation5], 0 }
   0xa   :  { %17 = vsyncpa [#allocation5 + $0x1], 0 }
   0xb   :  { %18 = vsyncpa [#allocation8], 0 }
   0xc   :  { %20 = vsyncpa [#allocation8 + $0x1], 0 }
   0xd   :  { %21 = vsyncpa [#allocation11], 0 }
   0xe   :  { %22 = vsyncpa [#allocation14], 0 }
   0xf   :  { %23 = vsyncpa [#allocation17], 0 }
  0x10   :  { %24 = vsyncpa [#allocation20], 0 }
  0x11   :  { %25 = vsyncpa [#allocation6], 0 }
  0x12   :  { %27 = vsyncpa [#allocation6 + $0x1], 0  ;;  %s2827_s13 = smov 0   ;;  %s2829_s14 = smov 0  }
  0x13   :  { %s2831_s15 = smov 0   ;;  %s2833_s16 = smov 0  }
  0x14   :  { %s2835_s17 = smov 0   ;;  %s2837_s18 = smov 0  }
  0x15 LB: > { %3466 = sst [smem:[#allocation30_spill]] %s2738_s16  ;;  %s2858_s19 = sadd.s32 4294967295, %s2746_s18   ;;  %s2746_s18 = sphi %s2837_s18, %s33_s18   ;;  %s2742_s17 = sphi %s2835_s17, %s3507_s17   ;;  %s2738_s16 = sphi %s2833_s16, %s3506_s16   ;;  %s2734_s15 = sphi %s2831_s15, %s3505_s15   ;;  %s2730_s14 = sphi %s2829_s14, %s3504_s14   ;;  %s2726_s13 = sphi %s2827_s13, %s3503_s13  }
  0x16   : > { %p2014_p0 = scmp.ge.s32.totalorder %s2746_s18, 1  ;;  %p3452_p1 = scmp.eq.s32.totalorder %s2858_s19, 0 }
  0x17   : > { %p300_p2 = scmp.lt.s32.totalorder %s2746_s18, 3  ;;  %s2748_s21 = smov [#allocation9]  }
  0x18   : > { %s312_s22 = sshll.u32 %s2748_s21, 4  ;;  %s2749_s24 = smov [#allocation10]   ;;  %s2867_s22 = int_to_ptr.vmem [resolvable:$true] %s312_s22 }
  0x19   : > { %p2863_p3 = pnand %p2014_p0, %p300_p2  ;;  %s326_s25 = sshll.u32 %s2749_s24, 4  ;;  %s2878_s25 = int_to_ptr.vmem [resolvable:$true] %s326_s25 }
  0x1a   : > { %s2750_s26 = smov [#allocation13]   ;;  %s3470_s2 = sld [smem:[#allocation33_spill]] }
  0x1b   : > { %s3467_s20 = scalar_select %p2863_p3, 1, 0 }
  0x1c   : > { %p2209_p4 = pneg %p2863_p3  ;;  %s2880_s27 = sshll.u32 %s2750_s26, 4  ;;  %s351_s27 = int_to_ptr.vmem [resolvable:$true] %s2880_s27 }
  0x1d   : > { %3468 = sst [smem:[#allocation31_spill]] %s3467_s20 }
  0x1e   : > { %p2874_p6 = pnand %p2209_p4, %p3452_p1 }
  0x20   : > { %s2356_s30 = scalar_lea.hbm %s3470_s2, 256  ;;  %p2890_p8 = pneg %p2874_p6 }
  0x21   : > { %p2357_p7 = scmp.ne.s32.totalorder %s3470_s2, %s2356_s30  ;;  %p2363_p11 = scmp.lt.u32.totalorder %s2356_s30, %s3470_s2 }
  0x23   : > { %p2359_p9 = pnand %p2890_p8, %p2357_p7 }
  0x25   : > { %p2360_p10 = pneg %p2359_p9 }
  0x27   : > { %p2365_p12 = pnand %p2363_p11, %p2360_p10 }
  0x29   : > { %2368 = shalt.err (!%p2365_p12)
}
  0x2a   : > { %s2369_s28 = scalar_lea.vmem %s2867_s22, 256  ;;  %p2377_p4 = scmp.lt.s32.totalorder %s2867_s22, %s2867_s22 }
  0x2b   : > { %p2370_p13 = scmp.ne.s32.totalorder %s2867_s22, %s2369_s28  ;;  %p2378_p5 = scmp.lt.s32.totalorder %s2369_s28, %s2369_s28 }
  0x2d   : > { %p2372_p0 = pnand %p2370_p13, %p2890_p8  ;;  %p2379_p7 = por %p2378_p5, %p2377_p4 }
  0x2f   : > { %p2373_p2 = pneg %p2372_p0 }
  0x31   : > { %p2380_p9 = pnand %p2379_p7, %p2373_p2 }
  0x33   : > { %2383 = shalt.err (!%p2380_p9)
}
  0x34   : > { %s3454_s29 = smov 64   ;;  %s2752_s30 = smov 4  }
  0x35   : > { %2212 = dma.hbm_to_vmem [thread:$0]  (!%p2874_p6), %s3470_s2, 256, %s2867_s22, [#allocation8], %s3454_s29, %s3454_s29, %s2752_s30  }
  0x36   : > { %s3472_s3 = sld [smem:[#allocation34_spill]] }
  0x3c   : > { %s2384_s28 = scalar_lea.hbm %s3472_s3, 16 }
  0x3d   : > { %p2385_p5 = scmp.ne.s32.totalorder %s3472_s3, %s2384_s28  ;;  %p2391_p12 = scmp.lt.u32.totalorder %s2384_s28, %s3472_s3 }
  0x3f   : > { %p2387_p10 = pnand %p2385_p5, %p2890_p8 }
  0x41   : > { %p2388_p11 = pneg %p2387_p10 }
  0x43   : > { %p2393_p13 = pnand %p2391_p12, %p2388_p11 }
  0x45   : > { %2396 = shalt.err (!%p2393_p13)
}
  0x46   : > { %s2397_s22 = scalar_lea.vmem %s2878_s25, 16  ;;  %s2404_s10 = scalar_lea.vmem %s2878_s25, 32 }
  0x47   : > { %p2398_p0 = scmp.ne.s32.totalorder %s2878_s25, %s2397_s22  ;;  %p2405_p7 = scmp.lt.s32.totalorder %s2878_s25, %s2878_s25 }
  0x48   : > { %p2406_p9 = scmp.lt.s32.totalorder %s2404_s10, %s2397_s22 }
  0x49   : > { %p2400_p2 = pnand %p2398_p0, %p2890_p8 }
  0x4a   : > { %p2407_p5 = por %p2406_p9, %p2405_p7 }
  0x4b   : > { %p2401_p4 = pneg %p2400_p2 }
  0x4d   : > { %p2408_p10 = pnand %p2407_p5, %p2401_p4 }
  0x4f   : > { %2411 = shalt.err (!%p2408_p10)
}
  0x50   : > { %2215 = dma.hbm_to_vmem [thread:$0]  (!%p2874_p6), %s3472_s3, 16, %s2878_s25, [#allocation11]  }
  0x51   : > { %s3473_s5 = sld [smem:[#allocation36_spill]] }
  0x57   : > { %s2412_s12 = scalar_lea.hbm %s3473_s5, 16 }
  0x58   : > { %p2413_p11 = scmp.ne.s32.totalorder %s3473_s5, %s2412_s12  ;;  %p2419_p0 = scmp.lt.u32.totalorder %s2412_s12, %s3473_s5 }
  0x5a   : > { %p2415_p12 = pnand %p2413_p11, %p2890_p8 }
  0x5c   : > { %p2416_p13 = pneg %p2415_p12 }
  0x5e   : > { %p2421_p2 = pnand %p2419_p0, %p2416_p13 }
  0x60   : > { %2424 = shalt.err (!%p2421_p2)
}
  0x61   : > { %s2425_s10 = scalar_lea.vmem %s351_s27, 16  ;;  %s2432_s25 = scalar_lea.vmem %s351_s27, 32 }
  0x62   : > { %p2426_p4 = scmp.ne.s32.totalorder %s351_s27, %s2425_s10  ;;  %p2433_p5 = scmp.lt.s32.totalorder %s351_s27, %s351_s27 }
  0x63   : > { %p2434_p10 = scmp.lt.s32.totalorder %s2432_s25, %s2425_s10 }
  0x64   : > { %p2428_p7 = pnand %p2426_p4, %p2890_p8 }
  0x65   : > { %p2435_p1 = por %p2434_p10, %p2433_p5 }
  0x66   : > { %p2429_p9 = pneg %p2428_p7 }
  0x68   : > { %p2436_p3 = pnand %p2435_p1, %p2429_p9 }
  0x6a   : > { %2439 = shalt.err (!%p2436_p3)
}
  0x6b   : > { %2221 = dma.hbm_to_vmem [thread:$0]  (!%p2874_p6), %s3473_s5, 16, %s351_s27, [#allocation14]  }
  0x6c   : > { %s2753_s20 = smov [#allocation16]   ;;  %s2754_s12 = smov [#allocation12]  }
  0x6d   : > { %s374_s11 = sshll.u32 %s2753_s20, 4  ;;  %s336_s24 = sshll.u32 %s2754_s12, 4  ;;  %s375_s11 = int_to_ptr.vmem [resolvable:$true] %s374_s11  ;;  %s337_s24 = int_to_ptr.vmem [resolvable:$true] %s336_s24 }
  0x6e   : > { %s3474_s7 = sld [smem:[#allocation38_spill]] }
  0x74   : > { %s2440_s22 = scalar_lea.hbm %s3474_s7, 16 }
  0x75   : > { %p2441_p1 = scmp.ne.s32.totalorder %s3474_s7, %s2440_s22  ;;  %p2447_p12 = scmp.lt.u32.totalorder %s2440_s22, %s3474_s7 }
  0x77   : > { %p2443_p3 = pnand %p2441_p1, %p2890_p8 }
  0x79   : > { %p2444_p11 = pneg %p2443_p3 }
  0x7b   : > { %p2449_p13 = pnand %p2447_p12, %p2444_p11 }
  0x7d   : > { %2452 = shalt.err (!%p2449_p13)
}
  0x7e   : > { %s2453_s27 = scalar_lea.vmem %s375_s11, 16  ;;  %s2460_s16 = scalar_lea.vmem %s375_s11, 32 }
  0x7f   : > { %p2454_p0 = scmp.ne.s32.totalorder %s375_s11, %s2453_s27  ;;  %p2461_p7 = scmp.lt.s32.totalorder %s375_s11, %s375_s11 }
  0x80   : > { %p2462_p9 = scmp.lt.s32.totalorder %s2460_s16, %s2453_s27 }
  0x81   : > { %p2456_p2 = pnand %p2454_p0, %p2890_p8 }
  0x82   : > { %p2463_p5 = por %p2462_p9, %p2461_p7 }
  0x83   : > { %p2457_p4 = pneg %p2456_p2 }
  0x85   : > { %p2464_p10 = pnand %p2463_p5, %p2457_p4 }
  0x87   : > { %2467 = shalt.err (!%p2464_p10)
}
  0x88   : > { %2227 = dma.hbm_to_vmem [thread:$0]  (!%p2874_p6), %s3474_s7, 16, %s375_s11, [#allocation17]  }
  0x89   : > { %s3475_s4 = sld [smem:[#allocation35_spill]] }
  0x8f   : > { %s2468_s28 = scalar_lea.hbm %s3475_s4, 256 }
  0x90   : > { %p2469_p1 = scmp.ne.s32.totalorder %s3475_s4, %s2468_s28  ;;  %p2475_p12 = scmp.lt.u32.totalorder %s2468_s28, %s3475_s4 }
  0x92   : > { %p2471_p3 = pnand %p2469_p1, %p2890_p8 }
  0x94   : > { %p2472_p11 = pneg %p2471_p3 }
  0x96   : > { %p2477_p13 = pnand %p2475_p12, %p2472_p11 }
  0x98   : > { %2480 = shalt.err (!%p2477_p13)
}
  0x99   : > { %s2481_s27 = scalar_lea.vmem %s337_s24, 256  ;;  %p2489_p7 = scmp.lt.s32.totalorder %s337_s24, %s337_s24 }
  0x9a   : > { %p2482_p0 = scmp.ne.s32.totalorder %s337_s24, %s2481_s27  ;;  %p2490_p9 = scmp.lt.s32.totalorder %s2481_s27, %s2481_s27 }
  0x9c   : > { %p2484_p2 = pnand %p2482_p0, %p2890_p8  ;;  %p2491_p5 = por %p2490_p9, %p2489_p7 }
  0x9e   : > { %p2485_p4 = pneg %p2484_p2 }
  0xa0   : > { %p2492_p10 = pnand %p2491_p5, %p2485_p4 }
  0xa2   : > { %2495 = shalt.err (!%p2492_p10)
}
  0xa3   : > { %s3476_s11 = smov 64   ;;  %s2755_s12 = smov [#allocation15]  }
  0xa4   : > { %2218 = dma.hbm_to_vmem [thread:$0]  (!%p2874_p6), %s3475_s4, 256, %s337_s24, [#allocation11], %s3476_s11, %s3476_s11, %s2752_s30  }
  0xa5   : > { %s360_s29 = sshll.u32 %s2755_s12, 4  ;;  %s2756_s26 = smov [#allocation18]   ;;  %s361_s29 = int_to_ptr.vmem [resolvable:$true] %s360_s29 }
  0xa6   : > { %s385_s28 = sshll.u32 %s2756_s26, 4  ;;  %s3477_s6 = sld [smem:[#allocation37_spill]]  ;;  %s386_s28 = int_to_ptr.vmem [resolvable:$true] %s385_s28 }
  0xac   : > { %s2496_s25 = scalar_lea.hbm %s3477_s6, 256 }
  0xad   : > { %p2497_p1 = scmp.ne.s32.totalorder %s3477_s6, %s2496_s25  ;;  %p2503_p12 = scmp.lt.u32.totalorder %s2496_s25, %s3477_s6 }
  0xaf   : > { %p2499_p3 = pnand %p2497_p1, %p2890_p8 }
  0xb1   : > { %p2500_p11 = pneg %p2499_p3 }
  0xb3   : > { %p2505_p13 = pnand %p2503_p12, %p2500_p11 }
  0xb5   : > { %2508 = shalt.err (!%p2505_p13)
}
  0xb6   : > { %s2509_s24 = scalar_lea.vmem %s361_s29, 256  ;;  %p2517_p7 = scmp.lt.s32.totalorder %s361_s29, %s361_s29 }
  0xb7   : > { %p2510_p0 = scmp.ne.s32.totalorder %s361_s29, %s2509_s24  ;;  %p2518_p9 = scmp.lt.s32.totalorder %s2509_s24, %s2509_s24 }
  0xb9   : > { %p2512_p2 = pnand %p2510_p0, %p2890_p8  ;;  %p2519_p5 = por %p2518_p9, %p2517_p7 }
  0xbb   : > { %p2513_p4 = pneg %p2512_p2 }
  0xbd   : > { %p2520_p10 = pnand %p2519_p5, %p2513_p4 }
  0xbf   : > { %2523 = shalt.err (!%p2520_p10)
}
  0xc0   : > { %2224 = dma.hbm_to_vmem [thread:$0]  (!%p2874_p6), %s3477_s6, 256, %s361_s29, [#allocation14], %s3476_s11, %s3476_s11, %s2752_s30  }
  0xc1   : > { %s2524_s22 = scalar_lea.hbm %s3446_s8, 16 }
  0xc2   : > { %p2525_p1 = scmp.ne.s32.totalorder %s3446_s8, %s2524_s22  ;;  %p2531_p12 = scmp.lt.u32.totalorder %s2524_s22, %s3446_s8 }
  0xc4   : > { %p2527_p3 = pnand %p2525_p1, %p2890_p8 }
  0xc6   : > { %p2528_p11 = pneg %p2527_p3 }
  0xc8   : > { %p2533_p13 = pnand %p2531_p12, %p2528_p11 }
  0xca   : > { %2536 = shalt.err (!%p2533_p13)
}
  0xcb   : > { %s2537_s16 = scalar_lea.vmem %s386_s28, 16  ;;  %s2544_s30 = scalar_lea.vmem %s386_s28, 32 }
  0xcc   : > { %p2538_p0 = scmp.ne.s32.totalorder %s386_s28, %s2537_s16  ;;  %p2545_p7 = scmp.lt.s32.totalorder %s386_s28, %s386_s28 }
  0xcd   : > { %p2546_p9 = scmp.lt.s32.totalorder %s2544_s30, %s2537_s16 }
  0xce   : > { %p2540_p2 = pnand %p2538_p0, %p2890_p8 }
  0xcf   : > { %p2547_p5 = por %p2546_p9, %p2545_p7 }
  0xd0   : > { %p2541_p4 = pneg %p2540_p2 }
  0xd2   : > { %p2548_p10 = pnand %p2547_p5, %p2541_p4 }
  0xd4   : > { %2551 = shalt.err (!%p2548_p10)
}
  0xd5   : > { %2230 = dma.hbm_to_vmem [thread:$0]  (!%p2874_p6), %s3446_s8, 16, %s386_s28, [#allocation17]  }
  0xd6   : > { %s2757_s24 = smov [#allocation19]   ;;  %s2552_s26 = scalar_lea.hbm %s3447_s9, 16 }
  0xd7   : > { %s396_s2 = sshll.u32 %s2757_s24, 4  ;;  %p2553_p1 = scmp.ne.s32.totalorder %s3447_s9, %s2552_s26  ;;  %s397_s2 = int_to_ptr.vmem [resolvable:$true] %s396_s2 }
  0xd8   : > { %p2559_p12 = scmp.lt.u32.totalorder %s2552_s26, %s3447_s9 }
  0xd9   : > { %p2555_p3 = pnand %p2553_p1, %p2890_p8 }
  0xdb   : > { %p2556_p11 = pneg %p2555_p3 }
  0xdd   : > { %p2561_p13 = pnand %p2559_p12, %p2556_p11 }
  0xdf   : > { %2564 = shalt.err (!%p2561_p13)
}
  0xe0   : > { %s2565_s28 = scalar_lea.vmem %s397_s2, 16  ;;  %s2572_s27 = scalar_lea.vmem %s397_s2, 32 }
  0xe1   : > { %p2566_p0 = scmp.ne.s32.totalorder %s397_s2, %s2565_s28  ;;  %p2573_p7 = scmp.lt.s32.totalorder %s397_s2, %s397_s2 }
  0xe2   : > { %p2574_p9 = scmp.lt.s32.totalorder %s2572_s27, %s2565_s28 }
  0xe3   : > { %p2568_p2 = pnand %p2566_p0, %p2890_p8 }
  0xe4   : > { %p2575_p5 = por %p2574_p9, %p2573_p7 }
  0xe5   : > { %p2569_p4 = pneg %p2568_p2 }
  0xe7   : > { %p2576_p10 = pnand %p2575_p5, %p2569_p4 }
  0xe9   : > { %2579 = shalt.err (!%p2576_p10)
}
  0xea   : > { %2233 = dma.hbm_to_vmem [thread:$0]  (!%p2874_p6), %s3447_s9, 16, %s397_s2, [#allocation20]  }
  0xeb   : > { %s2013_s21 = sadd.s32 4294967294, %s2746_s18   ;;  %s45_s11 = sadd.s32 1, %s2742_s17 }
  0xec   : > { %p47_p8 = scmp.ge.s32.totalorder %s45_s11, 2  ;;  %s52_s23 = sadd.s32 1, %s2734_s15 }
  0xed   : > { %p59_p1 = scmp.ne.s32.totalorder %s2734_s15, %s2730_s14  ;;  %p60_p3 = scmp.eq.s32.totalorder %s2746_s18, 0 }
  0xee   : > { %s3509_s11 = smov (%p47_p8, %s45_s11), 0  ;;  %p65_p12 = scmp.ne.s32.totalorder %s2730_s14, %s2726_s13 }
  0xef   : > { %p3061_p11 = por %p60_p3, %p59_p1  ;;  %s49_s24 = ssub.s32 %s2742_s17, %s3509_s11 }
  0xf0   : > { %p287_p6 = scmp.eq.s32.totalorder %s2858_s19, 1  ;;  %p50_p13 = scmp.eq.s32.totalorder %s49_s24, 0 }
  0xf1   : > { %p3479_p0 = scmp.eq.s32.totalorder %s2858_s19, 0  ;;  %p293_p7 = scmp.eq.s32.totalorder %s2013_s21, 1 }
  0xf2   : > { %p3076_p4 = por %p287_p6, %p59_p1  ;;  %p2253_p5 = scmp.lt.s32.totalorder %s2746_s18, 2 }
  0xf3   : > { %p3072_p2 = por %p3479_p0, %p65_p12  ;;  %p3083_p9 = por %p293_p7, %p65_p12 }
  0xf4   : > { %s3481_s20 = scalar_select %p3076_p4, 1, 0 }
  0xf5   : > { %s3480_s2 = scalar_select %p3072_p2, 1, 0 }
  0xf6   : > { %s3081_s12 = scalar_select %p50_p13, %s2734_s15, %s52_s23  }
  0xf7   : > { %s3482_s26 = scalar_select %p3083_p9, 1, 0 }
  0xf8   : > { %s407_s22 = sand.u32 1, %s2734_s15   ;;  %s2025_s10 = sshll.u32 %s2742_s17, 7 }
  0xf9   : > { %s3090_s25 = sshll.u32 %s407_s22, 3  ;;  %s3095_s27 = scalar_lea.hbm %s3438_s0, %s2025_s10 }
  0xfa   : > { %s411_s16 = scalar_lea.vmem [#allocation4], %s3090_s25  ;;  %p3100_p10 = pnand %p2253_p5, %p3061_p11 }
  0xfb   : > { %s418_s30 = sshll.u32 %s411_s16, 4  ;;  %s3484_s1 = sld [smem:[#allocation32_spill]]  ;;  %s3104_s30 = int_to_ptr.vmem [resolvable:$true] %s418_s30 }
  0xfc   : > { %s408_s3 = scalar_lea.sflag [#allocation5], %s407_s22  ;;  %s2580_s4 = scalar_lea.hbm %s3095_s27, 128 }
  0xfd   : > { %p2581_p8 = scmp.ne.s32.totalorder %s3095_s27, %s2580_s4  ;;  %p2582_p1 = pneg %p3100_p10 }
  0xfe   : > { %s2585_s5 = scalar_lea.hbm %s3438_s0, 256  ;;  %p2586_p12 = scmp.lt.u32.totalorder %s3095_s27, %s3438_s0 }
  0xff   : > { %p2583_p3 = pnand %p2582_p1, %p2581_p8  ;;  %p2587_p6 = scmp.lt.u32.totalorder %s2585_s5, %s2580_s4 }
 0x100   : > { %p2589_p0 = scmp.lt.u32.totalorder %s2580_s4, %s3095_s27 }
 0x101   : > { %s3109_s28 = scalar_lea.hbm %s3484_s1, %s2025_s10  ;;  %p2584_p11 = pneg %p2583_p3 }
 0x102   : > { %p2588_p13 = por %p2587_p6, %p2586_p12 }
 0x104   : > { %p2590_p7 = por %p2589_p0, %p2588_p13 }
 0x106   : > { %p2591_p5 = pnand %p2590_p7, %p2584_p11 }
 0x108   : > { %2594 = shalt.err (!%p2591_p5)
}
 0x109   : > { %s2595_s22 = scalar_lea.vmem %s3104_s30, 128  ;;  %s2758_s10 = smov [#allocation4]  }
 0x10a   : > { %p2596_p8 = scmp.ne.s32.totalorder %s3104_s30, %s2595_s22  ;;  %s2600_s23 = sshll.u32 %s2758_s10, 4  ;;  %s2601_s23 = int_to_ptr.vmem [resolvable:$false] %s2600_s23 }
 0x10b   : > { %s2602_s6 = scalar_lea.vmem %s2601_s23, 256  ;;  %p2603_p4 = scmp.lt.s32.totalorder %s3104_s30, %s2601_s23 }
 0x10c   : > { %p2598_p3 = pnand %p2596_p8, %p2582_p1  ;;  %p2604_p12 = scmp.lt.s32.totalorder %s2602_s6, %s2595_s22 }
 0x10e   : > { %p2599_p9 = pneg %p2598_p3  ;;  %p2605_p6 = por %p2604_p12, %p2603_p4 }
 0x110   : > { %p2606_p13 = pnand %p2605_p6, %p2599_p9 }
 0x112   : > { %2609 = shalt.err (!%p2606_p13)
}
 0x113   : > { %2237 = dma.hbm_to_vmem [thread:$0]  (!%p3100_p10), %s3095_s27, 128, %s3104_s30, %s408_s3  }
 0x114   : > { %s425_s4 = sand.u32 1, %s2746_s18   ;;  %s429_s5 = scalar_lea.vmem [#allocation7], %s3090_s25 }
 0x115   : > { %s437_s7 = sshll.u32 %s429_s5, 4  ;;  %s426_s24 = scalar_lea.sflag [#allocation8], %s425_s4  ;;  %s438_s7 = int_to_ptr.vmem [resolvable:$true] %s437_s7 }
 0x116   : > { %s2610_s29 = scalar_lea.hbm %s3109_s28, 128  ;;  %s2615_s10 = scalar_lea.hbm %s3484_s1, 256 }
 0x117   : > { %p2611_p4 = scmp.ne.s32.totalorder %s3109_s28, %s2610_s29  ;;  %p2616_p0 = scmp.lt.u32.totalorder %s3109_s28, %s3484_s1 }
 0x118   : > { %p2617_p7 = scmp.lt.u32.totalorder %s2615_s10, %s2610_s29  ;;  %p2619_p8 = scmp.lt.u32.totalorder %s2610_s29, %s3109_s28 }
 0x119   : > { %p2613_p9 = pnand %p2611_p4, %p2582_p1 }
 0x11a   : > { %p2618_p5 = por %p2617_p7, %p2616_p0 }
 0x11b   : > { %p2614_p11 = pneg %p2613_p9 }
 0x11c   : > { %p2620_p3 = por %p2619_p8, %p2618_p5 }
 0x11e   : > { %p2621_p12 = pnand %p2620_p3, %p2614_p11 }
 0x120   : > { %2624 = shalt.err (!%p2621_p12)
}
 0x121   : > { %s2625_s3 = scalar_lea.vmem %s438_s7, 128  ;;  %s2759_s25 = smov [#allocation7]  }
 0x122   : > { %p2626_p6 = scmp.ne.s32.totalorder %s438_s7, %s2625_s3  ;;  %s2630_s27 = sshll.u32 %s2759_s25, 4  ;;  %s2631_s27 = int_to_ptr.vmem [resolvable:$false] %s2630_s27 }
 0x123   : > { %s2632_s30 = scalar_lea.vmem %s2631_s27, 256  ;;  %p2633_p9 = scmp.lt.s32.totalorder %s438_s7, %s2631_s27 }
 0x124   : > { %p2628_p13 = pnand %p2626_p6, %p2582_p1  ;;  %p2634_p2 = scmp.lt.s32.totalorder %s2632_s30, %s2625_s3 }
 0x126   : > { %p2629_p4 = pneg %p2628_p13  ;;  %p2635_p0 = por %p2634_p2, %p2633_p9 }
 0x128   : > { %p2636_p7 = pnand %p2635_p0, %p2629_p4 }
 0x12a   : > { %2639 = shalt.err (!%p2636_p7)
}
 0x12b   : > { %2240 = dma.hbm_to_vmem [thread:$0]  (!%p3100_p10), %s3109_s28, 128, %s438_s7, %s426_s24  }
 0x12c   : > { %s3485_s4 = sld [smem:[#allocation31_spill]] }
 0x132   : > { %p3486_p11 = scmp.ne.s32.totalorder %s3485_s4, 0 }
 0x133   : > { %s3160_s5 = sand.u32 (!%p3486_p11), 1, %s2730_s14   ;;  %p3487_p2 = scmp.ne.s32.totalorder (!%p3486_p11), %s3480_s2, 0 }
 0x134   : > { %446 = sbr.rel (%p3486_p11) target bundleno = 2149 (0x865), region = 60  ;;  %s3163_s29 = sshll.u32 (!%p3486_p11), %s3160_s5, 3 }
 0x135   : > { %s449_s16 = scalar_lea.sflag (!%p3486_p11), [#allocation5], %s3160_s5  ;;  %s452_s22 = scalar_lea.vmem (!%p3486_p11), [#allocation4], %s3163_s29 }
 0x13b   : > { %2693 = dma.done.wait (%p3487_p2), %s449_s16, 128  }
 0x13c   : > { %2695 = vsyncadd (%p3487_p2), %s449_s16, 4294967168  ;;  %s457_s21 = sand.u32 1, %s2858_s19   ;;  %s461_s7 = scalar_lea.vmem [#allocation7], %s3163_s29 }
 0x13d   : > { %s458_s28 = scalar_lea.sflag [#allocation8], %s457_s21 }
 0x13e   : > { %2697 = dma.done.wait (%p3487_p2), %s458_s28, 128  }
 0x13f   : > { %2699 = vsyncadd (%p3487_p2), %s458_s28, 4294967168  ;;  %p3488_p10 = scmp.eq.s32.totalorder %s2858_s19, 0 }
 0x141   : > { %2701 = dma.done.wait (%p3488_p10), [#allocation8], 256   ;;  %p3489_p1 = pmov %p3488_p10 }
 0x143   : > { %2703 = vsyncadd (%p3489_p1), [#allocation8], 4294967040  ;;  %p3490_p5 = pmov %p3489_p1 }
 0x144   : > { %p3491_p8 = pmov %p3489_p1 }
 0x145   : > { %2705 = dma.done.wait (%p3490_p5), [#allocation11], 272  }
 0x146   : > { %2707 = vsyncadd (%p3491_p8), [#allocation11], 4294967024  ;;  %p3492_p3 = pmov %p3489_p1 }
 0x147   : > { %p3493_p12 = pmov %p3489_p1 }
 0x148   : > { %2709 = dma.done.wait (%p3492_p3), [#allocation14], 272  }
 0x149   : > { %2711 = vsyncadd (%p3493_p12), [#allocation14], 4294967024  ;;  %p3494_p6 = pmov %p3489_p1 }
 0x14a   : > { %p3495_p13 = pmov %p3489_p1 }
 0x14b   : > { %2713 = dma.done.wait (%p3494_p6), [#allocation17], 32  }
 0x14c   : > { %2715 = vsyncadd (%p3495_p13), [#allocation17], 4294967264  ;;  %p3496_p4 = pmov %p3489_p1 }
 0x14d   : > { %p3497_p9 = pmov %p3489_p1 }
 0x14e   : > { %2717 = dma.done.wait (%p3496_p4), [#allocation20], 16  }
 0x14f   : > { %2719 = vsyncadd (%p3497_p9), [#allocation20], 4294967280  ;;  %v2760_v0 = vmov 0.0   ;;  %vm2761_vm0 = vmmov 0   ;;  %v2332_v1 = vld [vmem:[#allocation12] sm:$0xff]   ;;  %v2333_v2 = vld [vmem:[#allocation12 + $0x8] sm:$0xff]   ;;  %v624_v23 = vlaneseq }
 0x150   : > { %2099 = vmatprep.subr.bf16.mxu0 %v2760_v0  ;;  %2107 = vmatprep.subr.bf16.mxu1 %v2760_v0  ;;  %v2334_v3 = vld [vmem:[#allocation9] sm:$0xff]   ;;  %v2335_v5 = vld [vmem:[#allocation9 + $0x8] sm:$0xff]   ;;  %v3204_v6 = vld [vmem:[%s461_s7] sm:$0xff]  ;;  %vm565_vm1 = vcmask 261120   ;;  %s2762_s19 = smov 104   ;;  %s2763_s2 = smov 120  }
 0x151   : > { %2103 = vmatprep.mubr.msk.bf16.mxu0 %vm2761_vm0, %v2760_v0  ;;  %2111 = vmatprep.mubr.msk.bf16.mxu1 %vm2761_vm0, %v2760_v0  ;;  %v540_v4 = vld [vmem:[%s452_s22] sm:$0xff]  ;;  %v921_v8 = vpack.c.bf16 %v3204_v6, %v3204_v6  ;;  %v2048_v11 = vld [vmem:[#allocation10] ss:$0 sm:$0xff]  ;;  %s2764_s24 = smov 112   ;;  %v2765_v21 = vmov 1983009808  }
 0x152   : > { %2100 = vmatpush3.bf16.msra.mxu0 %v2332_v1  ;;  %2108 = vmatpush3.bf16.msra.mxu1 %v2334_v3  ;;  %v541_v7 = vpack.c.bf16 %v540_v4, %v540_v4  ;;  %v2040_v9 = vld [vmem:[#allocation13] ss:$0 sm:$0xff]  ;;  %v622_v22 = vunpack.c.l.s4 %v2765_v21  ;;  %v2766_v24 = vmov 1934713408   ;;  %v625_v27 = vshrl.u32 %v624_v23, 7  ;;  %s2767_s10 = smov 96  }
 0x153   : > { %2101 = vmatprep.subr.bf16.mxu0 %v2760_v0  ;;  %2109 = vmatprep.subr.bf16.mxu1 %v2760_v0  ;;  %v654_v25 = vunpack.c.l.s4 %v2766_v24  ;;  %vm759_vm2 = vcmask 60416   ;;  %vm1143_vm3 = vcmask 64512   ;;  %vm1383_vm4 = vcmask 1043456   ;;  %s2768_s23 = smov 16   ;;  %s2769_s6 = smov 8  }
 0x154   : > { %v623_v26 = vunpack.c.0.s8 %v622_v22  ;;  %s2770_s3 = smov 24   ;;  %vm1714_vm5 = vcmask 130048   ;;  %vm1716_vm6 = vcmask 195584   ;;  %s3498_s25 = sld [smem:[#allocation30_spill]] }
 0x155   : > { %v655_v30 = vunpack.c.0.s8 %v654_v25  ;;  %s534_s30 = scalar_lea.vmem [#allocation21], %s3163_s29  ;;  %s3499_s21 = sld [smem:[#allocation39_spill]] }
 0x156   : > { %2102 = vmatpush3.bf16.msra.mxu0 %v2333_v2  ;;  %2110 = vmatpush3.bf16.msra.mxu1 %v2335_v5  ;;  %v3226_v31 = vsub.s32 %v623_v26, %v625_v27  ;;  %s1833_s4 = sshll.u32 %s534_s30, 4  ;;  %s1819_s7 = scalar_lea.sflag [#allocation6], %s3160_s5  ;;  %s3390_s4 = int_to_ptr.vmem [resolvable:$true] %s1833_s4 }
 0x157   : > { %2115 = vmatprep.subr.bf16.mxu0 %v2760_v0  ;;  %2121 = vmatprep.subr.bf16.mxu1 %v2760_v0  ;;  %v3238_v38 = vsub.s32 %v655_v30, %v625_v27  ;;  %p3500_p7 = scmp.ne.s32.totalorder %s3481_s20, 0  ;;  %s2771_s29 = smov [#allocation21]  }
 0x159   : > { %2104 = vmatmul.mubr.msk.bf16.vlgmr.msra.gmra.mrb[0].mxu0 %vm565_vm1, %v541_v7  ;;  %2112 = vmatmul.mubr.msk.bf16.vlgmr.msra.gmra.mrb[0].mxu1 %vm565_vm1, %v921_v8 }
 0x15a   : > { %2117 = vmatprep.mubr.msk.bf16.mxu0 %vm2761_vm0, %v2760_v0  ;;  %2123 = vmatprep.mubr.msk.bf16.mxu1 %vm2761_vm0, %v2760_v0  ;;  %s2071_s27 = sshll.u32 %s3498_s25, 7 }
 0x15b   : > { %s3388_s28 = scalar_lea.hbm %s3499_s21, %s2071_s27 }
 0x22c   : > { %v603_v10 = vpop.f32.mrb[0].mxu0  ;;  %v983_v15 = vpop.f32.mrb[0].mxu1 }
 0x22d   : > { %v3217_v12 = vadd.f32 %v2040_v9, %v603_v10  ;;  %v2105_v13 = vpop.f32.mrb[1].mxu0  ;;  %v984_v17 = vadd.f32 %v2048_v11, %v983_v15  ;;  %v2113_v18 = vpop.f32.mrb[1].mxu1 }
 0x22e   : > { %v606_v14 = vpop.f32.mrb[2].mxu0  ;;  %v986_v19 = vpop.f32.mrb[2].mxu1 }
 0x22f   : > { %616 = vrot.lane.b32.xlu1 %v3217_v12, %s2762_s19  ;;  %610 = vrot.lane.b32.xlu0 %v3217_v12, %s2763_s2  ;;  %v2106_v16 = vpop.f32.mrb[3].mxu0  ;;  %v2114_v20 = vpop.f32.mrb[3].mxu1 }
 0x233   : > { %990 = vrot.lane.b32.xlu1 %v984_v17, %s2763_s2  ;;  %613 = vrot.lane.b32.xlu0 %v3217_v12, %s2764_s24  ;;  %s2644_s2 = sshll.u32 %s2771_s29, 4  ;;  %s2645_s2 = int_to_ptr.vmem [resolvable:$false] %s2644_s2 }
 0x234   : > { %p2647_p10 = scmp.lt.s32.totalorder %s3390_s4, %s2645_s2 }
 0x237   : > { %996 = vrot.lane.b32.xlu1 %v984_v17, %s2762_s19  ;;  %993 = vrot.lane.b32.xlu0 %v984_v17, %s2764_s24  ;;  %s2640_s19 = scalar_lea.vmem %s3390_s4, 128  ;;  %s2646_s24 = scalar_lea.vmem %s2645_s2, 256 }
 0x238   : > { %p2641_p0 = scmp.ne.s32.totalorder %s3390_s4, %s2640_s19  ;;  %p2648_p1 = scmp.lt.s32.totalorder %s2646_s24, %s2640_s19 }
 0x23a   : > { %p2642_p11 = pnand %p2641_p0, %p3500_p7  ;;  %p2649_p5 = por %p2648_p1, %p2647_p10 }
 0x23c   : > { %p2643_p2 = pneg %p2642_p11 }
 0x23e   : > { %p2650_p8 = pnand %p2649_p5, %p2643_p2 }
 0x2a1   : > { %v3222_v28 = vpop.permute.xlu1 %616  ;;  %v3224_v29 = vpop.permute.xlu0 %610 }
 0x2a2   : > { %v635_v32 = vcombine.low %v3224_v29, %v3222_v28  ;;  %v636_v33 = vcombine.high %v3224_v29, %v3222_v28 }
 0x2a4   : > { %v643_v39 = vrot.slane %v635_v32, %v3226_v31  ;;  %v650_v40 = vrot.slane %v636_v33, %v3226_v31 }
 0x2a5   : > { %v991_v34 = vpop.permute.xlu1 %990  ;;  %v3232_v35 = vpop.permute.xlu0 %613 }
 0x2a6   : > { %v619_v36 = vcombine.low %v3217_v12, %v3232_v35  ;;  %v620_v37 = vcombine.high %v3217_v12, %v3232_v35 }
 0x2a8   : > { %v627_v41 = vrot.slane %v619_v36, %v3226_v31  ;;  %v634_v42 = vrot.slane %v620_v37, %v3226_v31 }
 0x2a9   : > { %v997_v43 = vpop.permute.xlu1 %996  ;;  %v994_v44 = vpop.permute.xlu0 %993 }
 0x2aa   : > { %v651_v45 = vcombine.low %v627_v41, %v643_v39  ;;  %v652_v46 = vcombine.high %v627_v41, %v643_v39  ;;  %v667_v47 = vcombine.low %v634_v42, %v650_v40  ;;  %v668_v48 = vcombine.high %v634_v42, %v650_v40 }
 0x2ab   : > { %v1015_v49 = vcombine.low %v991_v34, %v997_v43  ;;  %v1016_v50 = vcombine.high %v991_v34, %v997_v43  ;;  %v999_v51 = vcombine.low %v984_v17, %v994_v44  ;;  %v1000_v52 = vcombine.high %v984_v17, %v994_v44 }
 0x2ac   : > { %v659_v53 = vrot.slane %v651_v45, %v3238_v38  ;;  %v666_v54 = vrot.slane %v652_v46, %v3238_v38  ;;  %v675_v55 = vrot.slane %v667_v47, %v3238_v38  ;;  %v682_v56 = vrot.slane %v668_v48, %v3238_v38 }
 0x2ad   : > { %v1023_v57 = vrot.slane %v1015_v49, %v3226_v31  ;;  %v1030_v58 = vrot.slane %v1016_v50, %v3226_v31  ;;  %v1007_v59 = vrot.slane %v999_v51, %v3226_v31  ;;  %v1014_v60 = vrot.slane %v1000_v52, %v3226_v31 }
 0x2ae   : > { %v687_v61 = vcombine.low %v659_v53, %v666_v54  ;;  %v2044_v62 = vcombine.high %v659_v53, %v666_v54  ;;  %v703_v63 = vcombine.low %v675_v55, %v682_v56  ;;  %v2045_v1 = vcombine.high %v675_v55, %v682_v56 }
 0x2af   : > { %v1031_v2 = vcombine.low %v1007_v59, %v1023_v57  ;;  %v1032_v3 = vcombine.high %v1007_v59, %v1023_v57  ;;  %v1047_v4 = vcombine.low %v1014_v60, %v1030_v58  ;;  %v1048_v5 = vcombine.high %v1014_v60, %v1030_v58 }
 0x2b0   : > { %v694_v7 = vrot.slane %v687_v61, %v3226_v31  ;;  %v702_v8 = vrot.slane %v2044_v62, %v3226_v31  ;;  %v710_v9 = vrot.slane %v703_v63, %v3226_v31  ;;  %v718_v10 = vrot.slane %v2045_v1, %v3226_v31 }
 0x2b1   : > { %v1039_v11 = vrot.slane %v1031_v2, %v3238_v38  ;;  %v1046_v13 = vrot.slane %v1032_v3, %v3238_v38  ;;  %v1055_v14 = vrot.slane %v1047_v4, %v3238_v38  ;;  %v1062_v15 = vrot.slane %v1048_v5, %v3238_v38 }
 0x2b2   : > { %v719_v16 = vcombine.low %v694_v7, %v702_v8  ;;  %v720_v17 = vcombine.high %v694_v7, %v702_v8  ;;  %v735_v18 = vcombine.low %v710_v9, %v718_v10  ;;  %v736_v19 = vcombine.high %v710_v9, %v718_v10 }
 0x2b3   : > { %v1067_v20 = vcombine.low %v1039_v11, %v1046_v13  ;;  %v2052_v21 = vcombine.high %v1039_v11, %v1046_v13  ;;  %v1083_v22 = vcombine.low %v1055_v14, %v1062_v15  ;;  %v2053_v23 = vcombine.high %v1055_v14, %v1062_v15 }
 0x2b4   : > { %v727_v24 = vrot.slane %v719_v16, %v3238_v38  ;;  %v734_v25 = vrot.slane %v720_v17, %v3238_v38  ;;  %v743_v26 = vrot.slane %v735_v18, %v3238_v38  ;;  %v750_v27 = vrot.slane %v736_v19, %v3238_v38 }
 0x2b5   : > { %v1074_v36 = vrot.slane %v1067_v20, %v3226_v31  ;;  %v1082_v37 = vrot.slane %v2052_v21, %v3226_v31  ;;  %v1090_v39 = vrot.slane %v1083_v22, %v3226_v31  ;;  %v1098_v40 = vrot.slane %v2053_v23, %v3226_v31 }
 0x2b6   : > { %v751_v30 = vcombine.low %v727_v24, %v743_v26  ;;  %v752_v32 = vcombine.high %v727_v24, %v743_v26  ;;  %v753_v33 = vcombine.low %v734_v25, %v750_v27  ;;  %v754_v34 = vcombine.high %v734_v25, %v750_v27 }
 0x2b7   : > { %v1099_v45 = vcombine.low %v1074_v36, %v1082_v37  ;;  %v1115_v46 = vcombine.low %v1090_v39, %v1098_v40  ;;  %v1100_v53 = vcombine.high %v1074_v36, %v1082_v37  ;;  %v1116_v54 = vcombine.high %v1090_v39, %v1098_v40 }
 0x2b8   : > { %v755_v41 = vpack.c.bf16 %v751_v30, %v751_v30  ;;  %v756_v42 = vpack.c.bf16 %v752_v32, %v752_v32  ;;  %v757_v43 = vpack.c.bf16 %v753_v33, %v753_v33  ;;  %v758_v44 = vpack.c.bf16 %v754_v34, %v754_v34 }
 0x2b9   : > { %v1107_v47 = vrot.slane %v1099_v45, %v3238_v38  ;;  %v1123_v48 = vrot.slane %v1115_v46, %v3238_v38  ;;  %v1114_v61 = vrot.slane %v1100_v53, %v3238_v38  ;;  %v1130_v62 = vrot.slane %v1116_v54, %v3238_v38 }
 0x2ba   : > { %760 = vst.msk [vmem:[#allocation2] sm:$0xf] %vm759_vm2, %v755_v41  ;;  %761 = vst.msk [vmem:[#allocation2 + $0x4] sm:$0xf] %vm759_vm2, %v756_v42 }
 0x2bb   : > { %762 = vst.msk [vmem:[#allocation2 + $0x8] sm:$0xf] %vm759_vm2, %v757_v43  ;;  %763 = vst.msk [vmem:[#allocation2 + $0xc] sm:$0xf] %vm759_vm2, %v758_v44  ;;  %v1131_v55 = vcombine.low %v1107_v47, %v1123_v48  ;;  %v1132_v56 = vcombine.high %v1107_v47, %v1123_v48  ;;  %v1133_v2 = vcombine.low %v1114_v61, %v1130_v62 }
 0x2bc   : > { %v1134_v3 = vcombine.high %v1114_v61, %v1130_v62 }
 0x2bd   : > { %v1135_v59 = vpack.c.bf16 %v1131_v55, %v1131_v55  ;;  %v1136_v60 = vpack.c.bf16 %v1132_v56, %v1132_v56  ;;  %v1137_v4 = vpack.c.bf16 %v1133_v2, %v1133_v2 }
 0x2be   : > { %v1138_v5 = vpack.c.bf16 %v1134_v3, %v1134_v3 }
 0x2c1   : > { %v1139_v49 = vld [vmem:[#allocation2] sm:$0xf]  ;;  %v1140_v50 = vld [vmem:[#allocation2 + $0x4] sm:$0xf] }
 0x2c2   : > { %v1148_v51 = vsel %vm1143_vm3, %v1139_v49, 0  ;;  %v1194_v52 = vsel %vm1143_vm3, %v1140_v50, 0  ;;  %v1141_v57 = vld [vmem:[#allocation2 + $0x8] sm:$0xf]  ;;  %v1142_v58 = vld [vmem:[#allocation2 + $0xc] sm:$0xf] }
 0x2c3   : > { %2116 = vmatpush3.bf16.xpose.msra.mxu0 %v1148_v51  ;;  %2122 = vmatpush3.bf16.xpose.msra.mxu1 %v1194_v52  ;;  %v1240_v63 = vsel %vm1143_vm3, %v1141_v57, 0  ;;  %v1286_v1 = vsel %vm1143_vm3, %v1142_v58, 0 }
 0x2c4   : > { %2127 = vmatprep.subr.bf16.mxu0 %v2760_v0  ;;  %2133 = vmatprep.subr.bf16.mxu1 %v2760_v0 }
 0x2ca   : > { %2118 = vmatmul.mubr.msk.bf16.vlgmr.msra.gmra.mrb[4].mxu0 %vm1143_vm3, %v1135_v59  ;;  %2124 = vmatmul.mubr.msk.bf16.vlgmr.msra.gmra.mrb[4].mxu1 %vm1143_vm3, %v1136_v60 }
 0x2cb   : > { %2128 = vmatpush3.bf16.xpose.msra.mxu0 %v1240_v63  ;;  %2134 = vmatpush3.bf16.xpose.msra.mxu1 %v1286_v1 }
 0x2cc   : > { %2129 = vmatprep.mubr.msk.bf16.mxu0 %vm2761_vm0, %v2760_v0  ;;  %2135 = vmatprep.mubr.msk.bf16.mxu1 %vm2761_vm0, %v2760_v0 }
 0x2cd   : > { %2139 = vmatprep.subr.bf16.mxu0 %v2760_v0  ;;  %2145 = vmatprep.subr.bf16.mxu1 %v2760_v0 }
 0x2d2   : > { %2130 = vmatmul.mubr.msk.bf16.vlgmr.msra.gmra.mrb[8].mxu0 %vm1143_vm3, %v1137_v4  ;;  %2136 = vmatmul.mubr.msk.bf16.vlgmr.msra.gmra.mrb[8].mxu1 %vm1143_vm3, %v1138_v5 }
 0x2d3   : > { %2141 = vmatprep.mubr.msk.bf16.mxu0 %vm2761_vm0, %v2760_v0  ;;  %2147 = vmatprep.mubr.msk.bf16.mxu1 %vm2761_vm0, %v2760_v0 }
 0x39d   : > { %v1184_v7 = vpop.f32.mrb[4].mxu0  ;;  %v1230_v8 = vpop.f32.mrb[4].mxu1 }
 0x39e   : > { %v2119_v9 = vpop.f32.mrb[5].mxu0  ;;  %v2125_v10 = vpop.f32.mrb[5].mxu1  ;;  %v1331_v11 = vsel %vm1143_vm3, %v1230_v8, -inf  ;;  %v1328_v13 = vsel %vm1143_vm3, %v1184_v7, -inf }
 0x39f   : > { %1332 = vmax.xlane.f32.xlu1 %v1331_v11  ;;  %v1233_v14 = vpop.f32.mrb[6].mxu1  ;;  %1329 = vmax.xlane.f32.xlu0 %v1328_v13  ;;  %v1187_v15 = vpop.f32.mrb[6].mxu0 }
 0x3a0   : > { %v2120_v16 = vpop.f32.mrb[7].mxu0  ;;  %v2126_v17 = vpop.f32.mrb[7].mxu1 }
 0x3a5   : > { %v1276_v18 = vpop.f32.mrb[8].mxu0  ;;  %v1322_v19 = vpop.f32.mrb[8].mxu1 }
 0x3a6   : > { %v2131_v20 = vpop.f32.mrb[9].mxu0  ;;  %v2137_v21 = vpop.f32.mrb[9].mxu1  ;;  %v1334_v22 = vsel %vm1143_vm3, %v1276_v18, -inf  ;;  %v1337_v27 = vsel %vm1143_vm3, %v1322_v19, -inf }
 0x3a7   : > { %v1325_v23 = vpop.f32.mrb[10].mxu1  ;;  %1335 = vmax.xlane.f32.xlu0 %v1334_v22  ;;  %v1279_v24 = vpop.f32.mrb[10].mxu0 }
 0x3a8   : > { %v2132_v25 = vpop.f32.mrb[11].mxu0  ;;  %v2138_v26 = vpop.f32.mrb[11].mxu1 }
 0x3ab   : > { %1338 = vmax.xlane.f32.xlu0 %v1337_v27 }
 0x3b0   : > { %764 = vrot.lane.b32.xlu1 %v3217_v12, %s2767_s10 }
 0x3b4   : > { %768 = vrot.lane.b32.xlu1 %v3232_v35, %s2767_s10 }
 0x3b8   : > { %770 = vrot.lane.b32.xlu1 %v3222_v28, %s2767_s10 }
 0x3c1   : > { %766 = vrot.lane.b32.xlu0 %v3224_v29, %s2767_s10 }
 0x42c   : > { %v1333_v30 = vpop.xlane.xlu1 %1332  ;;  %v1330_v32 = vpop.xlane.xlu0 %1329 }
 0x42d   : > { %v1341_v33 = vsub.f32 %v1230_v8, %v1333_v30  ;;  %v1340_v34 = vsub.f32 %v1184_v7, %v1330_v32 }
 0x42f   : > { %v1346_v36 = vmul.f32 1.442695, %v1341_v33  ;;  %v1344_v37 = vmul.f32 1.442695, %v1340_v34 }
 0x430   : > { %v765_v39 = vpop.permute.xlu1 %764 }
 0x431   : > { %2338 = vpow2.f32 %v1346_v36 }
 0x432   : > { %2340 = vpow2.f32 %v1344_v37 }
 0x434   : > { %v1336_v40 = vpop.xlane.xlu0 %1335  ;;  %v769_v42 = vpop.permute.xlu1 %768 }
 0x435   : > { %v1342_v41 = vsub.f32 %v1276_v18, %v1336_v40  ;;  %v776_v28 = vcombine.low %v765_v39, %v769_v42  ;;  %v777_v29 = vcombine.high %v765_v39, %v769_v42 }
 0x437   : > { %v1348_v43 = vmul.f32 1.442695, %v1342_v41  ;;  %v784_v53 = vrot.slane %v776_v28, %v3226_v31  ;;  %v791_v54 = vrot.slane %v777_v29, %v3226_v31 }
 0x438   : > { %v1339_v12 = vpop.xlane.xlu0 %1338  ;;  %v771_v47 = vpop.permute.xlu1 %770 }
 0x439   : > { %2342 = vpow2.f32 %v1348_v43  ;;  %v1343_v35 = vsub.f32 %v1322_v19, %v1339_v12 }
 0x43b   : > { %v3304_v44 = vpop.eup %2338  ;;  %v1350_v45 = vmul.f32 1.442695, %v1343_v35 }
 0x43c   : > { %v3306_v46 = vpop.eup %2340  ;;  %v767_v48 = vpop.permute.xlu0 %766  ;;  %v1355_v49 = vsel %vm1143_vm3, %v3304_v44, 0.0 }
 0x43d   : > { %2344 = vpow2.f32 %v1350_v45  ;;  %v792_v50 = vcombine.low %v767_v48, %v771_v47  ;;  %v793_v51 = vcombine.high %v767_v48, %v771_v47  ;;  %1356 = vadd.xlane.f32.xlu1 %v1355_v49  ;;  %v1352_v52 = vsel %vm1143_vm3, %v3306_v46, 0.0 }
 0x43e   : > { %1353 = vadd.xlane.f32.xlu0 %v1352_v52 }
 0x43f   : > { %v800_v55 = vrot.slane %v792_v50, %v3226_v31  ;;  %v807_v56 = vrot.slane %v793_v51, %v3226_v31 }
 0x441   : > { %v808_v57 = vcombine.low %v784_v53, %v800_v55  ;;  %v809_v58 = vcombine.high %v784_v53, %v800_v55  ;;  %v824_v59 = vcombine.low %v791_v54, %v807_v56  ;;  %v825_v60 = vcombine.high %v791_v54, %v807_v56 }
 0x443   : > { %v3316_v61 = vpop.eup %2342  ;;  %v816_v62 = vrot.slane %v808_v57, %v3238_v38  ;;  %v823_v63 = vrot.slane %v809_v58, %v3238_v38  ;;  %v832_v1 = vrot.slane %v824_v59, %v3238_v38  ;;  %v839_v2 = vrot.slane %v825_v60, %v3238_v38 }
 0x444   : > { %v1358_v3 = vsel %vm1143_vm3, %v3316_v61, 0.0 }
 0x445   : > { %v844_v4 = vcombine.low %v816_v62, %v823_v63  ;;  %v2046_v5 = vcombine.high %v816_v62, %v823_v63  ;;  %v860_v7 = vcombine.low %v832_v1, %v839_v2  ;;  %v2047_v8 = vcombine.high %v832_v1, %v839_v2  ;;  %1359 = vadd.xlane.f32.xlu0 %v1358_v3 }
 0x447   : > { %v3324_v9 = vpop.eup %2344  ;;  %v851_v10 = vrot.slane %v844_v4, %v3226_v31  ;;  %v859_v11 = vrot.slane %v2046_v5, %v3226_v31  ;;  %v867_v13 = vrot.slane %v860_v7, %v3226_v31  ;;  %v875_v14 = vrot.slane %v2047_v8, %v3226_v31 }
 0x448   : > { %v1361_v15 = vsel %vm1143_vm3, %v3324_v9, 0.0 }
 0x449   : > { %v876_v16 = vcombine.low %v851_v10, %v859_v11  ;;  %v877_v17 = vcombine.high %v851_v10, %v859_v11  ;;  %v892_v18 = vcombine.low %v867_v13, %v875_v14  ;;  %v893_v19 = vcombine.high %v867_v13, %v875_v14  ;;  %1362 = vadd.xlane.f32.xlu0 %v1361_v15 }
 0x44b   : > { %v884_v20 = vrot.slane %v876_v16, %v3238_v38  ;;  %v891_v21 = vrot.slane %v877_v17, %v3238_v38  ;;  %v900_v22 = vrot.slane %v892_v18, %v3238_v38  ;;  %v907_v23 = vrot.slane %v893_v19, %v3238_v38 }
 0x44d   : > { %v908_v24 = vcombine.low %v884_v20, %v900_v22  ;;  %v909_v25 = vcombine.high %v884_v20, %v900_v22  ;;  %v910_v26 = vcombine.low %v891_v21, %v907_v23  ;;  %v911_v27 = vcombine.high %v891_v21, %v907_v23 }
 0x44f   : > { %v912_v30 = vpack.c.bf16 %v908_v24, %v908_v24  ;;  %v913_v32 = vpack.c.bf16 %v909_v25, %v909_v25  ;;  %v914_v33 = vpack.c.bf16 %v910_v26, %v910_v26  ;;  %v915_v34 = vpack.c.bf16 %v911_v27, %v911_v27  ;;  %v2336_v24 = vld [vmem:[#allocation15] sm:$0xff]  }
 0x451   : > { %916 = vst.msk [vmem:[#allocation3] sm:$0xf] %vm759_vm2, %v912_v30  ;;  %917 = vst.msk [vmem:[#allocation3 + $0x4] sm:$0xf] %vm759_vm2, %v913_v32 }
 0x452   : > { %918 = vst.msk [vmem:[#allocation3 + $0x8] sm:$0xf] %vm759_vm2, %v914_v33  ;;  %919 = vst.msk [vmem:[#allocation3 + $0xc] sm:$0xf] %vm759_vm2, %v915_v34 }
 0x458   : > { %v1376_v36 = vld [vmem:[#allocation3] sm:$0xf]  ;;  %v1377_v37 = vld [vmem:[#allocation3 + $0x4] sm:$0xf] }
 0x459   : > { %v1385_v39 = vsel %vm1383_vm4, %v1376_v36, 0  ;;  %v1431_v40 = vsel %vm1383_vm4, %v1377_v37, 0  ;;  %v1379_v47 = vld [vmem:[#allocation3 + $0xc] sm:$0xf]  ;;  %v1378_v49 = vld [vmem:[#allocation3 + $0x8] sm:$0xf] }
 0x45a   : > { %2140 = vmatpush3.bf16.msra.mxu0 %v1385_v39  ;;  %2146 = vmatpush3.bf16.msra.mxu1 %v1431_v40  ;;  %v1523_v51 = vsel %vm1383_vm4, %v1379_v47, 0  ;;  %v1477_v52 = vsel %vm1383_vm4, %v1378_v49, 0  ;;  %v2337_v37 = vld [vmem:[#allocation15 + $0x8] sm:$0xff]  }
 0x45b   : > { %2151 = vmatprep.subr.bf16.mxu0 %v2760_v0  ;;  %2157 = vmatprep.subr.bf16.mxu1 %v2760_v0 }
 0x4ca   : > { %v1357_v41 = vpop.xlane.xlu1 %1356 }
 0x4cb   : > { %2346 = vrcp.f32 %v1357_v41  ;;  %v1354_v42 = vpop.xlane.xlu0 %1353 }
 0x4cc   : > { %2348 = vrcp.f32 %v1354_v42 }
 0x4d2   : > { %v1360_v43 = vpop.xlane.xlu0 %1359 }
 0x4d3   : > { %2350 = vrcp.f32 %v1360_v43 }
 0x4d5   : > { %v2347_v12 = vpop.eup %2346 }
 0x4d6   : > { %v2349_v35 = vpop.eup %2348  ;;  %v1369_v28 = vmul.f32 %v2347_v12, %v3304_v44  ;;  %v1363_v29 = vpop.xlane.xlu0 %1362 }
 0x4d7   : > { %v1368_v45 = vmul.f32 %v2349_v35, %v3306_v46  ;;  %2352 = vrcp.f32 %v1363_v29 }
 0x4d8   : > { %v1373_v48 = vpack.c.bf16 %v1369_v28, %v1369_v28 }
 0x4d9   : > { %v1372_v50 = vpack.c.bf16 %v1368_v45, %v1368_v45 }
 0x4da   : > { %2148 = vmatmul.mubr.msk.bf16.vlgmr.msra.gmra.mrb[12].mxu1 %vm1143_vm3, %v1373_v48 }
 0x4db   : > { %2142 = vmatmul.mubr.msk.bf16.vlgmr.msra.gmra.mrb[12].mxu0 %vm1143_vm3, %v1372_v50  ;;  %2158 = vmatpush3.bf16.msra.mxu1 %v1523_v51 }
 0x4dc   : > { %2152 = vmatpush3.bf16.msra.mxu0 %v1477_v52  ;;  %2153 = vmatprep.mubr.msk.bf16.mxu0 %vm2761_vm0, %v2760_v0 }
 0x4dd   : > { %v2351_v44 = vpop.eup %2350  ;;  %2159 = vmatprep.mubr.msk.bf16.mxu1 %vm2761_vm0, %v2760_v0  ;;  %2163 = vmatprep.subr.bf16.mxu0 %v2760_v0 }
 0x4de   : > { %v1370_v46 = vmul.f32 %v2351_v44, %v3316_v61 }
 0x4e0   : > { %v1374_v53 = vpack.c.bf16 %v1370_v46, %v1370_v46 }
 0x4e1   : > { %v2353_v54 = vpop.eup %2352 }
 0x4e2   : > { %v1371_v55 = vmul.f32 %v2353_v54, %v3324_v9 }
 0x4e3   : > { %2154 = vmatmul.mubr.msk.bf16.vlgmr.msra.gmra.mrb[16].mxu0 %vm1143_vm3, %v1374_v53 }
 0x4e4   : > { %v1375_v56 = vpack.c.bf16 %v1371_v55, %v1371_v55  ;;  %2167 = vmatprep.mubr.msk.bf16.mxu0 %vm2761_vm0, %v2760_v0  ;;  %2164 = vmatpush3.bf16.msra.mxu0 %v2336_v24 }
 0x4e5   : > { %2165 = vmatprep.subr.bf16.mxu0 %v2760_v0 }
 0x4e6   : > { %2160 = vmatmul.mubr.msk.bf16.vlgmr.msra.gmra.mrb[16].mxu1 %vm1143_vm3, %v1375_v56  ;;  %v2067_v56 = vld [vmem:[#allocation16] ss:$0 sm:$0xff] }
 0x4e8   : > { %2166 = vmatpush3.bf16.msra.mxu0 %v2337_v37 }
 0x5ad   : > { %v1467_v57 = vpop.f32.mrb[12].mxu1 }
 0x5ae   : > { %v1421_v58 = vpop.f32.mrb[12].mxu0  ;;  %v2149_v59 = vpop.f32.mrb[13].mxu1 }
 0x5af   : > { %v2143_v60 = vpop.f32.mrb[13].mxu0  ;;  %v1470_v62 = vpop.f32.mrb[14].mxu1 }
 0x5b0   : > { %v1424_v63 = vpop.f32.mrb[14].mxu0  ;;  %v2150_v1 = vpop.f32.mrb[15].mxu1 }
 0x5b1   : > { %v2144_v61 = vpop.f32.mrb[15].mxu0 }
 0x5b6   : > { %v1513_v2 = vpop.f32.mrb[16].mxu0 }
 0x5b7   : > { %v1565_v3 = vcombine.low %v1421_v58, %v1513_v2  ;;  %v1566_v4 = vcombine.high %v1421_v58, %v1513_v2  ;;  %v2155_v5 = vpop.f32.mrb[17].mxu0 }
 0x5b8   : > { %v1516_v7 = vpop.f32.mrb[18].mxu0 }
 0x5b9   : > { %v2156_v8 = vpop.f32.mrb[19].mxu0  ;;  %v1559_v9 = vpop.f32.mrb[16].mxu1  ;;  %v1573_v15 = vrot.slane %v1565_v3, %v3226_v31  ;;  %v1580_v16 = vrot.slane %v1566_v4, %v3226_v31 }
 0x5ba   : > { %v1581_v10 = vcombine.low %v1467_v57, %v1559_v9  ;;  %v1582_v11 = vcombine.high %v1467_v57, %v1559_v9  ;;  %v2161_v13 = vpop.f32.mrb[17].mxu1  ;;  %v2068_v9 = vld [vmem:[#allocation18] ss:$0 sm:$0xff] }
 0x5bb   : > { %v1562_v14 = vpop.f32.mrb[18].mxu1 }
 0x5bc   : > { %v1589_v17 = vrot.slane %v1581_v10, %v3226_v31  ;;  %v1596_v18 = vrot.slane %v1582_v11, %v3226_v31  ;;  %v2162_v19 = vpop.f32.mrb[19].mxu1  ;;  %v2069_v11 = vld [vmem:[#allocation19] ss:$0 sm:$0xff] }
 0x5be   : > { %v1597_v20 = vcombine.low %v1573_v15, %v1589_v17  ;;  %v1598_v21 = vcombine.high %v1573_v15, %v1589_v17  ;;  %v1613_v22 = vcombine.low %v1580_v16, %v1596_v18  ;;  %v1614_v23 = vcombine.high %v1580_v16, %v1596_v18 }
 0x5c0   : > { %v1605_v25 = vrot.slane %v1597_v20, %v3238_v38  ;;  %v1612_v26 = vrot.slane %v1598_v21, %v3238_v38  ;;  %v1621_v27 = vrot.slane %v1613_v22, %v3238_v38  ;;  %v1628_v30 = vrot.slane %v1614_v23, %v3238_v38 }
 0x5c2   : > { %v1633_v32 = vcombine.low %v1605_v25, %v1612_v26  ;;  %v2062_v33 = vcombine.high %v1605_v25, %v1612_v26  ;;  %v1649_v34 = vcombine.low %v1621_v27, %v1628_v30  ;;  %v2063_v36 = vcombine.high %v1621_v27, %v1628_v30 }
 0x5c4   : > { %v1640_v39 = vrot.slane %v1633_v32, %v3226_v31  ;;  %v1648_v40 = vrot.slane %v2062_v33, %v3226_v31  ;;  %v1656_v41 = vrot.slane %v1649_v34, %v3226_v31  ;;  %v1664_v42 = vrot.slane %v2063_v36, %v3226_v31 }
 0x5c6   : > { %v1666_v43 = vcombine.high %v1640_v39, %v1648_v40  ;;  %v1682_v12 = vcombine.high %v1656_v41, %v1664_v42  ;;  %v1665_v35 = vcombine.low %v1640_v39, %v1648_v40  ;;  %v1681_v28 = vcombine.low %v1656_v41, %v1664_v42 }
 0x5c8   : > { %v1680_v29 = vrot.slane %v1666_v43, %v3238_v38  ;;  %v1696_v45 = vrot.slane %v1682_v12, %v3238_v38  ;;  %v1673_v0 = vrot.slane %v1665_v35, %v3238_v38  ;;  %v1689_v47 = vrot.slane %v1681_v28, %v3238_v38 }
 0x5ca   : > { %v1699_v48 = vcombine.low %v1680_v29, %v1696_v45  ;;  %v1698_v49 = vcombine.high %v1673_v0, %v1689_v47  ;;  %v1700_v50 = vcombine.high %v1680_v29, %v1696_v45  ;;  %v1697_v51 = vcombine.low %v1673_v0, %v1689_v47 }
 0x5cc   : > { %1706 = vrot.lane.b32.xlu0 %v1699_v48, %s2768_s23  ;;  %1702 = vrot.lane.b32.xlu1 %v1698_v49, %s2769_s6 }
 0x5d0   : > { %1710 = vrot.lane.b32.xlu1 %v1700_v50, %s2770_s3 }
 0x63e   : > { %v1703_v31 = vpop.permute.xlu1 %1702  ;;  %v1707_v52 = vpop.permute.xlu0 %1706 }
 0x63f   : > { %v1713_v44 = vsel %vm1143_vm3, %v1697_v51, %v1703_v31 }
 0x640   : > { %v1715_v53 = vsel %vm1714_vm5, %v1713_v44, %v1707_v52 }
 0x642   : > { %v1711_v46 = vpop.permute.xlu1 %1710 }
 0x643   : > { %v1717_v54 = vsel %vm1716_vm6, %v1715_v53, %v1711_v46 }
 0x644   : > { %v1718_v38 = vpack.c.bf16 %v1717_v54, %v1717_v54 }
 0x646   : > { %2168 = vmatmul.mubr.msk.bf16.vlgmr.msra.gmra.mrb[20].mxu0 %vm565_vm1, %v1718_v38 }
 0x719   : > { %v1772_v55 = vpop.f32.mrb[20].mxu0 }
 0x71a   : > { %v1778_v57 = vadd.f32 %v1772_v55, %v3204_v6  ;;  %v2169_v58 = vpop.f32.mrb[21].mxu0 }
 0x71b   : > { %v1775_v59 = vpop.f32.mrb[22].mxu0 }
 0x71c   : > { %v2170_v60 = vpop.f32.mrb[23].mxu0  ;;  %v1786_v62 = vadd.f32 %v2067_v56, %v1778_v57 }
 0x71e   : > { %v1787_v63 = vsel %vm565_vm1, %v1786_v62, 0.0 }
 0x71f   : > { %1788 = vadd.xlane.f32.xlu1 %v1787_v63 }
 0x7ac   : > { %v1789_v1 = vpop.xlane.xlu1 %1788 }
 0x7ad   : > { %v1791_v61 = vmul.f32 0.03125, %v1789_v1 }
 0x7af   : > { %v1792_v2 = vsub.f32 %v1786_v62, %v1791_v61 }
 0x7b1   : > { %v1793_v3 = vmul.f32 %v1792_v2, %v1792_v2 }
 0x7b3   : > { %v1794_v4 = vsel %vm565_vm1, %v1793_v3, 0.0 }
 0x7b4   : > { %1795 = vadd.xlane.f32.xlu0 %v1794_v4 }
 0x841   : > { %v1796_v5 = vpop.xlane.xlu0 %1795 }
 0x842   : > { %v1797_v7 = vmul.f32 0.03125, %v1796_v5 }
 0x844   : > { %v1798_v6 = vadd.f32 1e-05, %v1797_v7 }
 0x846   : > { %2354 = vrsqrt.f32 %v1798_v6 }
 0x850   : > { %v2355_v8 = vpop.eup %2354 }
 0x851   : > { %v1800_v10 = vmul.f32 %v2355_v8, %v1792_v2 }
 0x853   : > { %v1808_v13 = vmul.f32 %v2068_v9, %v1800_v10 }
 0x855   : > { %v1816_v14 = vadd.f32 %v2069_v11, %v1808_v13 }
 0x857   : > { %1817 = vst.msk [vmem:[%s534_s30] sm:$0xff] %vm565_vm1, %v1816_v14 }
 0x858   : > { %2653 = shalt.err (!%p2650_p8)
}
 0x859   : > { %s2654_s5 = scalar_lea.hbm %s3388_s28, 128  ;;  %s2658_s6 = scalar_lea.hbm %s3499_s21, 256 }
 0x85a   : > { %p2655_p3 = scmp.ne.s32.totalorder %s3388_s28, %s2654_s5  ;;  %p2659_p13 = scmp.lt.u32.totalorder %s3388_s28, %s3499_s21 }
 0x85b   : > { %p2660_p4 = scmp.lt.u32.totalorder %s2658_s6, %s2654_s5  ;;  %p2662_p0 = scmp.lt.u32.totalorder %s2654_s5, %s3388_s28 }
 0x85c   : > { %p2656_p12 = pnand %p2655_p3, %p3500_p7 }
 0x85d   : > { %p2661_p9 = por %p2660_p4, %p2659_p13 }
 0x85e   : > { %p2657_p6 = pneg %p2656_p12 }
 0x85f   : > { %p2663_p11 = por %p2662_p0, %p2661_p9 }
 0x861   : > { %p2664_p2 = pnand %p2663_p11, %p2657_p6 }
 0x863   : > { %2667 = shalt.err (!%p2664_p2)
}
 0x864   : > { %2207 = dma.vmem_to_hbm [thread:$0]  (%p3500_p7), %s3390_s4, 128, %s3388_s28, %s1819_s7  }
 0x865 PF: > { %s1845_s27 = sand.u32 1, %s2726_s13   ;;  %p3501_p10 = scmp.ne.s32.totalorder %s3482_s26, 0 }
 0x866   : > { %p3502_p1 = scmp.ge.s32.totalorder %s2746_s18, 2  ;;  %s1846_s30 = scalar_lea.sflag [#allocation6], %s1845_s27 }
 0x868   : > { %p2242_p5 = pnand %p3502_p1, %p3501_p10 }
 0x86a   : > { %2721 = dma.done.wait (!%p2242_p5), %s1846_s30, 128  }
 0x86b   : > { %2723 = vsyncadd (!%p2242_p5), %s1846_s30, 4294967168  ;;  %s33_s18 = sadd.s32 1, %s2746_s18   ;;  %s3503_s13 = smov %s2730_s14 }
 0x86c   : > { %p30_p8 = scmp.ge.s32.totalorder %s33_s18, 4   ;;  %s3504_s14 = smov %s2734_s15 }
 0x86d   : > { %s3505_s15 = smov %s3081_s12  ;;  %s3506_s16 = smov %s2742_s17 }
 0x86e   : > { %s3507_s17 = smov %s3509_s11  ;;  %32 = sbr.rel (!%p30_p8) target bundleno = 21 (0x15), region = 154 }
 0x875   :  { %1851 = vsyncpa [#allocation5], 1 }
 0x876   :  { %1853 = vsyncpa [#allocation5 + $0x1], 1 }
 0x877   :  { %1854 = vsyncpa [#allocation8], 1 }
 0x878   :  { %1856 = vsyncpa [#allocation8 + $0x1], 1 }
 0x879   :  { %1857 = vsyncpa [#allocation11], 1 }
 0x87a   :  { %1858 = vsyncpa [#allocation14], 1 }
 0x87b   :  { %1859 = vsyncpa [#allocation17], 1 }
 0x87c   :  { %1860 = vsyncpa [#allocation20], 1 }
 0x87d   :  { %1861 = vsyncpa [#allocation6], 1 }
 0x87e   :  { %1863 = vsyncpa [#allocation6 + $0x1], 1 }

// kernel: tpu_custom_call.1
= control target key start
LH: loop header
LB: loop body
LE: loop exit
PB: predicated region body
PF: predicated region fallthrough
CT: control target
= control target key end

     0   :  { %s3438_s0 = inlined_call_operand.hbm [shape: f32[2,8,32], index: 0, kind: input, shape index: {}]   ;;  %s3439_s1 = inlined_call_operand.hbm [shape: f32[2,8,32], index: 1, kind: input, shape index: {}]   ;;  %s3440_s2 = inlined_call_operand.hbm [shape: bf16[32,32], index: 2, kind: input, shape index: {}]   ;;  %s3441_s3 = inlined_call_operand.hbm [shape: f32[1,32], index: 3, kind: input, shape index: {}]   ;;  %s3442_s4 = inlined_call_operand.hbm [shape: bf16[32,64], index: 4, kind: input, shape index: {}]   ;;  %s3443_s5 = inlined_call_operand.hbm [shape: f32[1,64], index: 5, kind: input, shape index: {}]   ;;  %s3444_s6 = inlined_call_operand.hbm [shape: bf16[32,32], index: 6, kind: input, shape index: {}]   ;;  %s3445_s7 = inlined_call_operand.hbm [shape: f32[1,32], index: 7, kind: input, shape index: {}]   ;;  %s3446_s8 = inlined_call_operand.hbm [shape: f32[1,32], index: 8, kind: input, shape index: {}]   ;;  %s3447_s9 = inlined_call_operand.hbm [shape: f32[1,32], index: 9, kind: input, shape index: {}]   ;;  %s3448_s10 = inlined_call_operand.hbm [shape: f32[2,8,32], index: 10, kind: output, shape index: {}]  }
   0x1   :  { %3458 = sst [smem:[#allocation32_spill]] %s3439_s1 }
   0x2   :  { %3459 = sst [smem:[#allocation33_spill]] %s3440_s2 }
   0x3   :  { %3460 = sst [smem:[#allocation34_spill]] %s3441_s3 }
   0x4   :  { %3461 = sst [smem:[#allocation35_spill]] %s3442_s4 }
   0x5   :  { %3462 = sst [smem:[#allocation36_spill]] %s3443_s5 }
   0x6   :  { %3463 = sst [smem:[#allocation37_spill]] %s3444_s6 }
   0x7   :  { %3464 = sst [smem:[#allocation38_spill]] %s3445_s7 }
   0x8   :  { %3465 = sst [smem:[#allocation39_spill]] %s3448_s10 }
   0x9   :  { %15 = vsyncpa [#allocation5], 0 }
   0xa   :  { %17 = vsyncpa [#allocation5 + $0x1], 0 }
   0xb   :  { %18 = vsyncpa [#allocation8], 0 }
   0xc   :  { %20 = vsyncpa [#allocation8 + $0x1], 0 }
   0xd   :  { %21 = vsyncpa [#allocation11], 0 }
   0xe   :  { %22 = vsyncpa [#allocation14], 0 }
   0xf   :  { %23 = vsyncpa [#allocation17], 0 }
  0x10   :  { %24 = vsyncpa [#allocation20], 0 }
  0x11   :  { %25 = vsyncpa [#allocation6], 0 }
  0x12   :  { %27 = vsyncpa [#allocation6 + $0x1], 0  ;;  %s2827_s13 = smov 0   ;;  %s2829_s14 = smov 0  }
  0x13   :  { %s2831_s15 = smov 0   ;;  %s2833_s16 = smov 0  }
  0x14   :  { %s2835_s17 = smov 0   ;;  %s2837_s18 = smov 0  }
  0x15 LB: > { %3466 = sst [smem:[#allocation30_spill]] %s2738_s16  ;;  %s2858_s19 = sadd.s32 4294967295, %s2746_s18   ;;  %s2746_s18 = sphi %s2837_s18, %s33_s18   ;;  %s2742_s17 = sphi %s2835_s17, %s3507_s17   ;;  %s2738_s16 = sphi %s2833_s16, %s3506_s16   ;;  %s2734_s15 = sphi %s2831_s15, %s3505_s15   ;;  %s2730_s14 = sphi %s2829_s14, %s3504_s14   ;;  %s2726_s13 = sphi %s2827_s13, %s3503_s13  }
  0x16   : > { %p2014_p0 = scmp.ge.s32.totalorder %s2746_s18, 1  ;;  %p3452_p1 = scmp.eq.s32.totalorder %s2858_s19, 0 }
  0x17   : > { %p300_p2 = scmp.lt.s32.totalorder %s2746_s18, 3  ;;  %s2748_s21 = smov [#allocation9]  }
  0x18   : > { %s312_s22 = sshll.u32 %s2748_s21, 4  ;;  %s2749_s24 = smov [#allocation10]   ;;  %s2867_s22 = int_to_ptr.vmem [resolvable:$true] %s312_s22 }
  0x19   : > { %p2863_p3 = pnand %p2014_p0, %p300_p2  ;;  %s326_s25 = sshll.u32 %s2749_s24, 4  ;;  %s2878_s25 = int_to_ptr.vmem [resolvable:$true] %s326_s25 }
  0x1a   : > { %s2750_s26 = smov [#allocation13]   ;;  %s3470_s2 = sld [smem:[#allocation33_spill]] }
  0x1b   : > { %s3467_s20 = scalar_select %p2863_p3, 1, 0 }
  0x1c   : > { %p2209_p4 = pneg %p2863_p3  ;;  %s2880_s27 = sshll.u32 %s2750_s26, 4  ;;  %s351_s27 = int_to_ptr.vmem [resolvable:$true] %s2880_s27 }
  0x1d   : > { %3468 = sst [smem:[#allocation31_spill]] %s3467_s20 }
  0x1e   : > { %p2874_p6 = pnand %p2209_p4, %p3452_p1 }
  0x20   : > { %s2356_s30 = scalar_lea.hbm %s3470_s2, 256  ;;  %p2890_p8 = pneg %p2874_p6 }
  0x21   : > { %p2357_p7 = scmp.ne.s32.totalorder %s3470_s2, %s2356_s30  ;;  %p2363_p11 = scmp.lt.u32.totalorder %s2356_s30, %s3470_s2 }
  0x23   : > { %p2359_p9 = pnand %p2890_p8, %p2357_p7 }
  0x25   : > { %p2360_p10 = pneg %p2359_p9 }
  0x27   : > { %p2365_p12 = pnand %p2363_p11, %p2360_p10 }
  0x29   : > { %2368 = shalt.err (!%p2365_p12)
}
  0x2a   : > { %s2369_s28 = scalar_lea.vmem %s2867_s22, 256  ;;  %p2377_p4 = scmp.lt.s32.totalorder %s2867_s22, %s2867_s22 }
  0x2b   : > { %p2370_p13 = scmp.ne.s32.totalorder %s2867_s22, %s2369_s28  ;;  %p2378_p5 = scmp.lt.s32.totalorder %s2369_s28, %s2369_s28 }
  0x2d   : > { %p2372_p0 = pnand %p2370_p13, %p2890_p8  ;;  %p2379_p7 = por %p2378_p5, %p2377_p4 }
  0x2f   : > { %p2373_p2 = pneg %p2372_p0 }
  0x31   : > { %p2380_p9 = pnand %p2379_p7, %p2373_p2 }
  0x33   : > { %2383 = shalt.err (!%p2380_p9)
}
  0x34   : > { %s3454_s29 = smov 64   ;;  %s2752_s30 = smov 4  }
  0x35   : > { %2212 = dma.hbm_to_vmem [thread:$0]  (!%p2874_p6), %s3470_s2, 256, %s2867_s22, [#allocation8], %s3454_s29, %s3454_s29, %s2752_s30  }
  0x36   : > { %s3472_s3 = sld [smem:[#allocation34_spill]] }
  0x3c   : > { %s2384_s28 = scalar_lea.hbm %s3472_s3, 16 }
  0x3d   : > { %p2385_p5 = scmp.ne.s32.totalorder %s3472_s3, %s2384_s28  ;;  %p2391_p12 = scmp.lt.u32.totalorder %s2384_s28, %s3472_s3 }
  0x3f   : > { %p2387_p10 = pnand %p2385_p5, %p2890_p8 }
  0x41   : > { %p2388_p11 = pneg %p2387_p10 }
  0x43   : > { %p2393_p13 = pnand %p2391_p12, %p2388_p11 }
  0x45   : > { %2396 = shalt.err (!%p2393_p13)
}
  0x46   : > { %s2397_s22 = scalar_lea.vmem %s2878_s25, 16  ;;  %s2404_s10 = scalar_lea.vmem %s2878_s25, 32 }
  0x47   : > { %p2398_p0 = scmp.ne.s32.totalorder %s2878_s25, %s2397_s22  ;;  %p2405_p7 = scmp.lt.s32.totalorder %s2878_s25, %s2878_s25 }
  0x48   : > { %p2406_p9 = scmp.lt.s32.totalorder %s2404_s10, %s2397_s22 }
  0x49   : > { %p2400_p2 = pnand %p2398_p0, %p2890_p8 }
  0x4a   : > { %p2407_p5 = por %p2406_p9, %p2405_p7 }
  0x4b   : > { %p2401_p4 = pneg %p2400_p2 }
  0x4d   : > { %p2408_p10 = pnand %p2407_p5, %p2401_p4 }
  0x4f   : > { %2411 = shalt.err (!%p2408_p10)
}
  0x50   : > { %2215 = dma.hbm_to_vmem [thread:$0]  (!%p2874_p6), %s3472_s3, 16, %s2878_s25, [#allocation11]  }
  0x51   : > { %s3473_s5 = sld [smem:[#allocation36_spill]] }
  0x57   : > { %s2412_s12 = scalar_lea.hbm %s3473_s5, 16 }
  0x58   : > { %p2413_p11 = scmp.ne.s32.totalorder %s3473_s5, %s2412_s12  ;;  %p2419_p0 = scmp.lt.u32.totalorder %s2412_s12, %s3473_s5 }
  0x5a   : > { %p2415_p12 = pnand %p2413_p11, %p2890_p8 }
  0x5c   : > { %p2416_p13 = pneg %p2415_p12 }
  0x5e   : > { %p2421_p2 = pnand %p2419_p0, %p2416_p13 }
  0x60   : > { %2424 = shalt.err (!%p2421_p2)
}
  0x61   : > { %s2425_s10 = scalar_lea.vmem %s351_s27, 16  ;;  %s2432_s25 = scalar_lea.vmem %s351_s27, 32 }
  0x62   : > { %p2426_p4 = scmp.ne.s32.totalorder %s351_s27, %s2425_s10  ;;  %p2433_p5 = scmp.lt.s32.totalorder %s351_s27, %s351_s27 }
  0x63   : > { %p2434_p10 = scmp.lt.s32.totalorder %s2432_s25, %s2425_s10 }
  0x64   : > { %p2428_p7 = pnand %p2426_p4, %p2890_p8 }
  0x65   : > { %p2435_p1 = por %p2434_p10, %p2433_p5 }
  0x66   : > { %p2429_p9 = pneg %p2428_p7 }
  0x68   : > { %p2436_p3 = pnand %p2435_p1, %p2429_p9 }
  0x6a   : > { %2439 = shalt.err (!%p2436_p3)
}
  0x6b   : > { %2221 = dma.hbm_to_vmem [thread:$0]  (!%p2874_p6), %s3473_s5, 16, %s351_s27, [#allocation14]  }
  0x6c   : > { %s2753_s20 = smov [#allocation16]   ;;  %s2754_s12 = smov [#allocation12]  }
  0x6d   : > { %s374_s11 = sshll.u32 %s2753_s20, 4  ;;  %s336_s24 = sshll.u32 %s2754_s12, 4  ;;  %s375_s11 = int_to_ptr.vmem [resolvable:$true] %s374_s11  ;;  %s337_s24 = int_to_ptr.vmem [resolvable:$true] %s336_s24 }
  0x6e   : > { %s3474_s7 = sld [smem:[#allocation38_spill]] }
  0x74   : > { %s2440_s22 = scalar_lea.hbm %s3474_s7, 16 }
  0x75   : > { %p2441_p1 = scmp.ne.s32.totalorder %s3474_s7, %s2440_s22  ;;  %p2447_p12 = scmp.lt.u32.totalorder %s2440_s22, %s3474_s7 }
  0x77   : > { %p2443_p3 = pnand %p2441_p1, %p2890_p8 }
  0x79   : > { %p2444_p11 = pneg %p2443_p3 }
  0x7b   : > { %p2449_p13 = pnand %p2447_p12, %p2444_p11 }
  0x7d   : > { %2452 = shalt.err (!%p2449_p13)
}
  0x7e   : > { %s2453_s27 = scalar_lea.vmem %s375_s11, 16  ;;  %s2460_s16 = scalar_lea.vmem %s375_s11, 32 }
  0x7f   : > { %p2454_p0 = scmp.ne.s32.totalorder %s375_s11, %s2453_s27  ;;  %p2461_p7 = scmp.lt.s32.totalorder %s375_s11, %s375_s11 }
  0x80   : > { %p2462_p9 = scmp.lt.s32.totalorder %s2460_s16, %s2453_s27 }
  0x81   : > { %p2456_p2 = pnand %p2454_p0, %p2890_p8 }
  0x82   : > { %p2463_p5 = por %p2462_p9, %p2461_p7 }
  0x83   : > { %p2457_p4 = pneg %p2456_p2 }
  0x85   : > { %p2464_p10 = pnand %p2463_p5, %p2457_p4 }
  0x87   : > { %2467 = shalt.err (!%p2464_p10)
}
  0x88   : > { %2227 = dma.hbm_to_vmem [thread:$0]  (!%p2874_p6), %s3474_s7, 16, %s375_s11, [#allocation17]  }
  0x89   : > { %s3475_s4 = sld [smem:[#allocation35_spill]] }
  0x8f   : > { %s2468_s28 = scalar_lea.hbm %s3475_s4, 256 }
  0x90   : > { %p2469_p1 = scmp.ne.s32.totalorder %s3475_s4, %s2468_s28  ;;  %p2475_p12 = scmp.lt.u32.totalorder %s2468_s28, %s3475_s4 }
  0x92   : > { %p2471_p3 = pnand %p2469_p1, %p2890_p8 }
  0x94   : > { %p2472_p11 = pneg %p2471_p3 }
  0x96   : > { %p2477_p13 = pnand %p2475_p12, %p2472_p11 }
  0x98   : > { %2480 = shalt.err (!%p2477_p13)
}
  0x99   : > { %s2481_s27 = scalar_lea.vmem %s337_s24, 256  ;;  %p2489_p7 = scmp.lt.s32.totalorder %s337_s24, %s337_s24 }
  0x9a   : > { %p2482_p0 = scmp.ne.s32.totalorder %s337_s24, %s2481_s27  ;;  %p2490_p9 = scmp.lt.s32.totalorder %s2481_s27, %s2481_s27 }
  0x9c   : > { %p2484_p2 = pnand %p2482_p0, %p2890_p8  ;;  %p2491_p5 = por %p2490_p9, %p2489_p7 }
  0x9e   : > { %p2485_p4 = pneg %p2484_p2 }
  0xa0   : > { %p2492_p10 = pnand %p2491_p5, %p2485_p4 }
  0xa2   : > { %2495 = shalt.err (!%p2492_p10)
}
  0xa3   : > { %s3476_s11 = smov 64   ;;  %s2755_s12 = smov [#allocation15]  }
  0xa4   : > { %2218 = dma.hbm_to_vmem [thread:$0]  (!%p2874_p6), %s3475_s4, 256, %s337_s24, [#allocation11], %s3476_s11, %s3476_s11, %s2752_s30  }
  0xa5   : > { %s360_s29 = sshll.u32 %s2755_s12, 4  ;;  %s2756_s26 = smov [#allocation18]   ;;  %s361_s29 = int_to_ptr.vmem [resolvable:$true] %s360_s29 }
  0xa6   : > { %s385_s28 = sshll.u32 %s2756_s26, 4  ;;  %s3477_s6 = sld [smem:[#allocation37_spill]]  ;;  %s386_s28 = int_to_ptr.vmem [resolvable:$true] %s385_s28 }
  0xac   : > { %s2496_s25 = scalar_lea.hbm %s3477_s6, 256 }
  0xad   : > { %p2497_p1 = scmp.ne.s32.totalorder %s3477_s6, %s2496_s25  ;;  %p2503_p12 = scmp.lt.u32.totalorder %s2496_s25, %s3477_s6 }
  0xaf   : > { %p2499_p3 = pnand %p2497_p1, %p2890_p8 }
  0xb1   : > { %p2500_p11 = pneg %p2499_p3 }
  0xb3   : > { %p2505_p13 = pnand %p2503_p12, %p2500_p11 }
  0xb5   : > { %2508 = shalt.err (!%p2505_p13)
}
  0xb6   : > { %s2509_s24 = scalar_lea.vmem %s361_s29, 256  ;;  %p2517_p7 = scmp.lt.s32.totalorder %s361_s29, %s361_s29 }
  0xb7   : > { %p2510_p0 = scmp.ne.s32.totalorder %s361_s29, %s2509_s24  ;;  %p2518_p9 = scmp.lt.s32.totalorder %s2509_s24, %s2509_s24 }
  0xb9   : > { %p2512_p2 = pnand %p2510_p0, %p2890_p8  ;;  %p2519_p5 = por %p2518_p9, %p2517_p7 }
  0xbb   : > { %p2513_p4 = pneg %p2512_p2 }
  0xbd   : > { %p2520_p10 = pnand %p2519_p5, %p2513_p4 }
  0xbf   : > { %2523 = shalt.err (!%p2520_p10)
}
  0xc0   : > { %2224 = dma.hbm_to_vmem [thread:$0]  (!%p2874_p6), %s3477_s6, 256, %s361_s29, [#allocation14], %s3476_s11, %s3476_s11, %s2752_s30  }
  0xc1   : > { %s2524_s22 = scalar_lea.hbm %s3446_s8, 16 }
  0xc2   : > { %p2525_p1 = scmp.ne.s32.totalorder %s3446_s8, %s2524_s22  ;;  %p2531_p12 = scmp.lt.u32.totalorder %s2524_s22, %s3446_s8 }
  0xc4   : > { %p2527_p3 = pnand %p2525_p1, %p2890_p8 }
  0xc6   : > { %p2528_p11 = pneg %p2527_p3 }
  0xc8   : > { %p2533_p13 = pnand %p2531_p12, %p2528_p11 }
  0xca   : > { %2536 = shalt.err (!%p2533_p13)
}
  0xcb   : > { %s2537_s16 = scalar_lea.vmem %s386_s28, 16  ;;  %s2544_s30 = scalar_lea.vmem %s386_s28, 32 }
  0xcc   : > { %p2538_p0 = scmp.ne.s32.totalorder %s386_s28, %s2537_s16  ;;  %p2545_p7 = scmp.lt.s32.totalorder %s386_s28, %s386_s28 }
  0xcd   : > { %p2546_p9 = scmp.lt.s32.totalorder %s2544_s30, %s2537_s16 }
  0xce   : > { %p2540_p2 = pnand %p2538_p0, %p2890_p8 }
  0xcf   : > { %p2547_p5 = por %p2546_p9, %p2545_p7 }
  0xd0   : > { %p2541_p4 = pneg %p2540_p2 }
  0xd2   : > { %p2548_p10 = pnand %p2547_p5, %p2541_p4 }
  0xd4   : > { %2551 = shalt.err (!%p2548_p10)
}
  0xd5   : > { %2230 = dma.hbm_to_vmem [thread:$0]  (!%p2874_p6), %s3446_s8, 16, %s386_s28, [#allocation17]  }
  0xd6   : > { %s2757_s24 = smov [#allocation19]   ;;  %s2552_s26 = scalar_lea.hbm %s3447_s9, 16 }
  0xd7   : > { %s396_s2 = sshll.u32 %s2757_s24, 4  ;;  %p2553_p1 = scmp.ne.s32.totalorder %s3447_s9, %s2552_s26  ;;  %s397_s2 = int_to_ptr.vmem [resolvable:$true] %s396_s2 }
  0xd8   : > { %p2559_p12 = scmp.lt.u32.totalorder %s2552_s26, %s3447_s9 }
  0xd9   : > { %p2555_p3 = pnand %p2553_p1, %p2890_p8 }
  0xdb   : > { %p2556_p11 = pneg %p2555_p3 }
  0xdd   : > { %p2561_p13 = pnand %p2559_p12, %p2556_p11 }
  0xdf   : > { %2564 = shalt.err (!%p2561_p13)
}
  0xe0   : > { %s2565_s28 = scalar_lea.vmem %s397_s2, 16  ;;  %s2572_s27 = scalar_lea.vmem %s397_s2, 32 }
  0xe1   : > { %p2566_p0 = scmp.ne.s32.totalorder %s397_s2, %s2565_s28  ;;  %p2573_p7 = scmp.lt.s32.totalorder %s397_s2, %s397_s2 }
  0xe2   : > { %p2574_p9 = scmp.lt.s32.totalorder %s2572_s27, %s2565_s28 }
  0xe3   : > { %p2568_p2 = pnand %p2566_p0, %p2890_p8 }
  0xe4   : > { %p2575_p5 = por %p2574_p9, %p2573_p7 }
  0xe5   : > { %p2569_p4 = pneg %p2568_p2 }
  0xe7   : > { %p2576_p10 = pnand %p2575_p5, %p2569_p4 }
  0xe9   : > { %2579 = shalt.err (!%p2576_p10)
}
  0xea   : > { %2233 = dma.hbm_to_vmem [thread:$0]  (!%p2874_p6), %s3447_s9, 16, %s397_s2, [#allocation20]  }
  0xeb   : > { %s2013_s21 = sadd.s32 4294967294, %s2746_s18   ;;  %s45_s11 = sadd.s32 1, %s2742_s17 }
  0xec   : > { %p47_p8 = scmp.ge.s32.totalorder %s45_s11, 2  ;;  %s52_s23 = sadd.s32 1, %s2734_s15 }
  0xed   : > { %p59_p1 = scmp.ne.s32.totalorder %s2734_s15, %s2730_s14  ;;  %p60_p3 = scmp.eq.s32.totalorder %s2746_s18, 0 }
  0xee   : > { %s3509_s11 = smov (%p47_p8, %s45_s11), 0  ;;  %p65_p12 = scmp.ne.s32.totalorder %s2730_s14, %s2726_s13 }
  0xef   : > { %p3061_p11 = por %p60_p3, %p59_p1  ;;  %s49_s24 = ssub.s32 %s2742_s17, %s3509_s11 }
  0xf0   : > { %p287_p6 = scmp.eq.s32.totalorder %s2858_s19, 1  ;;  %p50_p13 = scmp.eq.s32.totalorder %s49_s24, 0 }
  0xf1   : > { %p3479_p0 = scmp.eq.s32.totalorder %s2858_s19, 0  ;;  %p293_p7 = scmp.eq.s32.totalorder %s2013_s21, 1 }
  0xf2   : > { %p3076_p4 = por %p287_p6, %p59_p1  ;;  %p2253_p5 = scmp.lt.s32.totalorder %s2746_s18, 2 }
  0xf3   : > { %p3072_p2 = por %p3479_p0, %p65_p12  ;;  %p3083_p9 = por %p293_p7, %p65_p12 }
  0xf4   : > { %s3481_s20 = scalar_select %p3076_p4, 1, 0 }
  0xf5   : > { %s3480_s2 = scalar_select %p3072_p2, 1, 0 }
  0xf6   : > { %s3081_s12 = scalar_select %p50_p13, %s2734_s15, %s52_s23  }
  0xf7   : > { %s3482_s26 = scalar_select %p3083_p9, 1, 0 }
  0xf8   : > { %s407_s22 = sand.u32 1, %s2734_s15   ;;  %s2025_s10 = sshll.u32 %s2742_s17, 7 }
  0xf9   : > { %s3090_s25 = sshll.u32 %s407_s22, 3  ;;  %s3095_s27 = scalar_lea.hbm %s3438_s0, %s2025_s10 }
  0xfa   : > { %s411_s16 = scalar_lea.vmem [#allocation4], %s3090_s25  ;;  %p3100_p10 = pnand %p2253_p5, %p3061_p11 }
  0xfb   : > { %s418_s30 = sshll.u32 %s411_s16, 4  ;;  %s3484_s1 = sld [smem:[#allocation32_spill]]  ;;  %s3104_s30 = int_to_ptr.vmem [resolvable:$true] %s418_s30 }
  0xfc   : > { %s408_s3 = scalar_lea.sflag [#allocation5], %s407_s22  ;;  %s2580_s4 = scalar_lea.hbm %s3095_s27, 128 }
  0xfd   : > { %p2581_p8 = scmp.ne.s32.totalorder %s3095_s27, %s2580_s4  ;;  %p2582_p1 = pneg %p3100_p10 }
  0xfe   : > { %s2585_s5 = scalar_lea.hbm %s3438_s0, 256  ;;  %p2586_p12 = scmp.lt.u32.totalorder %s3095_s27, %s3438_s0 }
  0xff   : > { %p2583_p3 = pnand %p2582_p1, %p2581_p8  ;;  %p2587_p6 = scmp.lt.u32.totalorder %s2585_s5, %s2580_s4 }
 0x100   : > { %p2589_p0 = scmp.lt.u32.totalorder %s2580_s4, %s3095_s27 }
 0x101   : > { %s3109_s28 = scalar_lea.hbm %s3484_s1, %s2025_s10  ;;  %p2584_p11 = pneg %p2583_p3 }
 0x102   : > { %p2588_p13 = por %p2587_p6, %p2586_p12 }
 0x104   : > { %p2590_p7 = por %p2589_p0, %p2588_p13 }
 0x106   : > { %p2591_p5 = pnand %p2590_p7, %p2584_p11 }
 0x108   : > { %2594 = shalt.err (!%p2591_p5)
}
 0x109   : > { %s2595_s22 = scalar_lea.vmem %s3104_s30, 128  ;;  %s2758_s10 = smov [#allocation4]  }
 0x10a   : > { %p2596_p8 = scmp.ne.s32.totalorder %s3104_s30, %s2595_s22  ;;  %s2600_s23 = sshll.u32 %s2758_s10, 4  ;;  %s2601_s23 = int_to_ptr.vmem [resolvable:$false] %s2600_s23 }
 0x10b   : > { %s2602_s6 = scalar_lea.vmem %s2601_s23, 256  ;;  %p2603_p4 = scmp.lt.s32.totalorder %s3104_s30, %s2601_s23 }
 0x10c   : > { %p2598_p3 = pnand %p2596_p8, %p2582_p1  ;;  %p2604_p12 = scmp.lt.s32.totalorder %s2602_s6, %s2595_s22 }
 0x10e   : > { %p2599_p9 = pneg %p2598_p3  ;;  %p2605_p6 = por %p2604_p12, %p2603_p4 }
 0x110   : > { %p2606_p13 = pnand %p2605_p6, %p2599_p9 }
 0x112   : > { %2609 = shalt.err (!%p2606_p13)
}
 0x113   : > { %2237 = dma.hbm_to_vmem [thread:$0]  (!%p3100_p10), %s3095_s27, 128, %s3104_s30, %s408_s3  }
 0x114   : > { %s425_s4 = sand.u32 1, %s2746_s18   ;;  %s429_s5 = scalar_lea.vmem [#allocation7], %s3090_s25 }
 0x115   : > { %s437_s7 = sshll.u32 %s429_s5, 4  ;;  %s426_s24 = scalar_lea.sflag [#allocation8], %s425_s4  ;;  %s438_s7 = int_to_ptr.vmem [resolvable:$true] %s437_s7 }
 0x116   : > { %s2610_s29 = scalar_lea.hbm %s3109_s28, 128  ;;  %s2615_s10 = scalar_lea.hbm %s3484_s1, 256 }
 0x117   : > { %p2611_p4 = scmp.ne.s32.totalorder %s3109_s28, %s2610_s29  ;;  %p2616_p0 = scmp.lt.u32.totalorder %s3109_s28, %s3484_s1 }
 0x118   : > { %p2617_p7 = scmp.lt.u32.totalorder %s2615_s10, %s2610_s29  ;;  %p2619_p8 = scmp.lt.u32.totalorder %s2610_s29, %s3109_s28 }
 0x119   : > { %p2613_p9 = pnand %p2611_p4, %p2582_p1 }
 0x11a   : > { %p2618_p5 = por %p2617_p7, %p2616_p0 }
 0x11b   : > { %p2614_p11 = pneg %p2613_p9 }
 0x11c   : > { %p2620_p3 = por %p2619_p8, %p2618_p5 }
 0x11e   : > { %p2621_p12 = pnand %p2620_p3, %p2614_p11 }
 0x120   : > { %2624 = shalt.err (!%p2621_p12)
}
 0x121   : > { %s2625_s3 = scalar_lea.vmem %s438_s7, 128  ;;  %s2759_s25 = smov [#allocation7]  }
 0x122   : > { %p2626_p6 = scmp.ne.s32.totalorder %s438_s7, %s2625_s3  ;;  %s2630_s27 = sshll.u32 %s2759_s25, 4  ;;  %s2631_s27 = int_to_ptr.vmem [resolvable:$false] %s2630_s27 }
 0x123   : > { %s2632_s30 = scalar_lea.vmem %s2631_s27, 256  ;;  %p2633_p9 = scmp.lt.s32.totalorder %s438_s7, %s2631_s27 }
 0x124   : > { %p2628_p13 = pnand %p2626_p6, %p2582_p1  ;;  %p2634_p2 = scmp.lt.s32.totalorder %s2632_s30, %s2625_s3 }
 0x126   : > { %p2629_p4 = pneg %p2628_p13  ;;  %p2635_p0 = por %p2634_p2, %p2633_p9 }
 0x128   : > { %p2636_p7 = pnand %p2635_p0, %p2629_p4 }
 0x12a   : > { %2639 = shalt.err (!%p2636_p7)
}
 0x12b   : > { %2240 = dma.hbm_to_vmem [thread:$0]  (!%p3100_p10), %s3109_s28, 128, %s438_s7, %s426_s24  }
 0x12c   : > { %s3485_s4 = sld [smem:[#allocation31_spill]] }
 0x132   : > { %p3486_p11 = scmp.ne.s32.totalorder %s3485_s4, 0 }
 0x133   : > { %s3160_s5 = sand.u32 (!%p3486_p11), 1, %s2730_s14   ;;  %p3487_p2 = scmp.ne.s32.totalorder (!%p3486_p11), %s3480_s2, 0 }
 0x134   : > { %446 = sbr.rel (%p3486_p11) target bundleno = 2149 (0x865), region = 60  ;;  %s3163_s29 = sshll.u32 (!%p3486_p11), %s3160_s5, 3 }
 0x135   : > { %s449_s16 = scalar_lea.sflag (!%p3486_p11), [#allocation5], %s3160_s5  ;;  %s452_s22 = scalar_lea.vmem (!%p3486_p11), [#allocation4], %s3163_s29 }
 0x13b   : > { %2693 = dma.done.wait (%p3487_p2), %s449_s16, 128  }
 0x13c   : > { %2695 = vsyncadd (%p3487_p2), %s449_s16, 4294967168  ;;  %s457_s21 = sand.u32 1, %s2858_s19   ;;  %s461_s7 = scalar_lea.vmem [#allocation7], %s3163_s29 }
 0x13d   : > { %s458_s28 = scalar_lea.sflag [#allocation8], %s457_s21 }
 0x13e   : > { %2697 = dma.done.wait (%p3487_p2), %s458_s28, 128  }
 0x13f   : > { %2699 = vsyncadd (%p3487_p2), %s458_s28, 4294967168  ;;  %p3488_p10 = scmp.eq.s32.totalorder %s2858_s19, 0 }
 0x141   : > { %2701 = dma.done.wait (%p3488_p10), [#allocation8], 256   ;;  %p3489_p1 = pmov %p3488_p10 }
 0x143   : > { %2703 = vsyncadd (%p3489_p1), [#allocation8], 4294967040  ;;  %p3490_p5 = pmov %p3489_p1 }
 0x144   : > { %p3491_p8 = pmov %p3489_p1 }
 0x145   : > { %2705 = dma.done.wait (%p3490_p5), [#allocation11], 272  }
 0x146   : > { %2707 = vsyncadd (%p3491_p8), [#allocation11], 4294967024  ;;  %p3492_p3 = pmov %p3489_p1 }
 0x147   : > { %p3493_p12 = pmov %p3489_p1 }
 0x148   : > { %2709 = dma.done.wait (%p3492_p3), [#allocation14], 272  }
 0x149   : > { %2711 = vsyncadd (%p3493_p12), [#allocation14], 4294967024  ;;  %p3494_p6 = pmov %p3489_p1 }
 0x14a   : > { %p3495_p13 = pmov %p3489_p1 }
 0x14b   : > { %2713 = dma.done.wait (%p3494_p6), [#allocation17], 32  }
 0x14c   : > { %2715 = vsyncadd (%p3495_p13), [#allocation17], 4294967264  ;;  %p3496_p4 = pmov %p3489_p1 }
 0x14d   : > { %p3497_p9 = pmov %p3489_p1 }
 0x14e   : > { %2717 = dma.done.wait (%p3496_p4), [#allocation20], 16  }
 0x14f   : > { %2719 = vsyncadd (%p3497_p9), [#allocation20], 4294967280  ;;  %v2760_v0 = vmov 0.0   ;;  %vm2761_vm0 = vmmov 0   ;;  %v2332_v1 = vld [vmem:[#allocation12] sm:$0xff]   ;;  %v2333_v2 = vld [vmem:[#allocation12 + $0x8] sm:$0xff]   ;;  %v624_v23 = vlaneseq }
 0x150   : > { %2099 = vmatprep.subr.bf16.mxu0 %v2760_v0  ;;  %2107 = vmatprep.subr.bf16.mxu1 %v2760_v0  ;;  %v2334_v3 = vld [vmem:[#allocation9] sm:$0xff]   ;;  %v2335_v5 = vld [vmem:[#allocation9 + $0x8] sm:$0xff]   ;;  %v3204_v6 = vld [vmem:[%s461_s7] sm:$0xff]  ;;  %vm565_vm1 = vcmask 261120   ;;  %s2762_s19 = smov 104   ;;  %s2763_s2 = smov 120  }
 0x151   : > { %2103 = vmatprep.mubr.msk.bf16.mxu0 %vm2761_vm0, %v2760_v0  ;;  %2111 = vmatprep.mubr.msk.bf16.mxu1 %vm2761_vm0, %v2760_v0  ;;  %v540_v4 = vld [vmem:[%s452_s22] sm:$0xff]  ;;  %v921_v8 = vpack.c.bf16 %v3204_v6, %v3204_v6  ;;  %v2048_v11 = vld [vmem:[#allocation10] ss:$0 sm:$0xff]  ;;  %s2764_s24 = smov 112   ;;  %v2765_v21 = vmov 1983009808  }
 0x152   : > { %2100 = vmatpush3.bf16.msra.mxu0 %v2332_v1  ;;  %2108 = vmatpush3.bf16.msra.mxu1 %v2334_v3  ;;  %v541_v7 = vpack.c.bf16 %v540_v4, %v540_v4  ;;  %v2040_v9 = vld [vmem:[#allocation13] ss:$0 sm:$0xff]  ;;  %v622_v22 = vunpack.c.l.s4 %v2765_v21  ;;  %v2766_v24 = vmov 1934713408   ;;  %v625_v27 = vshrl.u32 %v624_v23, 7  ;;  %s2767_s10 = smov 96  }
 0x153   : > { %2101 = vmatprep.subr.bf16.mxu0 %v2760_v0  ;;  %2109 = vmatprep.subr.bf16.mxu1 %v2760_v0  ;;  %v654_v25 = vunpack.c.l.s4 %v2766_v24  ;;  %vm759_vm2 = vcmask 60416   ;;  %vm1143_vm3 = vcmask 64512   ;;  %vm1383_vm4 = vcmask 1043456   ;;  %s2768_s23 = smov 16   ;;  %s2769_s6 = smov 8  }
 0x154   : > { %v623_v26 = vunpack.c.0.s8 %v622_v22  ;;  %s2770_s3 = smov 24   ;;  %vm1714_vm5 = vcmask 130048   ;;  %vm1716_vm6 = vcmask 195584   ;;  %s3498_s25 = sld [smem:[#allocation30_spill]] }
 0x155   : > { %v655_v30 = vunpack.c.0.s8 %v654_v25  ;;  %s534_s30 = scalar_lea.vmem [#allocation21], %s3163_s29  ;;  %s3499_s21 = sld [smem:[#allocation39_spill]] }
 0x156   : > { %2102 = vmatpush3.bf16.msra.mxu0 %v2333_v2  ;;  %2110 = vmatpush3.bf16.msra.mxu1 %v2335_v5  ;;  %v3226_v31 = vsub.s32 %v623_v26, %v625_v27  ;;  %s1833_s4 = sshll.u32 %s534_s30, 4  ;;  %s1819_s7 = scalar_lea.sflag [#allocation6], %s3160_s5  ;;  %s3390_s4 = int_to_ptr.vmem [resolvable:$true] %s1833_s4 }
 0x157   : > { %2115 = vmatprep.subr.bf16.mxu0 %v2760_v0  ;;  %2121 = vmatprep.subr.bf16.mxu1 %v2760_v0  ;;  %v3238_v38 = vsub.s32 %v655_v30, %v625_v27  ;;  %p3500_p7 = scmp.ne.s32.totalorder %s3481_s20, 0  ;;  %s2771_s29 = smov [#allocation21]  }
 0x159   : > { %2104 = vmatmul.mubr.msk.bf16.vlgmr.msra.gmra.mrb[0].mxu0 %vm565_vm1, %v541_v7  ;;  %2112 = vmatmul.mubr.msk.bf16.vlgmr.msra.gmra.mrb[0].mxu1 %vm565_vm1, %v921_v8 }
 0x15a   : > { %2117 = vmatprep.mubr.msk.bf16.mxu0 %vm2761_vm0, %v2760_v0  ;;  %2123 = vmatprep.mubr.msk.bf16.mxu1 %vm2761_vm0, %v2760_v0  ;;  %s2071_s27 = sshll.u32 %s3498_s25, 7 }
 0x15b   : > { %s3388_s28 = scalar_lea.hbm %s3499_s21, %s2071_s27 }
 0x22c   : > { %v603_v10 = vpop.f32.mrb[0].mxu0  ;;  %v983_v15 = vpop.f32.mrb[0].mxu1 }
 0x22d   : > { %v3217_v12 = vadd.f32 %v2040_v9, %v603_v10  ;;  %v2105_v13 = vpop.f32.mrb[1].mxu0  ;;  %v984_v17 = vadd.f32 %v2048_v11, %v983_v15  ;;  %v2113_v18 = vpop.f32.mrb[1].mxu1 }
 0x22e   : > { %v606_v14 = vpop.f32.mrb[2].mxu0  ;;  %v986_v19 = vpop.f32.mrb[2].mxu1 }
 0x22f   : > { %616 = vrot.lane.b32.xlu1 %v3217_v12, %s2762_s19  ;;  %610 = vrot.lane.b32.xlu0 %v3217_v12, %s2763_s2  ;;  %v2106_v16 = vpop.f32.mrb[3].mxu0  ;;  %v2114_v20 = vpop.f32.mrb[3].mxu1 }
 0x233   : > { %990 = vrot.lane.b32.xlu1 %v984_v17, %s2763_s2  ;;  %613 = vrot.lane.b32.xlu0 %v3217_v12, %s2764_s24  ;;  %s2644_s2 = sshll.u32 %s2771_s29, 4  ;;  %s2645_s2 = int_to_ptr.vmem [resolvable:$false] %s2644_s2 }
 0x234   : > { %p2647_p10 = scmp.lt.s32.totalorder %s3390_s4, %s2645_s2 }
 0x237   : > { %996 = vrot.lane.b32.xlu1 %v984_v17, %s2762_s19  ;;  %993 = vrot.lane.b32.xlu0 %v984_v17, %s2764_s24  ;;  %s2640_s19 = scalar_lea.vmem %s3390_s4, 128  ;;  %s2646_s24 = scalar_lea.vmem %s2645_s2, 256 }
 0x238   : > { %p2641_p0 = scmp.ne.s32.totalorder %s3390_s4, %s2640_s19  ;;  %p2648_p1 = scmp.lt.s32.totalorder %s2646_s24, %s2640_s19 }
 0x23a   : > { %p2642_p11 = pnand %p2641_p0, %p3500_p7  ;;  %p2649_p5 = por %p2648_p1, %p2647_p10 }
 0x23c   : > { %p2643_p2 = pneg %p2642_p11 }
 0x23e   : > { %p2650_p8 = pnand %p2649_p5, %p2643_p2 }
 0x2a1   : > { %v3222_v28 = vpop.permute.xlu1 %616  ;;  %v3224_v29 = vpop.permute.xlu0 %610 }
 0x2a2   : > { %v635_v32 = vcombine.low %v3224_v29, %v3222_v28  ;;  %v636_v33 = vcombine.high %v3224_v29, %v3222_v28 }
 0x2a4   : > { %v643_v39 = vrot.slane %v635_v32, %v3226_v31  ;;  %v650_v40 = vrot.slane %v636_v33, %v3226_v31 }
 0x2a5   : > { %v991_v34 = vpop.permute.xlu1 %990  ;;  %v3232_v35 = vpop.permute.xlu0 %613 }
 0x2a6   : > { %v619_v36 = vcombine.low %v3217_v12, %v3232_v35  ;;  %v620_v37 = vcombine.high %v3217_v12, %v3232_v35 }
 0x2a8   : > { %v627_v41 = vrot.slane %v619_v36, %v3226_v31  ;;  %v634_v42 = vrot.slane %v620_v37, %v3226_v31 }
 0x2a9   : > { %v997_v43 = vpop.permute.xlu1 %996  ;;  %v994_v44 = vpop.permute.xlu0 %993 }
 0x2aa   : > { %v651_v45 = vcombine.low %v627_v41, %v643_v39  ;;  %v652_v46 = vcombine.high %v627_v41, %v643_v39  ;;  %v667_v47 = vcombine.low %v634_v42, %v650_v40  ;;  %v668_v48 = vcombine.high %v634_v42, %v650_v40 }
 0x2ab   : > { %v1015_v49 = vcombine.low %v991_v34, %v997_v43  ;;  %v1016_v50 = vcombine.high %v991_v34, %v997_v43  ;;  %v999_v51 = vcombine.low %v984_v17, %v994_v44  ;;  %v1000_v52 = vcombine.high %v984_v17, %v994_v44 }
 0x2ac   : > { %v659_v53 = vrot.slane %v651_v45, %v3238_v38  ;;  %v666_v54 = vrot.slane %v652_v46, %v3238_v38  ;;  %v675_v55 = vrot.slane %v667_v47, %v3238_v38  ;;  %v682_v56 = vrot.slane %v668_v48, %v3238_v38 }
 0x2ad   : > { %v1023_v57 = vrot.slane %v1015_v49, %v3226_v31  ;;  %v1030_v58 = vrot.slane %v1016_v50, %v3226_v31  ;;  %v1007_v59 = vrot.slane %v999_v51, %v3226_v31  ;;  %v1014_v60 = vrot.slane %v1000_v52, %v3226_v31 }
 0x2ae   : > { %v687_v61 = vcombine.low %v659_v53, %v666_v54  ;;  %v2044_v62 = vcombine.high %v659_v53, %v666_v54  ;;  %v703_v63 = vcombine.low %v675_v55, %v682_v56  ;;  %v2045_v1 = vcombine.high %v675_v55, %v682_v56 }
 0x2af   : > { %v1031_v2 = vcombine.low %v1007_v59, %v1023_v57  ;;  %v1032_v3 = vcombine.high %v1007_v59, %v1023_v57  ;;  %v1047_v4 = vcombine.low %v1014_v60, %v1030_v58  ;;  %v1048_v5 = vcombine.high %v1014_v60, %v1030_v58 }
 0x2b0   : > { %v694_v7 = vrot.slane %v687_v61, %v3226_v31  ;;  %v702_v8 = vrot.slane %v2044_v62, %v3226_v31  ;;  %v710_v9 = vrot.slane %v703_v63, %v3226_v31  ;;  %v718_v10 = vrot.slane %v2045_v1, %v3226_v31 }
 0x2b1   : > { %v1039_v11 = vrot.slane %v1031_v2, %v3238_v38  ;;  %v1046_v13 = vrot.slane %v1032_v3, %v3238_v38  ;;  %v1055_v14 = vrot.slane %v1047_v4, %v3238_v38  ;;  %v1062_v15 = vrot.slane %v1048_v5, %v3238_v38 }
 0x2b2   : > { %v719_v16 = vcombine.low %v694_v7, %v702_v8  ;;  %v720_v17 = vcombine.high %v694_v7, %v702_v8  ;;  %v735_v18 = vcombine.low %v710_v9, %v718_v10  ;;  %v736_v19 = vcombine.high %v710_v9, %v718_v10 }
 0x2b3   : > { %v1067_v20 = vcombine.low %v1039_v11, %v1046_v13  ;;  %v2052_v21 = vcombine.high %v1039_v11, %v1046_v13  ;;  %v1083_v22 = vcombine.low %v1055_v14, %v1062_v15  ;;  %v2053_v23 = vcombine.high %v1055_v14, %v1062_v15 }
 0x2b4   : > { %v727_v24 = vrot.slane %v719_v16, %v3238_v38  ;;  %v734_v25 = vrot.slane %v720_v17, %v3238_v38  ;;  %v743_v26 = vrot.slane %v735_v18, %v3238_v38  ;;  %v750_v27 = vrot.slane %v736_v19, %v3238_v38 }
 0x2b5   : > { %v1074_v36 = vrot.slane %v1067_v20, %v3226_v31  ;;  %v1082_v37 = vrot.slane %v2052_v21, %v3226_v31  ;;  %v1090_v39 = vrot.slane %v1083_v22, %v3226_v31  ;;  %v1098_v40 = vrot.slane %v2053_v23, %v3226_v31 }
 0x2b6   : > { %v751_v30 = vcombine.low %v727_v24, %v743_v26  ;;  %v752_v32 = vcombine.high %v727_v24, %v743_v26  ;;  %v753_v33 = vcombine.low %v734_v25, %v750_v27  ;;  %v754_v34 = vcombine.high %v734_v25, %v750_v27 }
 0x2b7   : > { %v1099_v45 = vcombine.low %v1074_v36, %v1082_v37  ;;  %v1115_v46 = vcombine.low %v1090_v39, %v1098_v40  ;;  %v1100_v53 = vcombine.high %v1074_v36, %v1082_v37  ;;  %v1116_v54 = vcombine.high %v1090_v39, %v1098_v40 }
 0x2b8   : > { %v755_v41 = vpack.c.bf16 %v751_v30, %v751_v30  ;;  %v756_v42 = vpack.c.bf16 %v752_v32, %v752_v32  ;;  %v757_v43 = vpack.c.bf16 %v753_v33, %v753_v33  ;;  %v758_v44 = vpack.c.bf16 %v754_v34, %v754_v34 }
 0x2b9   : > { %v1107_v47 = vrot.slane %v1099_v45, %v3238_v38  ;;  %v1123_v48 = vrot.slane %v1115_v46, %v3238_v38  ;;  %v1114_v61 = vrot.slane %v1100_v53, %v3238_v38  ;;  %v1130_v62 = vrot.slane %v1116_v54, %v3238_v38 }
 0x2ba   : > { %760 = vst.msk [vmem:[#allocation2] sm:$0xf] %vm759_vm2, %v755_v41  ;;  %761 = vst.msk [vmem:[#allocation2 + $0x4] sm:$0xf] %vm759_vm2, %v756_v42 }
 0x2bb   : > { %762 = vst.msk [vmem:[#allocation2 + $0x8] sm:$0xf] %vm759_vm2, %v757_v43  ;;  %763 = vst.msk [vmem:[#allocation2 + $0xc] sm:$0xf] %vm759_vm2, %v758_v44  ;;  %v1131_v55 = vcombine.low %v1107_v47, %v1123_v48  ;;  %v1132_v56 = vcombine.high %v1107_v47, %v1123_v48  ;;  %v1133_v2 = vcombine.low %v1114_v61, %v1130_v62 }
 0x2bc   : > { %v1134_v3 = vcombine.high %v1114_v61, %v1130_v62 }
 0x2bd   : > { %v1135_v59 = vpack.c.bf16 %v1131_v55, %v1131_v55  ;;  %v1136_v60 = vpack.c.bf16 %v1132_v56, %v1132_v56  ;;  %v1137_v4 = vpack.c.bf16 %v1133_v2, %v1133_v2 }
 0x2be   : > { %v1138_v5 = vpack.c.bf16 %v1134_v3, %v1134_v3 }
 0x2c1   : > { %v1139_v49 = vld [vmem:[#allocation2] sm:$0xf]  ;;  %v1140_v50 = vld [vmem:[#allocation2 + $0x4] sm:$0xf] }
 0x2c2   : > { %v1148_v51 = vsel %vm1143_vm3, %v1139_v49, 0  ;;  %v1194_v52 = vsel %vm1143_vm3, %v1140_v50, 0  ;;  %v1141_v57 = vld [vmem:[#allocation2 + $0x8] sm:$0xf]  ;;  %v1142_v58 = vld [vmem:[#allocation2 + $0xc] sm:$0xf] }
 0x2c3   : > { %2116 = vmatpush3.bf16.xpose.msra.mxu0 %v1148_v51  ;;  %2122 = vmatpush3.bf16.xpose.msra.mxu1 %v1194_v52  ;;  %v1240_v63 = vsel %vm1143_vm3, %v1141_v57, 0  ;;  %v1286_v1 = vsel %vm1143_vm3, %v1142_v58, 0 }
 0x2c4   : > { %2127 = vmatprep.subr.bf16.mxu0 %v2760_v0  ;;  %2133 = vmatprep.subr.bf16.mxu1 %v2760_v0 }
 0x2ca   : > { %2118 = vmatmul.mubr.msk.bf16.vlgmr.msra.gmra.mrb[4].mxu0 %vm1143_vm3, %v1135_v59  ;;  %2124 = vmatmul.mubr.msk.bf16.vlgmr.msra.gmra.mrb[4].mxu1 %vm1143_vm3, %v1136_v60 }
 0x2cb   : > { %2128 = vmatpush3.bf16.xpose.msra.mxu0 %v1240_v63  ;;  %2134 = vmatpush3.bf16.xpose.msra.mxu1 %v1286_v1 }
 0x2cc   : > { %2129 = vmatprep.mubr.msk.bf16.mxu0 %vm2761_vm0, %v2760_v0  ;;  %2135 = vmatprep.mubr.msk.bf16.mxu1 %vm2761_vm0, %v2760_v0 }
 0x2cd   : > { %2139 = vmatprep.subr.bf16.mxu0 %v2760_v0  ;;  %2145 = vmatprep.subr.bf16.mxu1 %v2760_v0 }
 0x2d2   : > { %2130 = vmatmul.mubr.msk.bf16.vlgmr.msra.gmra.mrb[8].mxu0 %vm1143_vm3, %v1137_v4  ;;  %2136 = vmatmul.mubr.msk.bf16.vlgmr.msra.gmra.mrb[8].mxu1 %vm1143_vm3, %v1138_v5 }
 0x2d3   : > { %2141 = vmatprep.mubr.msk.bf16.mxu0 %vm2761_vm0, %v2760_v0  ;;  %2147 = vmatprep.mubr.msk.bf16.mxu1 %vm2761_vm0, %v2760_v0 }
 0x39d   : > { %v1184_v7 = vpop.f32.mrb[4].mxu0  ;;  %v1230_v8 = vpop.f32.mrb[4].mxu1 }
 0x39e   : > { %v2119_v9 = vpop.f32.mrb[5].mxu0  ;;  %v2125_v10 = vpop.f32.mrb[5].mxu1  ;;  %v1331_v11 = vsel %vm1143_vm3, %v1230_v8, -inf  ;;  %v1328_v13 = vsel %vm1143_vm3, %v1184_v7, -inf }
 0x39f   : > { %1332 = vmax.xlane.f32.xlu1 %v1331_v11  ;;  %v1233_v14 = vpop.f32.mrb[6].mxu1  ;;  %1329 = vmax.xlane.f32.xlu0 %v1328_v13  ;;  %v1187_v15 = vpop.f32.mrb[6].mxu0 }
 0x3a0   : > { %v2120_v16 = vpop.f32.mrb[7].mxu0  ;;  %v2126_v17 = vpop.f32.mrb[7].mxu1 }
 0x3a5   : > { %v1276_v18 = vpop.f32.mrb[8].mxu0  ;;  %v1322_v19 = vpop.f32.mrb[8].mxu1 }
 0x3a6   : > { %v2131_v20 = vpop.f32.mrb[9].mxu0  ;;  %v2137_v21 = vpop.f32.mrb[9].mxu1  ;;  %v1334_v22 = vsel %vm1143_vm3, %v1276_v18, -inf  ;;  %v1337_v27 = vsel %vm1143_vm3, %v1322_v19, -inf }
 0x3a7   : > { %v1325_v23 = vpop.f32.mrb[10].mxu1  ;;  %1335 = vmax.xlane.f32.xlu0 %v1334_v22  ;;  %v1279_v24 = vpop.f32.mrb[10].mxu0 }
 0x3a8   : > { %v2132_v25 = vpop.f32.mrb[11].mxu0  ;;  %v2138_v26 = vpop.f32.mrb[11].mxu1 }
 0x3ab   : > { %1338 = vmax.xlane.f32.xlu0 %v1337_v27 }
 0x3b0   : > { %764 = vrot.lane.b32.xlu1 %v3217_v12, %s2767_s10 }
 0x3b4   : > { %768 = vrot.lane.b32.xlu1 %v3232_v35, %s2767_s10 }
 0x3b8   : > { %770 = vrot.lane.b32.xlu1 %v3222_v28, %s2767_s10 }
 0x3c1   : > { %766 = vrot.lane.b32.xlu0 %v3224_v29, %s2767_s10 }
 0x42c   : > { %v1333_v30 = vpop.xlane.xlu1 %1332  ;;  %v1330_v32 = vpop.xlane.xlu0 %1329 }
 0x42d   : > { %v1341_v33 = vsub.f32 %v1230_v8, %v1333_v30  ;;  %v1340_v34 = vsub.f32 %v1184_v7, %v1330_v32 }
 0x42f   : > { %v1346_v36 = vmul.f32 1.442695, %v1341_v33  ;;  %v1344_v37 = vmul.f32 1.442695, %v1340_v34 }
 0x430   : > { %v765_v39 = vpop.permute.xlu1 %764 }
 0x431   : > { %2338 = vpow2.f32 %v1346_v36 }
 0x432   : > { %2340 = vpow2.f32 %v1344_v37 }
 0x434   : > { %v1336_v40 = vpop.xlane.xlu0 %1335  ;;  %v769_v42 = vpop.permute.xlu1 %768 }
 0x435   : > { %v1342_v41 = vsub.f32 %v1276_v18, %v1336_v40  ;;  %v776_v28 = vcombine.low %v765_v39, %v769_v42  ;;  %v777_v29 = vcombine.high %v765_v39, %v769_v42 }
 0x437   : > { %v1348_v43 = vmul.f32 1.442695, %v1342_v41  ;;  %v784_v53 = vrot.slane %v776_v28, %v3226_v31  ;;  %v791_v54 = vrot.slane %v777_v29, %v3226_v31 }
 0x438   : > { %v1339_v12 = vpop.xlane.xlu0 %1338  ;;  %v771_v47 = vpop.permute.xlu1 %770 }
 0x439   : > { %2342 = vpow2.f32 %v1348_v43  ;;  %v1343_v35 = vsub.f32 %v1322_v19, %v1339_v12 }
 0x43b   : > { %v3304_v44 = vpop.eup %2338  ;;  %v1350_v45 = vmul.f32 1.442695, %v1343_v35 }
 0x43c   : > { %v3306_v46 = vpop.eup %2340  ;;  %v767_v48 = vpop.permute.xlu0 %766  ;;  %v1355_v49 = vsel %vm1143_vm3, %v3304_v44, 0.0 }
 0x43d   : > { %2344 = vpow2.f32 %v1350_v45  ;;  %v792_v50 = vcombine.low %v767_v48, %v771_v47  ;;  %v793_v51 = vcombine.high %v767_v48, %v771_v47  ;;  %1356 = vadd.xlane.f32.xlu1 %v1355_v49  ;;  %v1352_v52 = vsel %vm1143_vm3, %v3306_v46, 0.0 }
 0x43e   : > { %1353 = vadd.xlane.f32.xlu0 %v1352_v52 }
 0x43f   : > { %v800_v55 = vrot.slane %v792_v50, %v3226_v31  ;;  %v807_v56 = vrot.slane %v793_v51, %v3226_v31 }
 0x441   : > { %v808_v57 = vcombine.low %v784_v53, %v800_v55  ;;  %v809_v58 = vcombine.high %v784_v53, %v800_v55  ;;  %v824_v59 = vcombine.low %v791_v54, %v807_v56  ;;  %v825_v60 = vcombine.high %v791_v54, %v807_v56 }
 0x443   : > { %v3316_v61 = vpop.eup %2342  ;;  %v816_v62 = vrot.slane %v808_v57, %v3238_v38  ;;  %v823_v63 = vrot.slane %v809_v58, %v3238_v38  ;;  %v832_v1 = vrot.slane %v824_v59, %v3238_v38  ;;  %v839_v2 = vrot.slane %v825_v60, %v3238_v38 }
 0x444   : > { %v1358_v3 = vsel %vm1143_vm3, %v3316_v61, 0.0 }
 0x445   : > { %v844_v4 = vcombine.low %v816_v62, %v823_v63  ;;  %v2046_v5 = vcombine.high %v816_v62, %v823_v63  ;;  %v860_v7 = vcombine.low %v832_v1, %v839_v2  ;;  %v2047_v8 = vcombine.high %v832_v1, %v839_v2  ;;  %1359 = vadd.xlane.f32.xlu0 %v1358_v3 }
 0x447   : > { %v3324_v9 = vpop.eup %2344  ;;  %v851_v10 = vrot.slane %v844_v4, %v3226_v31  ;;  %v859_v11 = vrot.slane %v2046_v5, %v3226_v31  ;;  %v867_v13 = vrot.slane %v860_v7, %v3226_v31  ;;  %v875_v14 = vrot.slane %v2047_v8, %v3226_v31 }
 0x448   : > { %v1361_v15 = vsel %vm1143_vm3, %v3324_v9, 0.0 }
 0x449   : > { %v876_v16 = vcombine.low %v851_v10, %v859_v11  ;;  %v877_v17 = vcombine.high %v851_v10, %v859_v11  ;;  %v892_v18 = vcombine.low %v867_v13, %v875_v14  ;;  %v893_v19 = vcombine.high %v867_v13, %v875_v14  ;;  %1362 = vadd.xlane.f32.xlu0 %v1361_v15 }
 0x44b   : > { %v884_v20 = vrot.slane %v876_v16, %v3238_v38  ;;  %v891_v21 = vrot.slane %v877_v17, %v3238_v38  ;;  %v900_v22 = vrot.slane %v892_v18, %v3238_v38  ;;  %v907_v23 = vrot.slane %v893_v19, %v3238_v38 }
 0x44d   : > { %v908_v24 = vcombine.low %v884_v20, %v900_v22  ;;  %v909_v25 = vcombine.high %v884_v20, %v900_v22  ;;  %v910_v26 = vcombine.low %v891_v21, %v907_v23  ;;  %v911_v27 = vcombine.high %v891_v21, %v907_v23 }
 0x44f   : > { %v912_v30 = vpack.c.bf16 %v908_v24, %v908_v24  ;;  %v913_v32 = vpack.c.bf16 %v909_v25, %v909_v25  ;;  %v914_v33 = vpack.c.bf16 %v910_v26, %v910_v26  ;;  %v915_v34 = vpack.c.bf16 %v911_v27, %v911_v27  ;;  %v2336_v24 = vld [vmem:[#allocation15] sm:$0xff]  }
 0x451   : > { %916 = vst.msk [vmem:[#allocation3] sm:$0xf] %vm759_vm2, %v912_v30  ;;  %917 = vst.msk [vmem:[#allocation3 + $0x4] sm:$0xf] %vm759_vm2, %v913_v32 }
 0x452   : > { %918 = vst.msk [vmem:[#allocation3 + $0x8] sm:$0xf] %vm759_vm2, %v914_v33  ;;  %919 = vst.msk [vmem:[#allocation3 + $0xc] sm:$0xf] %vm759_vm2, %v915_v34 }
 0x458   : > { %v1376_v36 = vld [vmem:[#allocation3] sm:$0xf]  ;;  %v1377_v37 = vld [vmem:[#allocation3 + $0x4] sm:$0xf] }
 0x459   : > { %v1385_v39 = vsel %vm1383_vm4, %v1376_v36, 0  ;;  %v1431_v40 = vsel %vm1383_vm4, %v1377_v37, 0  ;;  %v1379_v47 = vld [vmem:[#allocation3 + $0xc] sm:$0xf]  ;;  %v1378_v49 = vld [vmem:[#allocation3 + $0x8] sm:$0xf] }
 0x45a   : > { %2140 = vmatpush3.bf16.msra.mxu0 %v1385_v39  ;;  %2146 = vmatpush3.bf16.msra.mxu1 %v1431_v40  ;;  %v1523_v51 = vsel %vm1383_vm4, %v1379_v47, 0  ;;  %v1477_v52 = vsel %vm1383_vm4, %v1378_v49, 0  ;;  %v2337_v37 = vld [vmem:[#allocation15 + $0x8] sm:$0xff]  }
 0x45b   : > { %2151 = vmatprep.subr.bf16.mxu0 %v2760_v0  ;;  %2157 = vmatprep.subr.bf16.mxu1 %v2760_v0 }
 0x4ca   : > { %v1357_v41 = vpop.xlane.xlu1 %1356 }
 0x4cb   : > { %2346 = vrcp.f32 %v1357_v41  ;;  %v1354_v42 = vpop.xlane.xlu0 %1353 }
 0x4cc   : > { %2348 = vrcp.f32 %v1354_v42 }
 0x4d2   : > { %v1360_v43 = vpop.xlane.xlu0 %1359 }
 0x4d3   : > { %2350 = vrcp.f32 %v1360_v43 }
 0x4d5   : > { %v2347_v12 = vpop.eup %2346 }
 0x4d6   : > { %v2349_v35 = vpop.eup %2348  ;;  %v1369_v28 = vmul.f32 %v2347_v12, %v3304_v44  ;;  %v1363_v29 = vpop.xlane.xlu0 %1362 }
 0x4d7   : > { %v1368_v45 = vmul.f32 %v2349_v35, %v3306_v46  ;;  %2352 = vrcp.f32 %v1363_v29 }
 0x4d8   : > { %v1373_v48 = vpack.c.bf16 %v1369_v28, %v1369_v28 }
 0x4d9   : > { %v1372_v50 = vpack.c.bf16 %v1368_v45, %v1368_v45 }
 0x4da   : > { %2148 = vmatmul.mubr.msk.bf16.vlgmr.msra.gmra.mrb[12].mxu1 %vm1143_vm3, %v1373_v48 }
 0x4db   : > { %2142 = vmatmul.mubr.msk.bf16.vlgmr.msra.gmra.mrb[12].mxu0 %vm1143_vm3, %v1372_v50  ;;  %2158 = vmatpush3.bf16.msra.mxu1 %v1523_v51 }
 0x4dc   : > { %2152 = vmatpush3.bf16.msra.mxu0 %v1477_v52  ;;  %2153 = vmatprep.mubr.msk.bf16.mxu0 %vm2761_vm0, %v2760_v0 }
 0x4dd   : > { %v2351_v44 = vpop.eup %2350  ;;  %2159 = vmatprep.mubr.msk.bf16.mxu1 %vm2761_vm0, %v2760_v0  ;;  %2163 = vmatprep.subr.bf16.mxu0 %v2760_v0 }
 0x4de   : > { %v1370_v46 = vmul.f32 %v2351_v44, %v3316_v61 }
 0x4e0   : > { %v1374_v53 = vpack.c.bf16 %v1370_v46, %v1370_v46 }
 0x4e1   : > { %v2353_v54 = vpop.eup %2352 }
 0x4e2   : > { %v1371_v55 = vmul.f32 %v2353_v54, %v3324_v9 }
 0x4e3   : > { %2154 = vmatmul.mubr.msk.bf16.vlgmr.msra.gmra.mrb[16].mxu0 %vm1143_vm3, %v1374_v53 }
 0x4e4   : > { %v1375_v56 = vpack.c.bf16 %v1371_v55, %v1371_v55  ;;  %2167 = vmatprep.mubr.msk.bf16.mxu0 %vm2761_vm0, %v2760_v0  ;;  %2164 = vmatpush3.bf16.msra.mxu0 %v2336_v24 }
 0x4e5   : > { %2165 = vmatprep.subr.bf16.mxu0 %v2760_v0 }
 0x4e6   : > { %2160 = vmatmul.mubr.msk.bf16.vlgmr.msra.gmra.mrb[16].mxu1 %vm1143_vm3, %v1375_v56  ;;  %v2067_v56 = vld [vmem:[#allocation16] ss:$0 sm:$0xff] }
 0x4e8   : > { %2166 = vmatpush3.bf16.msra.mxu0 %v2337_v37 }
 0x5ad   : > { %v1467_v57 = vpop.f32.mrb[12].mxu1 }
 0x5ae   : > { %v1421_v58 = vpop.f32.mrb[12].mxu0  ;;  %v2149_v59 = vpop.f32.mrb[13].mxu1 }
 0x5af   : > { %v2143_v60 = vpop.f32.mrb[13].mxu0  ;;  %v1470_v62 = vpop.f32.mrb[14].mxu1 }
 0x5b0   : > { %v1424_v63 = vpop.f32.mrb[14].mxu0  ;;  %v2150_v1 = vpop.f32.mrb[15].mxu1 }
 0x5b1   : > { %v2144_v61 = vpop.f32.mrb[15].mxu0 }
 0x5b6   : > { %v1513_v2 = vpop.f32.mrb[16].mxu0 }
 0x5b7   : > { %v1565_v3 = vcombine.low %v1421_v58, %v1513_v2  ;;  %v1566_v4 = vcombine.high %v1421_v58, %v1513_v2  ;;  %v2155_v5 = vpop.f32.mrb[17].mxu0 }
 0x5b8   : > { %v1516_v7 = vpop.f32.mrb[18].mxu0 }
 0x5b9   : > { %v2156_v8 = vpop.f32.mrb[19].mxu0  ;;  %v1559_v9 = vpop.f32.mrb[16].mxu1  ;;  %v1573_v15 = vrot.slane %v1565_v3, %v3226_v31  ;;  %v1580_v16 = vrot.slane %v1566_v4, %v3226_v31 }
 0x5ba   : > { %v1581_v10 = vcombine.low %v1467_v57, %v1559_v9  ;;  %v1582_v11 = vcombine.high %v1467_v57, %v1559_v9  ;;  %v2161_v13 = vpop.f32.mrb[17].mxu1  ;;  %v2068_v9 = vld [vmem:[#allocation18] ss:$0 sm:$0xff] }
 0x5bb   : > { %v1562_v14 = vpop.f32.mrb[18].mxu1 }
 0x5bc   : > { %v1589_v17 = vrot.slane %v1581_v10, %v3226_v31  ;;  %v1596_v18 = vrot.slane %v1582_v11, %v3226_v31  ;;  %v2162_v19 = vpop.f32.mrb[19].mxu1  ;;  %v2069_v11 = vld [vmem:[#allocation19] ss:$0 sm:$0xff] }
 0x5be   : > { %v1597_v20 = vcombine.low %v1573_v15, %v1589_v17  ;;  %v1598_v21 = vcombine.high %v1573_v15, %v1589_v17  ;;  %v1613_v22 = vcombine.low %v1580_v16, %v1596_v18  ;;  %v1614_v23 = vcombine.high %v1580_v16, %v1596_v18 }
 0x5c0   : > { %v1605_v25 = vrot.slane %v1597_v20, %v3238_v38  ;;  %v1612_v26 = vrot.slane %v1598_v21, %v3238_v38  ;;  %v1621_v27 = vrot.slane %v1613_v22, %v3238_v38  ;;  %v1628_v30 = vrot.slane %v1614_v23, %v3238_v38 }
 0x5c2   : > { %v1633_v32 = vcombine.low %v1605_v25, %v1612_v26  ;;  %v2062_v33 = vcombine.high %v1605_v25, %v1612_v26  ;;  %v1649_v34 = vcombine.low %v1621_v27, %v1628_v30  ;;  %v2063_v36 = vcombine.high %v1621_v27, %v1628_v30 }
 0x5c4   : > { %v1640_v39 = vrot.slane %v1633_v32, %v3226_v31  ;;  %v1648_v40 = vrot.slane %v2062_v33, %v3226_v31  ;;  %v1656_v41 = vrot.slane %v1649_v34, %v3226_v31  ;;  %v1664_v42 = vrot.slane %v2063_v36, %v3226_v31 }
 0x5c6   : > { %v1666_v43 = vcombine.high %v1640_v39, %v1648_v40  ;;  %v1682_v12 = vcombine.high %v1656_v41, %v1664_v42  ;;  %v1665_v35 = vcombine.low %v1640_v39, %v1648_v40  ;;  %v1681_v28 = vcombine.low %v1656_v41, %v1664_v42 }
 0x5c8   : > { %v1680_v29 = vrot.slane %v1666_v43, %v3238_v38  ;;  %v1696_v45 = vrot.slane %v1682_v12, %v3238_v38  ;;  %v1673_v0 = vrot.slane %v1665_v35, %v3238_v38  ;;  %v1689_v47 = vrot.slane %v1681_v28, %v3238_v38 }
 0x5ca   : > { %v1699_v48 = vcombine.low %v1680_v29, %v1696_v45  ;;  %v1698_v49 = vcombine.high %v1673_v0, %v1689_v47  ;;  %v1700_v50 = vcombine.high %v1680_v29, %v1696_v45  ;;  %v1697_v51 = vcombine.low %v1673_v0, %v1689_v47 }
 0x5cc   : > { %1706 = vrot.lane.b32.xlu0 %v1699_v48, %s2768_s23  ;;  %1702 = vrot.lane.b32.xlu1 %v1698_v49, %s2769_s6 }
 0x5d0   : > { %1710 = vrot.lane.b32.xlu1 %v1700_v50, %s2770_s3 }
 0x63e   : > { %v1703_v31 = vpop.permute.xlu1 %1702  ;;  %v1707_v52 = vpop.permute.xlu0 %1706 }
 0x63f   : > { %v1713_v44 = vsel %vm1143_vm3, %v1697_v51, %v1703_v31 }
 0x640   : > { %v1715_v53 = vsel %vm1714_vm5, %v1713_v44, %v1707_v52 }
 0x642   : > { %v1711_v46 = vpop.permute.xlu1 %1710 }
 0x643   : > { %v1717_v54 = vsel %vm1716_vm6, %v1715_v53, %v1711_v46 }
 0x644   : > { %v1718_v38 = vpack.c.bf16 %v1717_v54, %v1717_v54 }
 0x646   : > { %2168 = vmatmul.mubr.msk.bf16.vlgmr.msra.gmra.mrb[20].mxu0 %vm565_vm1, %v1718_v38 }
 0x719   : > { %v1772_v55 = vpop.f32.mrb[20].mxu0 }
 0x71a   : > { %v1778_v57 = vadd.f32 %v1772_v55, %v3204_v6  ;;  %v2169_v58 = vpop.f32.mrb[21].mxu0 }
 0x71b   : > { %v1775_v59 = vpop.f32.mrb[22].mxu0 }
 0x71c   : > { %v2170_v60 = vpop.f32.mrb[23].mxu0  ;;  %v1786_v62 = vadd.f32 %v2067_v56, %v1778_v57 }
 0x71e   : > { %v1787_v63 = vsel %vm565_vm1, %v1786_v62, 0.0 }
 0x71f   : > { %1788 = vadd.xlane.f32.xlu1 %v1787_v63 }
 0x7ac   : > { %v1789_v1 = vpop.xlane.xlu1 %1788 }
 0x7ad   : > { %v1791_v61 = vmul.f32 0.03125, %v1789_v1 }
 0x7af   : > { %v1792_v2 = vsub.f32 %v1786_v62, %v1791_v61 }
 0x7b1   : > { %v1793_v3 = vmul.f32 %v1792_v2, %v1792_v2 }
 0x7b3   : > { %v1794_v4 = vsel %vm565_vm1, %v1793_v3, 0.0 }
 0x7b4   : > { %1795 = vadd.xlane.f32.xlu0 %v1794_v4 }
 0x841   : > { %v1796_v5 = vpop.xlane.xlu0 %1795 }
 0x842   : > { %v1797_v7 = vmul.f32 0.03125, %v1796_v5 }
 0x844   : > { %v1798_v6 = vadd.f32 1e-05, %v1797_v7 }
 0x846   : > { %2354 = vrsqrt.f32 %v1798_v6 }
 0x850   : > { %v2355_v8 = vpop.eup %2354 }
 0x851   : > { %v1800_v10 = vmul.f32 %v2355_v8, %v1792_v2 }
 0x853   : > { %v1808_v13 = vmul.f32 %v2068_v9, %v1800_v10 }
 0x855   : > { %v1816_v14 = vadd.f32 %v2069_v11, %v1808_v13 }
 0x857   : > { %1817 = vst.msk [vmem:[%s534_s30] sm:$0xff] %vm565_vm1, %v1816_v14 }
 0x858   : > { %2653 = shalt.err (!%p2650_p8)
}
 0x859   : > { %s2654_s5 = scalar_lea.hbm %s3388_s28, 128  ;;  %s2658_s6 = scalar_lea.hbm %s3499_s21, 256 }
 0x85a   : > { %p2655_p3 = scmp.ne.s32.totalorder %s3388_s28, %s2654_s5  ;;  %p2659_p13 = scmp.lt.u32.totalorder %s3388_s28, %s3499_s21 }
 0x85b   : > { %p2660_p4 = scmp.lt.u32.totalorder %s2658_s6, %s2654_s5  ;;  %p2662_p0 = scmp.lt.u32.totalorder %s2654_s5, %s3388_s28 }
 0x85c   : > { %p2656_p12 = pnand %p2655_p3, %p3500_p7 }
 0x85d   : > { %p2661_p9 = por %p2660_p4, %p2659_p13 }
 0x85e   : > { %p2657_p6 = pneg %p2656_p12 }
 0x85f   : > { %p2663_p11 = por %p2662_p0, %p2661_p9 }
 0x861   : > { %p2664_p2 = pnand %p2663_p11, %p2657_p6 }
 0x863   : > { %2667 = shalt.err (!%p2664_p2)
}
 0x864   : > { %2207 = dma.vmem_to_hbm [thread:$0]  (%p3500_p7), %s3390_s4, 128, %s3388_s28, %s1819_s7  }
 0x865 PF: > { %s1845_s27 = sand.u32 1, %s2726_s13   ;;  %p3501_p10 = scmp.ne.s32.totalorder %s3482_s26, 0 }
 0x866   : > { %p3502_p1 = scmp.ge.s32.totalorder %s2746_s18, 2  ;;  %s1846_s30 = scalar_lea.sflag [#allocation6], %s1845_s27 }
 0x868   : > { %p2242_p5 = pnand %p3502_p1, %p3501_p10 }
 0x86a   : > { %2721 = dma.done.wait (!%p2242_p5), %s1846_s30, 128  }
 0x86b   : > { %2723 = vsyncadd (!%p2242_p5), %s1846_s30, 4294967168  ;;  %s33_s18 = sadd.s32 1, %s2746_s18   ;;  %s3503_s13 = smov %s2730_s14 }
 0x86c   : > { %p30_p8 = scmp.ge.s32.totalorder %s33_s18, 4   ;;  %s3504_s14 = smov %s2734_s15 }
 0x86d   : > { %s3505_s15 = smov %s3081_s12  ;;  %s3506_s16 = smov %s2742_s17 }
 0x86e   : > { %s3507_s17 = smov %s3509_s11  ;;  %32 = sbr.rel (!%p30_p8) target bundleno = 21 (0x15), region = 154 }
 0x875   :  { %1851 = vsyncpa [#allocation5], 1 }
 0x876   :  { %1853 = vsyncpa [#allocation5 + $0x1], 1 }
 0x877   :  { %1854 = vsyncpa [#allocation8], 1 }
 0x878   :  { %1856 = vsyncpa [#allocation8 + $0x1], 1 }
 0x879   :  { %1857 = vsyncpa [#allocation11], 1 }
 0x87a   :  { %1858 = vsyncpa [#allocation14], 1 }
 0x87b   :  { %1859 = vsyncpa [#allocation17], 1 }
 0x87c   :  { %1860 = vsyncpa [#allocation20], 1 }
 0x87d   :  { %1861 = vsyncpa [#allocation6], 1 }
 0x87e   :  { %1863 = vsyncpa [#allocation6 + $0x1], 1 }

</bundles_post_ra>
